<compile_context>
chip_gen: v7x
topology: tpu7x:2x2x1
jax: 0.10.0
libtpu: 0.0.40
codegen_flags: <defaults>
</compile_context>

<pallas_src>
import functools

import jax
import jax.numpy as jnp
from jax.experimental import pallas as pl
from jax.experimental.pallas import tpu as pltpu


# ----------------------------- Pallas kernel ---------------------------------
def _msblock_kernel(x_ref, gamma_ref, beta_ref, wqkv_ref, bqkv_ref,
                    wproj_ref, bproj_ref, o_ref, qkv_scr, attn_scr, *,
                    num_heads, has_cls_embed, eps, block_rows, n_pad, n_valid):
    """One grid step = `block_rows` batch rows, flattened to a (block_rows*n_pad, C) slab.

    x_ref     : (R, C)      input tokens, R = block_rows * n_pad
    gamma/beta: (1, C)      LayerNorm affine params (f32)
    wqkv_ref  : (C, 3C)     qkv weight, pre-transposed, K columns pre-scaled, bf16
    bqkv_ref  : (1, 3C)     qkv bias (K slice pre-scaled), f32
    wproj_ref : (C, C)      attention output projection (in, out), bf16
    bproj_ref : (1, C)      projection bias, f32
    o_ref     : (R, C)      block output (x + attention branch)
    qkv_scr   : (R, 3C)     f32 VMEM scratch for the qkv slab
    attn_scr  : (R, C)      f32 VMEM scratch for the attention-branch output slab
    """
    C = x_ref.shape[1]
    H = num_heads
    hd = C // H

    x = x_ref[...].astype(jnp.float32)                    # (R, C)

    # ---- norm1 (LayerNorm over channels) over the whole slab ----
    mean = jnp.mean(x, axis=-1, keepdims=True)
    xc = x - mean
    var = jnp.mean(xc * xc, axis=-1, keepdims=True)
    xn = xc * jax.lax.rsqrt(var + eps) * gamma_ref[...] + beta_ref[...]   # (R, C)

    # ---- qkv projection: one (R, C) @ (C, 3C) bf16 MXU GEMM, f32 accumulate ----
    # (attention scale is already folded into the K columns of Wqkv / bqkv)
    qkv_scr[...] = jnp.dot(xn.astype(jnp.bfloat16), wqkv_ref[...],
                           preferred_element_type=jnp.float32) + bqkv_ref[...]

    # ---- constants hoisted out of the per-row loop ----
    if n_pad != n_valid:
        key_ids = jax.lax.broadcasted_iota(jnp.int32, (1, n_pad), 1)
        key_mask = jnp.where(key_ids < n_valid, 0.0, -1e9).astype(jnp.float32)
    else:
        key_mask = None
    if has_cls_embed:
        tok = jax.lax.broadcasted_iota(jnp.int32, (n_pad, 1), 0)
        res_mask = (tok > 0).astype(jnp.float32)           # 0 for cls token, 1 elsewhere
    else:
        res_mask = None

    # ---- per-batch-row attention core (fori_loop bounds live ranges) ----
    def row_body(b, carry):
        r0 = pl.multiple_of(b * n_pad, 8)
        qkv_row = qkv_scr[pl.ds(r0, n_pad), :]             # (n_pad, 3C) f32

        for h in range(H):                                  # static, tiny head loop
            lo = h * hd
            q_h = qkv_row[:, lo:lo + hd]                   # un-scaled q (lane slice)
            k_h = qkv_row[:, C + lo:C + lo + hd]           # pre-scaled k
            v_h = qkv_row[:, 2 * C + lo:2 * C + lo + hd]

            # scores: (n_pad, hd) x (n_pad, hd) contracting over hd -> (n_pad, n_pad)
            s = jax.lax.dot_general(
                q_h.astype(jnp.bfloat16), k_h.astype(jnp.bfloat16),
                (((1,), (1,)), ((), ())),
                preferred_element_type=jnp.float32)
            if key_mask is not None:
                s = s + key_mask                            # mask padded key columns
            s = s - jnp.max(s, axis=-1, keepdims=True)
            p = jnp.exp(s)
            p = p * pl.reciprocal(jnp.sum(p, axis=-1, keepdims=True), approx=True)

            o_h = jnp.dot(p.astype(jnp.bfloat16), v_h.astype(jnp.bfloat16),
                          preferred_element_type=jnp.float32)          # (n_pad, hd)

            # residual pooling: add un-scaled q (cls token excluded if present)
            if res_mask is not None:
                o_h = o_h + q_h * res_mask
            else:
                o_h = o_h + q_h

            attn_scr[pl.ds(r0, n_pad), lo:lo + hd] = o_h
        return carry

    jax.lax.fori_loop(0, block_rows, row_body, 0)

    # ---- attention output projection over the whole slab + outer skip (x_res == x) ----
    out = jnp.dot(attn_scr[...].astype(jnp.bfloat16), wproj_ref[...],
                  preferred_element_type=jnp.float32) + bproj_ref[...]
    o_ref[...] = (x + out).astype(o_ref.dtype)


# ------------------------------- wrapper --------------------------------------
def prepare_params(params, *, num_heads):
    """One-time parameter prep: transposes, scale folding, bf16 weight cast."""
    C = params["ln_gamma"].shape[0]
    hd = C // num_heads
    scale = hd ** -0.5

    wqkv_t = params["qkv_w"].T.astype(jnp.float32)         # (C, 3C)
    bqkv = params["qkv_b"].astype(jnp.float32)             # (3C,)
    # Fold the attention scale into the K block only (q stays unscaled for the residual).
    col_scale = jnp.concatenate([jnp.ones((C,), jnp.float32),
                                 jnp.full((C,), scale, jnp.float32),
                                 jnp.ones((C,), jnp.float32)])
    wqkv_t = wqkv_t * col_scale[None, :]
    bqkv = bqkv * col_scale

    return {
        "gamma": params["ln_gamma"].reshape(1, C).astype(jnp.float32),
        "beta": params["ln_beta"].reshape(1, C).astype(jnp.float32),
        "wqkv_t": wqkv_t.astype(jnp.bfloat16),             # bf16 MXU inputs
        "bqkv": bqkv.reshape(1, 3 * C).astype(jnp.float32),
        "wproj_t": params["proj_w"].T.astype(jnp.bfloat16),
        "bproj": params["proj_b"].reshape(1, C).astype(jnp.float32),
    }


def _pick_block_rows(B, n_pad, C):
    """Largest divisor of B that keeps >=4 grid steps (v7x megacore pipelining)
    and a modest per-step VMEM footprint."""
    best = 1
    for br in range(1, B + 1):
        if B % br:
            continue
        steps = B // br
        rows = br * n_pad
        vmem_bytes = rows * C * 4 * 6          # x/out double-buffered + qkv/attn scratch (approx)
        if steps >= min(4, B) and vmem_bytes <= (16 << 20):
            best = br
    return best


def multiscale_block(x, prep, *, num_heads, has_cls_embed=True, eps=1e-5,
                     block_rows=None):
    """Pallas implementation of MultiScaleBlock.forward (default config, eval mode)."""
    B, N, C = x.shape
    assert C % num_heads == 0

    n_pad = ((N + 7) // 8) * 8                 # 8-aligned token dim (65 -> 72)
    if n_pad != N:
        x_p = jnp.pad(x, ((0, 0), (0, n_pad - N), (0, 0)))
    else:
        x_p = x
    x2d = x_p.reshape(B * n_pad, C)            # contiguous collapse -> free

    if block_rows is None:
        block_rows = _pick_block_rows(B, n_pad, C)
    assert B % block_rows == 0
    rows = block_rows * n_pad
    grid = (B // block_rows,)

    kernel = functools.partial(
        _msblock_kernel, num_heads=num_heads, has_cls_embed=has_cls_embed,
        eps=eps, block_rows=block_rows, n_pad=n_pad, n_valid=N)

    out2d = pl.pallas_call(
        kernel,
        out_shape=jax.ShapeDtypeStruct((B * n_pad, C), x.dtype),
        grid_spec=pltpu.PrefetchScalarGridSpec(
            num_scalar_prefetch=0,
            grid=grid,
            in_specs=[
                pl.BlockSpec((rows, C), lambda b: (b, 0)),        # x slab
                pl.BlockSpec((1, C), lambda b: (0, 0)),           # gamma (resident)
                pl.BlockSpec((1, C), lambda b: (0, 0)),           # beta
                pl.BlockSpec((C, 3 * C), lambda b: (0, 0)),       # Wqkv (bf16)
                pl.BlockSpec((1, 3 * C), lambda b: (0, 0)),       # bqkv
                pl.BlockSpec((C, C), lambda b: (0, 0)),           # Wproj (bf16)
                pl.BlockSpec((1, C), lambda b: (0, 0)),           # bproj
            ],
            out_specs=pl.BlockSpec((rows, C), lambda b: (b, 0)),
            scratch_shapes=[
                pltpu.VMEM((rows, 3 * C), jnp.float32),           # qkv slab
                pltpu.VMEM((rows, C), jnp.float32),               # attention output slab
            ],
        ),
        compiler_params=pltpu.CompilerParams(
            dimension_semantics=("parallel",),
        ),
    )(x2d, prep["gamma"], prep["beta"], prep["wqkv_t"], prep["bqkv"],
      prep["wproj_t"], prep["bproj"])

    return out2d.reshape(B, n_pad, C)[:, :N, :]


# --------------------------- pure-JAX reference --------------------------------
def multiscale_block_ref(x, params, *, num_heads, has_cls_embed=True, eps=1e-5):
    B, N, C = x.shape
    hd = C // num_heads
    scale = hd ** -0.5

    mean = x.mean(-1, keepdims=True)
    var = ((x - mean) ** 2).mean(-1, keepdims=True)
    xn = (x - mean) / jnp.sqrt(var + eps) * params["ln_gamma"] + params["ln_beta"]

    qkv = xn @ params["qkv_w"].T + params["qkv_b"]
    qkv = qkv.reshape(B, N, 3, num_heads, hd).transpose(2, 0, 3, 1, 4)
    q, k, v = qkv[0], qkv[1], qkv[2]                       # (B, H, N, hd)

    attn = (q * scale) @ jnp.swapaxes(k, -2, -1)
    attn = jax.nn.softmax(attn, axis=-1)
    o = attn @ v

    if has_cls_embed:
        o = o.at[:, :, 1:, :].add(q[:, :, 1:, :])          # residual pooling (skip cls)
    else:
        o = o + q

    o = o.transpose(0, 2, 1, 3).reshape(B, N, C)
    o = o @ params["proj_w"].T + params["proj_b"]
    return x + o                                            # x_res = x (no pool_skip/pool_proj)


# ----------------------------------- main --------------------------------------
if __name__ == "__main__":
    num_heads = 4
    dim = 128                         # dim_c == dim_v (lane-dense: full 128-lane last dim)
    patches_shape = (8, 8)
    has_cls_embed = True
    N = patches_shape[0] * patches_shape[1] + (1 if has_cls_embed else 0)   # 65 tokens
    B = 8
    block_rows = 2                    # grid=(4,) -> >=2 steps per TensorCore on v7x

    key = jax.random.PRNGKey(0)
    k_x, k_g, k_b, k_w1, k_b1, k_w2, k_b2 = jax.random.split(key, 7)

    x = jax.random.normal(k_x, (B, N, dim), dtype=jnp.float32)

    params = {
        "ln_gamma": 1.0 + 0.1 * jax.random.normal(k_g, (dim,), dtype=jnp.float32),
        "ln_beta": 0.1 * jax.random.normal(k_b, (dim,), dtype=jnp.float32),
        # PyTorch Linear stores weight as (out, in); deterministic synthetic init.
        "qkv_w": 0.05 * jax.random.normal(k_w1, (3 * dim, dim), dtype=jnp.float32),
        "qkv_b": 0.05 * jax.random.normal(k_b1, (3 * dim,), dtype=jnp.float32),
        "proj_w": 0.05 * jax.random.normal(k_w2, (dim, dim), dtype=jnp.float32),
        "proj_b": 0.05 * jax.random.normal(k_b2, (dim,), dtype=jnp.float32),
    }

    prep = prepare_params(params, num_heads=num_heads)   # hoisted transposes / scale fold / bf16

    out = multiscale_block(x, prep, num_heads=num_heads,
                           has_cls_embed=has_cls_embed, block_rows=block_rows)
    out = jax.block_until_ready(out)

    ref = multiscale_block_ref(x, params, num_heads=num_heads,
                               has_cls_embed=has_cls_embed)
    assert out.shape == (B, N, dim)
    err = float(jnp.max(jnp.abs(out - ref)))
    # tolerance accounts for bf16 MXU inputs + pl.reciprocal(approx=True) in softmax
    assert jnp.allclose(out, ref, atol=3e-2, rtol=3e-2), f"max abs err {err}"

    print("KERNEL_OK")
</pallas_src>

<mosaic_0001>
module attributes {stable_mosaic.version = 11 : i64} {
  func.func @_msblock_kernel(%arg0: i32, %arg1: memref<144x128xf32, #tpu.memory_space<vmem>>, %arg2: memref<1x128xf32, #tpu.memory_space<vmem>>, %arg3: memref<1x128xf32, #tpu.memory_space<vmem>>, %arg4: memref<128x384xbf16, #tpu.memory_space<vmem>>, %arg5: memref<1x384xf32, #tpu.memory_space<vmem>>, %arg6: memref<128x128xbf16, #tpu.memory_space<vmem>>, %arg7: memref<1x128xf32, #tpu.memory_space<vmem>>, %arg8: memref<144x128xf32, #tpu.memory_space<vmem>>, %arg9: memref<144x384xf32, #tpu.memory_space<vmem>>, %arg10: memref<144x128xf32, #tpu.memory_space<vmem>>) attributes {dimension_semantics = [#tpu.dimension_semantics<parallel>], iteration_bounds = array<i64: 4>, scalar_prefetch = 0 : i64, scratch_operands = 2 : i64, tpu.core_type = #tpu.core_type<tc>, window_params = [{transform_indices = @transform_0, window_bounds = array<i64: 144, 128>}, {pipeline_mode = #tpu.pipeline_mode<synchronous>, transform_indices = @transform_1, window_bounds = array<i64: 1, 128>}, {pipeline_mode = #tpu.pipeline_mode<synchronous>, transform_indices = @transform_2, window_bounds = array<i64: 1, 128>}, {pipeline_mode = #tpu.pipeline_mode<synchronous>, transform_indices = @transform_3, window_bounds = array<i64: 128, 384>}, {pipeline_mode = #tpu.pipeline_mode<synchronous>, transform_indices = @transform_4, window_bounds = array<i64: 1, 384>}, {pipeline_mode = #tpu.pipeline_mode<synchronous>, transform_indices = @transform_5, window_bounds = array<i64: 128, 128>}, {pipeline_mode = #tpu.pipeline_mode<synchronous>, transform_indices = @transform_6, window_bounds = array<i64: 1, 128>}, {transform_indices = @transform_7, window_bounds = array<i64: 144, 128>}]} {
    %c0 = arith.constant 0 : index
    %c0_0 = arith.constant 0 : index
    %0 = vector.load %arg1[%c0, %c0_0] : memref<144x128xf32, #tpu.memory_space<vmem>>, vector<144x128xf32>
    %cst = arith.constant dense<0.000000e+00> : vector<144xf32>
    %1 = vector.multi_reduction <add>, %0, %cst [1] : vector<144x128xf32> to vector<144xf32>
    %2 = vector.shape_cast %1 : vector<144xf32> to vector<144x1xf32>
    %cst_1 = arith.constant 1.280000e+02 : f32
    %3 = vector.broadcast %cst_1 : f32 to vector<144x1xf32>
    %4 = arith.divf %2, %3 : vector<144x1xf32>
    %5 = vector.broadcast %4 : vector<144x1xf32> to vector<144x128xf32>
    %6 = arith.subf %0, %5 : vector<144x128xf32>
    %7 = arith.mulf %6, %6 : vector<144x128xf32>
    %cst_2 = arith.constant dense<0.000000e+00> : vector<144xf32>
    %8 = vector.multi_reduction <add>, %7, %cst_2 [1] : vector<144x128xf32> to vector<144xf32>
    %9 = vector.shape_cast %8 : vector<144xf32> to vector<144x1xf32>
    %cst_3 = arith.constant 1.280000e+02 : f32
    %10 = vector.broadcast %cst_3 : f32 to vector<144x1xf32>
    %11 = arith.divf %9, %10 : vector<144x1xf32>
    %cst_4 = arith.constant 9.99999974E-6 : f32
    %12 = vector.broadcast %cst_4 : f32 to vector<144x1xf32>
    %13 = arith.addf %11, %12 : vector<144x1xf32>
    %14 = math.rsqrt %13 : vector<144x1xf32>
    %15 = vector.broadcast %14 : vector<144x1xf32> to vector<144x128xf32>
    %16 = arith.mulf %6, %15 : vector<144x128xf32>
    %c0_5 = arith.constant 0 : index
    %c0_6 = arith.constant 0 : index
    %17 = vector.load %arg2[%c0_5, %c0_6] : memref<1x128xf32, #tpu.memory_space<vmem>>, vector<1x128xf32>
    %18 = vector.broadcast %17 : vector<1x128xf32> to vector<144x128xf32>
    %19 = arith.mulf %16, %18 : vector<144x128xf32>
    %c0_7 = arith.constant 0 : index
    %c0_8 = arith.constant 0 : index
    %20 = vector.load %arg3[%c0_7, %c0_8] : memref<1x128xf32, #tpu.memory_space<vmem>>, vector<1x128xf32>
    %21 = vector.broadcast %20 : vector<1x128xf32> to vector<144x128xf32>
    %22 = arith.addf %19, %21 : vector<144x128xf32>
    %23 = arith.truncf %22 : vector<144x128xf32> to vector<144x128xbf16>
    %c0_9 = arith.constant 0 : index
    %c0_10 = arith.constant 0 : index
    %24 = vector.load %arg4[%c0_9, %c0_10] : memref<128x384xbf16, #tpu.memory_space<vmem>>, vector<128x384xbf16>
    %cst_11 = arith.constant dense<0.000000e+00> : vector<144x384xf32>
    %25 = tpu.matmul %23, %24, %cst_11 {dimension_numbers = #tpu.dot_dimension_numbers<[1], [0], [0], [1], [0, 0, 1, 1], [], []>} : vector<144x128xbf16>, vector<128x384xbf16>, vector<144x384xf32> -> vector<144x384xf32>
    %c0_12 = arith.constant 0 : index
    %c0_13 = arith.constant 0 : index
    %26 = vector.load %arg5[%c0_12, %c0_13] : memref<1x384xf32, #tpu.memory_space<vmem>>, vector<1x384xf32>
    %27 = vector.broadcast %26 : vector<1x384xf32> to vector<144x384xf32>
    %28 = arith.addf %25, %27 : vector<144x384xf32>
    %c0_14 = arith.constant 0 : index
    %c0_15 = arith.constant 0 : index
    %29 = vector.load %arg9[%c0_14, %c0_15] : memref<144x384xf32, #tpu.memory_space<vmem>>, vector<144x384xf32>
    tpu.vector_store %arg9[%c0_14, %c0_15], %28 {strides = array<i32>} : memref<144x384xf32, #tpu.memory_space<vmem>>, vector<144x384xf32>,
    %30 = tpu.iota {dimensions = array<i32: 1>} : vector<1x72xi32>
    %c65_i32 = arith.constant 65 : i32
    %31 = vector.broadcast %c65_i32 : i32 to vector<1x72xi32>
    %32 = arith.cmpi slt, %30, %31 : vector<1x72xi32>
    %cst_16 = arith.constant 0.000000e+00 : f32
    %cst_17 = arith.constant -1.000000e+09 : f32
    %33 = vector.broadcast %cst_16 : f32 to vector<1x72xf32>
    %34 = vector.broadcast %cst_17 : f32 to vector<1x72xf32>
    %35 = arith.select %32, %33, %34 : vector<1x72xi1>, vector<1x72xf32>
    %36 = tpu.iota {dimensions = array<i32: 0>} : vector<72x1xi32>
    %c0_i32 = arith.constant 0 : i32
    %37 = vector.broadcast %c0_i32 : i32 to vector<72x1xi32>
    %38 = arith.cmpi sgt, %36, %37 : vector<72x1xi32>
    %39 = arith.extui %38 : vector<72x1xi1> to vector<72x1xi32>
    %40 = arith.sitofp %39 : vector<72x1xi32> to vector<72x1xf32>
    %c0_i32_18 = arith.constant 0 : i32
    %c2_i32 = arith.constant 2 : i32
    %41 = arith.addi %c0_i32_18, %c2_i32 : i32
    %c1_i32 = arith.constant 1 : i32
    scf.for %arg11 = %c0_i32_18 to %41 step %c1_i32  : i32 {
      %c72_i32 = arith.constant 72 : i32
      %51 = arith.muli %arg11, %c72_i32 : i32
      %52 = tpu.assume_multiple %51, 8 : i32
      %53 = arith.index_cast %52 : i32 to index
      %c0_29 = arith.constant 0 : index
      %54 = vector.load %arg9[%53, %c0_29] : memref<144x384xf32, #tpu.memory_space<vmem>>, vector<72x384xf32>
      %55 = vector.extract_strided_slice %54 {offsets = [0, 0], sizes = [72, 32], strides = [1, 1]} : vector<72x384xf32> to vector<72x32xf32>
      %56 = vector.extract_strided_slice %54 {offsets = [0, 128], sizes = [72, 32], strides = [1, 1]} : vector<72x384xf32> to vector<72x32xf32>
      %57 = vector.extract_strided_slice %54 {offsets = [0, 256], sizes = [72, 32], strides = [1, 1]} : vector<72x384xf32> to vector<72x32xf32>
      %58 = arith.truncf %55 : vector<72x32xf32> to vector<72x32xbf16>
      %59 = arith.truncf %56 : vector<72x32xf32> to vector<72x32xbf16>
      %cst_30 = arith.constant dense<0.000000e+00> : vector<72x72xf32>
      %60 = tpu.matmul %58, %59, %cst_30 {dimension_numbers = #tpu.dot_dimension_numbers<[1], [1], [0], [0], [0, 0, 1, 0], [], []>} : vector<72x32xbf16>, vector<72x32xbf16>, vector<72x72xf32> -> vector<72x72xf32>
      %61 = vector.broadcast %35 : vector<1x72xf32> to vector<72x72xf32>
      %62 = arith.addf %60, %61 : vector<72x72xf32>
      %cst_31 = arith.constant dense<0xFF800000> : vector<72xf32>
      %63 = vector.multi_reduction <maximumf>, %62, %cst_31 [1] : vector<72x72xf32> to vector<72xf32>
      %64 = vector.shape_cast %63 : vector<72xf32> to vector<72x1xf32>
      %65 = vector.broadcast %64 : vector<72x1xf32> to vector<72x72xf32>
      %66 = arith.subf %62, %65 : vector<72x72xf32>
      %67 = math.exp %66 : vector<72x72xf32>
      %cst_32 = arith.constant dense<0.000000e+00> : vector<72xf32>
      %68 = vector.multi_reduction <add>, %67, %cst_32 [1] : vector<72x72xf32> to vector<72xf32>
      %69 = vector.shape_cast %68 : vector<72xf32> to vector<72x1xf32>
      %70 = tpu.reciprocal %69 {approx = true} : vector<72x1xf32> -> vector<72x1xf32>
      %71 = vector.broadcast %70 : vector<72x1xf32> to vector<72x72xf32>
      %72 = arith.mulf %67, %71 : vector<72x72xf32>
      %73 = arith.truncf %72 : vector<72x72xf32> to vector<72x72xbf16>
      %74 = arith.truncf %57 : vector<72x32xf32> to vector<72x32xbf16>
      %cst_33 = arith.constant dense<0.000000e+00> : vector<72x32xf32>
      %75 = tpu.matmul %73, %74, %cst_33 {dimension_numbers = #tpu.dot_dimension_numbers<[1], [0], [0], [1], [0, 0, 1, 1], [], []>} : vector<72x72xbf16>, vector<72x32xbf16>, vector<72x32xf32> -> vector<72x32xf32>
      %76 = vector.broadcast %40 : vector<72x1xf32> to vector<72x32xf32>
      %77 = arith.mulf %55, %76 : vector<72x32xf32>
      %78 = arith.addf %75, %77 : vector<72x32xf32>
      %79 = arith.index_cast %52 : i32 to index
      %c0_34 = arith.constant 0 : index
      %80 = vector.load %arg10[%79, %c0_34] : memref<144x128xf32, #tpu.memory_space<vmem>>, vector<72x32xf32>
      tpu.vector_store %arg10[%79, %c0_34], %78 {strides = array<i32>} : memref<144x128xf32, #tpu.memory_space<vmem>>, vector<72x32xf32>,
      %81 = vector.extract_strided_slice %54 {offsets = [0, 32], sizes = [72, 32], strides = [1, 1]} : vector<72x384xf32> to vector<72x32xf32>
      %82 = vector.extract_strided_slice %54 {offsets = [0, 160], sizes = [72, 32], strides = [1, 1]} : vector<72x384xf32> to vector<72x32xf32>
      %83 = vector.extract_strided_slice %54 {offsets = [0, 288], sizes = [72, 32], strides = [1, 1]} : vector<72x384xf32> to vector<72x32xf32>
      %84 = arith.truncf %81 : vector<72x32xf32> to vector<72x32xbf16>
      %85 = arith.truncf %82 : vector<72x32xf32> to vector<72x32xbf16>
      %cst_35 = arith.constant dense<0.000000e+00> : vector<72x72xf32>
      %86 = tpu.matmul %84, %85, %cst_35 {dimension_numbers = #tpu.dot_dimension_numbers<[1], [1], [0], [0], [0, 0, 1, 0], [], []>} : vector<72x32xbf16>, vector<72x32xbf16>, vector<72x72xf32> -> vector<72x72xf32>
      %87 = vector.broadcast %35 : vector<1x72xf32> to vector<72x72xf32>
      %88 = arith.addf %86, %87 : vector<72x72xf32>
      %cst_36 = arith.constant dense<0xFF800000> : vector<72xf32>
      %89 = vector.multi_reduction <maximumf>, %88, %cst_36 [1] : vector<72x72xf32> to vector<72xf32>
      %90 = vector.shape_cast %89 : vector<72xf32> to vector<72x1xf32>
      %91 = vector.broadcast %90 : vector<72x1xf32> to vector<72x72xf32>
      %92 = arith.subf %88, %91 : vector<72x72xf32>
      %93 = math.exp %92 : vector<72x72xf32>
      %cst_37 = arith.constant dense<0.000000e+00> : vector<72xf32>
      %94 = vector.multi_reduction <add>, %93, %cst_37 [1] : vector<72x72xf32> to vector<72xf32>
      %95 = vector.shape_cast %94 : vector<72xf32> to vector<72x1xf32>
      %96 = tpu.reciprocal %95 {approx = true} : vector<72x1xf32> -> vector<72x1xf32>
      %97 = vector.broadcast %96 : vector<72x1xf32> to vector<72x72xf32>
      %98 = arith.mulf %93, %97 : vector<72x72xf32>
      %99 = arith.truncf %98 : vector<72x72xf32> to vector<72x72xbf16>
      %100 = arith.truncf %83 : vector<72x32xf32> to vector<72x32xbf16>
      %cst_38 = arith.constant dense<0.000000e+00> : vector<72x32xf32>
      %101 = tpu.matmul %99, %100, %cst_38 {dimension_numbers = #tpu.dot_dimension_numbers<[1], [0], [0], [1], [0, 0, 1, 1], [], []>} : vector<72x72xbf16>, vector<72x32xbf16>, vector<72x32xf32> -> vector<72x32xf32>
      %102 = vector.broadcast %40 : vector<72x1xf32> to vector<72x32xf32>
      %103 = arith.mulf %81, %102 : vector<72x32xf32>
      %104 = arith.addf %101, %103 : vector<72x32xf32>
      %105 = arith.index_cast %52 : i32 to index
      %c32 = arith.constant 32 : index
      %106 = vector.load %arg10[%105, %c32] : memref<144x128xf32, #tpu.memory_space<vmem>>, vector<72x32xf32>
      tpu.vector_store %arg10[%105, %c32], %104 {strides = array<i32>} : memref<144x128xf32, #tpu.memory_space<vmem>>, vector<72x32xf32>,
      %107 = vector.extract_strided_slice %54 {offsets = [0, 64], sizes = [72, 32], strides = [1, 1]} : vector<72x384xf32> to vector<72x32xf32>
      %108 = vector.extract_strided_slice %54 {offsets = [0, 192], sizes = [72, 32], strides = [1, 1]} : vector<72x384xf32> to vector<72x32xf32>
      %109 = vector.extract_strided_slice %54 {offsets = [0, 320], sizes = [72, 32], strides = [1, 1]} : vector<72x384xf32> to vector<72x32xf32>
      %110 = arith.truncf %107 : vector<72x32xf32> to vector<72x32xbf16>
      %111 = arith.truncf %108 : vector<72x32xf32> to vector<72x32xbf16>
      %cst_39 = arith.constant dense<0.000000e+00> : vector<72x72xf32>
      %112 = tpu.matmul %110, %111, %cst_39 {dimension_numbers = #tpu.dot_dimension_numbers<[1], [1], [0], [0], [0, 0, 1, 0], [], []>} : vector<72x32xbf16>, vector<72x32xbf16>, vector<72x72xf32> -> vector<72x72xf32>
      %113 = vector.broadcast %35 : vector<1x72xf32> to vector<72x72xf32>
      %114 = arith.addf %112, %113 : vector<72x72xf32>
      %cst_40 = arith.constant dense<0xFF800000> : vector<72xf32>
      %115 = vector.multi_reduction <maximumf>, %114, %cst_40 [1] : vector<72x72xf32> to vector<72xf32>
      %116 = vector.shape_cast %115 : vector<72xf32> to vector<72x1xf32>
      %117 = vector.broadcast %116 : vector<72x1xf32> to vector<72x72xf32>
      %118 = arith.subf %114, %117 : vector<72x72xf32>
      %119 = math.exp %118 : vector<72x72xf32>
      %cst_41 = arith.constant dense<0.000000e+00> : vector<72xf32>
      %120 = vector.multi_reduction <add>, %119, %cst_41 [1] : vector<72x72xf32> to vector<72xf32>
      %121 = vector.shape_cast %120 : vector<72xf32> to vector<72x1xf32>
      %122 = tpu.reciprocal %121 {approx = true} : vector<72x1xf32> -> vector<72x1xf32>
      %123 = vector.broadcast %122 : vector<72x1xf32> to vector<72x72xf32>
      %124 = arith.mulf %119, %123 : vector<72x72xf32>
      %125 = arith.truncf %124 : vector<72x72xf32> to vector<72x72xbf16>
      %126 = arith.truncf %109 : vector<72x32xf32> to vector<72x32xbf16>
      %cst_42 = arith.constant dense<0.000000e+00> : vector<72x32xf32>
      %127 = tpu.matmul %125, %126, %cst_42 {dimension_numbers = #tpu.dot_dimension_numbers<[1], [0], [0], [1], [0, 0, 1, 1], [], []>} : vector<72x72xbf16>, vector<72x32xbf16>, vector<72x32xf32> -> vector<72x32xf32>
      %128 = vector.broadcast %40 : vector<72x1xf32> to vector<72x32xf32>
      %129 = arith.mulf %107, %128 : vector<72x32xf32>
      %130 = arith.addf %127, %129 : vector<72x32xf32>
      %131 = arith.index_cast %52 : i32 to index
      %c64 = arith.constant 64 : index
      %132 = vector.load %arg10[%131, %c64] : memref<144x128xf32, #tpu.memory_space<vmem>>, vector<72x32xf32>
      tpu.vector_store %arg10[%131, %c64], %130 {strides = array<i32>} : memref<144x128xf32, #tpu.memory_space<vmem>>, vector<72x32xf32>,
      %133 = vector.extract_strided_slice %54 {offsets = [0, 96], sizes = [72, 32], strides = [1, 1]} : vector<72x384xf32> to vector<72x32xf32>
      %134 = vector.extract_strided_slice %54 {offsets = [0, 224], sizes = [72, 32], strides = [1, 1]} : vector<72x384xf32> to vector<72x32xf32>
      %135 = vector.extract_strided_slice %54 {offsets = [0, 352], sizes = [72, 32], strides = [1, 1]} : vector<72x384xf32> to vector<72x32xf32>
      %136 = arith.truncf %133 : vector<72x32xf32> to vector<72x32xbf16>
      %137 = arith.truncf %134 : vector<72x32xf32> to vector<72x32xbf16>
      %cst_43 = arith.constant dense<0.000000e+00> : vector<72x72xf32>
      %138 = tpu.matmul %136, %137, %cst_43 {dimension_numbers = #tpu.dot_dimension_numbers<[1], [1], [0], [0], [0, 0, 1, 0], [], []>} : vector<72x32xbf16>, vector<72x32xbf16>, vector<72x72xf32> -> vector<72x72xf32>
      %139 = vector.broadcast %35 : vector<1x72xf32> to vector<72x72xf32>
      %140 = arith.addf %138, %139 : vector<72x72xf32>
      %cst_44 = arith.constant dense<0xFF800000> : vector<72xf32>
      %141 = vector.multi_reduction <maximumf>, %140, %cst_44 [1] : vector<72x72xf32> to vector<72xf32>
      %142 = vector.shape_cast %141 : vector<72xf32> to vector<72x1xf32>
      %143 = vector.broadcast %142 : vector<72x1xf32> to vector<72x72xf32>
      %144 = arith.subf %140, %143 : vector<72x72xf32>
      %145 = math.exp %144 : vector<72x72xf32>
      %cst_45 = arith.constant dense<0.000000e+00> : vector<72xf32>
      %146 = vector.multi_reduction <add>, %145, %cst_45 [1] : vector<72x72xf32> to vector<72xf32>
      %147 = vector.shape_cast %146 : vector<72xf32> to vector<72x1xf32>
      %148 = tpu.reciprocal %147 {approx = true} : vector<72x1xf32> -> vector<72x1xf32>
      %149 = vector.broadcast %148 : vector<72x1xf32> to vector<72x72xf32>
      %150 = arith.mulf %145, %149 : vector<72x72xf32>
      %151 = arith.truncf %150 : vector<72x72xf32> to vector<72x72xbf16>
      %152 = arith.truncf %135 : vector<72x32xf32> to vector<72x32xbf16>
      %cst_46 = arith.constant dense<0.000000e+00> : vector<72x32xf32>
      %153 = tpu.matmul %151, %152, %cst_46 {dimension_numbers = #tpu.dot_dimension_numbers<[1], [0], [0], [1], [0, 0, 1, 1], [], []>} : vector<72x72xbf16>, vector<72x32xbf16>, vector<72x32xf32> -> vector<72x32xf32>
      %154 = vector.broadcast %40 : vector<72x1xf32> to vector<72x32xf32>
      %155 = arith.mulf %133, %154 : vector<72x32xf32>
      %156 = arith.addf %153, %155 : vector<72x32xf32>
      %157 = arith.index_cast %52 : i32 to index
      %c96 = arith.constant 96 : index
      %158 = vector.load %arg10[%157, %c96] : memref<144x128xf32, #tpu.memory_space<vmem>>, vector<72x32xf32>
      tpu.vector_store %arg10[%157, %c96], %156 {strides = array<i32>} : memref<144x128xf32, #tpu.memory_space<vmem>>, vector<72x32xf32>,
    }
    %c2_i32_19 = arith.constant 2 : i32
    %c0_20 = arith.constant 0 : index
    %c0_21 = arith.constant 0 : index
    %42 = vector.load %arg10[%c0_20, %c0_21] : memref<144x128xf32, #tpu.memory_space<vmem>>, vector<144x128xf32>
    %43 = arith.truncf %42 : vector<144x128xf32> to vector<144x128xbf16>
    %c0_22 = arith.constant 0 : index
    %c0_23 = arith.constant 0 : index
    %44 = vector.load %arg6[%c0_22, %c0_23] : memref<128x128xbf16, #tpu.memory_space<vmem>>, vector<128x128xbf16>
    %cst_24 = arith.constant dense<0.000000e+00> : vector<144x128xf32>
    %45 = tpu.matmul %43, %44, %cst_24 {dimension_numbers = #tpu.dot_dimension_numbers<[1], [0], [0], [1], [0, 0, 1, 1], [], []>} : vector<144x128xbf16>, vector<128x128xbf16>, vector<144x128xf32> -> vector<144x128xf32>
    %c0_25 = arith.constant 0 : index
    %c0_26 = arith.constant 0 : index
    %46 = vector.load %arg7[%c0_25, %c0_26] : memref<1x128xf32, #tpu.memory_space<vmem>>, vector<1x128xf32>
    %47 = vector.broadcast %46 : vector<1x128xf32> to vector<144x128xf32>
    %48 = arith.addf %45, %47 : vector<144x128xf32>
    %49 = arith.addf %0, %48 : vector<144x128xf32>
    %c0_27 = arith.constant 0 : index
    %c0_28 = arith.constant 0 : index
    %50 = vector.load %arg8[%c0_27, %c0_28] : memref<144x128xf32, #tpu.memory_space<vmem>>, vector<144x128xf32>
    tpu.vector_store %arg8[%c0_27, %c0_28], %49 {strides = array<i32>} : memref<144x128xf32, #tpu.memory_space<vmem>>, vector<144x128xf32>,
    return
  }
  func.func @transform_0(%arg0: i32) -> (i32, i32) {
    %c0_i32 = arith.constant 0 : i32
    %c0_i32_0 = arith.constant 0 : i32
    return %arg0, %c0_i32 : i32, i32
  }
  func.func @transform_1(%arg0: i32) -> (i32, i32) {
    %c0_i32 = arith.constant 0 : i32
    %c0_i32_0 = arith.constant 0 : i32
    %c0_i32_1 = arith.constant 0 : i32
    return %c0_i32, %c0_i32_0 : i32, i32
  }
  func.func @transform_2(%arg0: i32) -> (i32, i32) {
    %c0_i32 = arith.constant 0 : i32
    %c0_i32_0 = arith.constant 0 : i32
    %c0_i32_1 = arith.constant 0 : i32
    return %c0_i32, %c0_i32_0 : i32, i32
  }
  func.func @transform_3(%arg0: i32) -> (i32, i32) {
    %c0_i32 = arith.constant 0 : i32
    %c0_i32_0 = arith.constant 0 : i32
    %c0_i32_1 = arith.constant 0 : i32
    return %c0_i32, %c0_i32_0 : i32, i32
  }
  func.func @transform_4(%arg0: i32) -> (i32, i32) {
    %c0_i32 = arith.constant 0 : i32
    %c0_i32_0 = arith.constant 0 : i32
    %c0_i32_1 = arith.constant 0 : i32
    return %c0_i32, %c0_i32_0 : i32, i32
  }
  func.func @transform_5(%arg0: i32) -> (i32, i32) {
    %c0_i32 = arith.constant 0 : i32
    %c0_i32_0 = arith.constant 0 : i32
    %c0_i32_1 = arith.constant 0 : i32
    return %c0_i32, %c0_i32_0 : i32, i32
  }
  func.func @transform_6(%arg0: i32) -> (i32, i32) {
    %c0_i32 = arith.constant 0 : i32
    %c0_i32_0 = arith.constant 0 : i32
    %c0_i32_1 = arith.constant 0 : i32
    return %c0_i32, %c0_i32_0 : i32, i32
  }
  func.func @transform_7(%arg0: i32) -> (i32, i32) {
    %c0_i32 = arith.constant 0 : i32
    %c0_i32_0 = arith.constant 0 : i32
    return %arg0, %c0_i32 : i32, i32
  }
}

</mosaic_0001>

<bundles_post_ra>
// kernel: tpu_custom_call.1
= control target key start
LH: loop header
LB: loop body
LE: loop exit
PB: predicated region body
PF: predicated region fallthrough
CT: control target
= control target key end

     0   :  { %s5843_s0 = inlined_call_operand.hbm [shape: f32[576,128], index: 0, kind: input, shape index: {}]   ;;  %s5844_s1 = inlined_call_operand.vmem [shape: f32[1,128], index: 1, kind: input, shape index: {}]   ;;  %s5845_s2 = inlined_call_operand.vmem [shape: f32[1,128], index: 2, kind: input, shape index: {}]   ;;  %s5846_s3 = inlined_call_operand.hbm [shape: bf16[128,384], index: 3, kind: input, shape index: {}]   ;;  %s5847_s4 = inlined_call_operand.vmem [shape: f32[1,384], index: 4, kind: input, shape index: {}]   ;;  %s5848_s5 = inlined_call_operand.hbm [shape: bf16[128,128], index: 5, kind: input, shape index: {}]   ;;  %s5849_s6 = inlined_call_operand.vmem [shape: f32[1,128], index: 6, kind: input, shape index: {}]   ;;  %s5850_s7 = inlined_call_operand.hbm [shape: f32[576,128], index: 7, kind: output, shape index: {}]  }
   0x1   :  { %5873 = sst [smem:[#allocation29_spill]] %s5846_s3 }
   0x2   :  { %12 = vsyncpa [#allocation5], 0 }
   0x3   :  { %14 = vsyncpa [#allocation5 + $0x1], 0 }
   0x4   :  { %15 = vsyncpa [#allocation8], 0 }
   0x5   :  { %16 = vsyncpa [#allocation6], 0 }
   0x6   :  { %18 = vsyncpa [#allocation6 + $0x1], 0  ;;  %s4189_s24 = smov 0   ;;  %s4191_s25 = smov 0  }
   0x7   :  { %s4193_s26 = smov 0   ;;  %s4195_s27 = smov 0  }
   0x8 LB: > { %s4210_s28 = sadd.s32 4294967295, %s4122_s27   ;;  %s3064_s29 = sadd.s32 4294967294, %s4122_s27   ;;  %s4122_s27 = sphi %s4195_s27, %s5923_s27   ;;  %s4118_s26 = sphi %s4193_s26, %s5922_s26   ;;  %s4114_s25 = sphi %s4191_s25, %s5921_s25   ;;  %s4110_s24 = sphi %s4189_s24, %s5920_s24  }
   0x9   : > { %p44_p0 = scmp.ne.s32.totalorder %s4114_s25, %s4110_s24  ;;  %p5851_p1 = scmp.eq.s32.totalorder %s4210_s28, 0 }
   0xa   : > { %p200_p3 = scmp.eq.s32.totalorder %s3064_s29, 3  ;;  %p3065_p5 = scmp.ge.s32.totalorder %s4122_s27, 1 }
   0xb   : > { %p4219_p4 = por %p5851_p1, %p44_p0  ;;  %p207_p7 = scmp.lt.s32.totalorder %s4122_s27, 5 }
   0xc   : > { %p4224_p6 = por %p200_p3, %p44_p0  ;;  %s4128_s10 = smov [#allocation7]  }
   0xd   : > { %s5874_s30 = scalar_select %p4219_p4, 1, 0 }
   0xe   : > { %s5875_s8 = scalar_select %p4224_p6, 1, 0 }
   0xf   : > { %p4229_p8 = pnand %p3065_p5, %p207_p7  ;;  %s225_s11 = sshll.u32 %s4128_s10, 4  ;;  %s226_s11 = int_to_ptr.vmem [resolvable:$true] %s225_s11 }
  0x10   : > { %s4129_s13 = smov [#allocation9]   ;;  %s5878_s3 = sld [smem:[#allocation29_spill]] }
  0x11   : > { %s5876_s9 = scalar_select %p4229_p8, 1, 0 }
  0x12   : > { %p3654_p9 = pneg %p4229_p8  ;;  %s241_s14 = sshll.u32 %s4129_s13, 4  ;;  %s4241_s14 = int_to_ptr.vmem [resolvable:$true] %s241_s14 }
  0x14   : > { %p4237_p10 = pnand %p3654_p9, %p5851_p1 }
  0x16   : > { %s3962_s17 = scalar_lea.hbm %s5878_s3, 3072  ;;  %p3964_p12 = pneg %p4237_p10 }
  0x17   : > { %p3963_p11 = scmp.ne.s32.totalorder %s5878_s3, %s3962_s17  ;;  %p3969_p3 = scmp.lt.u32.totalorder %s3962_s17, %s5878_s3 }
  0x19   : > { %p3965_p13 = pnand %p3964_p12, %p3963_p11 }
  0x1b   : > { %p3966_p0 = pneg %p3965_p13 }
  0x1d   : > { %p3971_p5 = pnand %p3969_p3, %p3966_p0 }
  0x1f   : > { %3974 = shalt.err (!%p3971_p5)
}
  0x20   : > { %s3975_s22 = scalar_lea.vmem %s226_s11, 3072  ;;  %p3983_p2 = scmp.lt.s32.totalorder %s226_s11, %s226_s11 }
  0x21   : > { %p3976_p7 = scmp.ne.s32.totalorder %s226_s11, %s3975_s22  ;;  %p3984_p6 = scmp.lt.s32.totalorder %s3975_s22, %s3975_s22 }
  0x23   : > { %p3978_p9 = pnand %p3976_p7, %p3964_p12  ;;  %p3985_p4 = por %p3984_p6, %p3983_p2 }
  0x25   : > { %p3979_p1 = pneg %p3978_p9 }
  0x27   : > { %p3986_p8 = pnand %p3985_p4, %p3979_p1 }
  0x29   : > { %3989 = shalt.err (!%p3986_p8)
}
  0x2a   : > { %s4130_s23 = smov 192   ;;  %s4131_s29 = smov 12  }
  0x2b   : > { %3657 = dma.hbm_to_vmem [thread:$0]  (!%p4237_p10), %s5878_s3, 3072, %s226_s11, [#allocation8], %s4130_s23, %s4130_s23, %s4131_s29  }
  0x2c   : > { %s3990_s17 = scalar_lea.hbm %s5848_s5, 1024 }
  0x2d   : > { %p3991_p11 = scmp.ne.s32.totalorder %s5848_s5, %s3990_s17  ;;  %p3997_p4 = scmp.lt.u32.totalorder %s3990_s17, %s5848_s5 }
  0x2f   : > { %p3993_p1 = pnand %p3991_p11, %p3964_p12 }
  0x31   : > { %p3994_p2 = pneg %p3993_p1 }
  0x33   : > { %p3999_p6 = pnand %p3997_p4, %p3994_p2 }
  0x35   : > { %4002 = shalt.err (!%p3999_p6)
}
  0x36   : > { %s4003_s11 = scalar_lea.vmem %s4241_s14, 1024  ;;  %p4011_p3 = scmp.lt.s32.totalorder %s4241_s14, %s4241_s14 }
  0x37   : > { %p4004_p8 = scmp.ne.s32.totalorder %s4241_s14, %s4003_s11  ;;  %p4012_p5 = scmp.lt.s32.totalorder %s4003_s11, %s4003_s11 }
  0x39   : > { %p4006_p13 = pnand %p4004_p8, %p3964_p12  ;;  %p4013_p7 = por %p4012_p5, %p4011_p3 }
  0x3b   : > { %p4007_p0 = pneg %p4006_p13 }
  0x3d   : > { %p4014_p9 = pnand %p4013_p7, %p4007_p0 }
  0x3f   : > { %4017 = shalt.err (!%p4014_p9)
}
  0x40   : > { %s4132_s22 = smov 64   ;;  %s4133_s23 = smov 4  }
  0x41   : > { %3660 = dma.hbm_to_vmem [thread:$0]  (!%p4237_p10), %s5848_s5, 1024, %s4241_s14, [#allocation8], %s4132_s22, %s4132_s22, %s4133_s23  }
  0x42   : > { %s4291_s13 = sadd.s32 1, %s4122_s27   ;;  %s31_s16 = sadd.s32 1, %s4118_s26 }
  0x43   : > { %s28_s15 = ssub.s32 %s4122_s27, %s4291_s13  ;;  %p38_p11 = scmp.ne.s32.totalorder %s4118_s26, %s4114_s25 }
  0x44   : > { %p29_p12 = scmp.eq.s32.totalorder %s28_s15, 0  ;;  %p39_p1 = scmp.eq.s32.totalorder %s4122_s27, 0 }
  0x45   : > { %p5879_p4 = scmp.eq.s32.totalorder %s4210_s28, 3  ;;  %p3671_p8 = scmp.lt.s32.totalorder %s4122_s27, 4 }
  0x46   : > { %s4300_s17 = scalar_select %p29_p12, %s4118_s26, %s31_s16  }
  0x47   : > { %p40_p2 = por %p39_p1, %p38_p11  ;;  %p4304_p6 = por %p5879_p4, %p38_p11 }
  0x48   : > { %s258_s12 = sand.u32 1, %s4118_s26   ;;  %s3153_s14 = smul.u32 2304, %s4122_s27 }
  0x49   : > { %s3640_s19 = smul.u32 144, %s258_s12  ;;  %p4311_p10 = pnand %p3671_p8, %p40_p2 }
  0x4a   : > { %s4318_s22 = scalar_lea.hbm %s5843_s0, %s3153_s14  ;;  %s4322_s10 = scalar_lea.sflag [#allocation5], %s258_s12 }
  0x4b   : > { %s262_s23 = scalar_lea.vmem [#allocation4], %s3640_s19  ;;  %s4018_s15 = scalar_lea.hbm %s4318_s22, 2304 }
  0x4c   : > { %s269_s29 = sshll.u32 %s262_s23, 4  ;;  %p4019_p13 = scmp.ne.s32.totalorder %s4318_s22, %s4018_s15  ;;  %s4320_s29 = int_to_ptr.vmem [resolvable:$true] %s269_s29 }
  0x4d   : > { %p4020_p0 = pneg %p4311_p10  ;;  %s4023_s21 = scalar_lea.hbm %s5843_s0, 9216 }
  0x4e   : > { %p4024_p7 = scmp.lt.u32.totalorder %s4318_s22, %s5843_s0  ;;  %p4025_p9 = scmp.lt.u32.totalorder %s4023_s21, %s4018_s15 }
  0x4f   : > { %p4021_p3 = pnand %p4020_p0, %p4019_p13  ;;  %p4027_p11 = scmp.lt.u32.totalorder %s4018_s15, %s4318_s22 }
  0x50   : > { %p4026_p12 = por %p4025_p9, %p4024_p7 }
  0x51   : > { %p4022_p5 = pneg %p4021_p3 }
  0x52   : > { %p4028_p1 = por %p4027_p11, %p4026_p12 }
  0x54   : > { %p4029_p2 = pnand %p4028_p1, %p4022_p5 }
  0x56   : > { %4032 = shalt.err (!%p4029_p2)
}
  0x57   : > { %s4033_s12 = scalar_lea.vmem %s4320_s29, 2304  ;;  %s4134_s19 = smov [#allocation4]  }
  0x58   : > { %p4034_p4 = scmp.ne.s32.totalorder %s4320_s29, %s4033_s12  ;;  %s4038_s23 = sshll.u32 %s4134_s19, 4  ;;  %s4039_s23 = int_to_ptr.vmem [resolvable:$false] %s4038_s23 }
  0x59   : > { %s4040_s3 = scalar_lea.vmem %s4039_s23, 4608  ;;  %p4041_p3 = scmp.lt.s32.totalorder %s4320_s29, %s4039_s23 }
  0x5a   : > { %p4036_p8 = pnand %p4034_p4, %p4020_p0  ;;  %p4042_p7 = scmp.lt.s32.totalorder %s4040_s3, %s4033_s12 }
  0x5c   : > { %p4037_p13 = pneg %p4036_p8  ;;  %p4043_p9 = por %p4042_p7, %p4041_p3 }
  0x5e   : > { %p4044_p12 = pnand %p4043_p9, %p4037_p13 }
  0x60   : > { %4047 = shalt.err (!%p4044_p12)
}
  0x61   : > { %s4135_s15 = smov 128   ;;  %s4136_s16 = smov 8  }
  0x62   : > { %3664 = dma.hbm_to_vmem [thread:$0]  (!%p4311_p10), %s4318_s22, 2304, %s4320_s29, %s4322_s10, %s4135_s15, %s4135_s15, %s4136_s16  }
  0x63   : > { %p5882_p0 = scmp.ne.s32.totalorder %s5876_s9, 0 }
  0x65   : > { %281 = sbr.rel (%p5882_p0) target bundleno = 2680 (0xa78), region = 48 }
  0x6c   : > { %s4353_s14 = sand.u32 1, %s4114_s25   ;;  %p5883_p5 = scmp.ne.s32.totalorder %s5874_s30, 0 }
  0x6d   : > { %s3641_s21 = smul.u32 144, %s4353_s14  ;;  %s284_s11 = scalar_lea.sflag [#allocation5], %s4353_s14 }
  0x6f   : > { %s4359_s12 = scalar_lea.vmem [#allocation4], %s3641_s21 }
  0x70   : > { %4097 = dma.done.wait (%p5883_p5), %s284_s11, 2304  }
  0x71   : > { %4099 = vsyncadd (%p5883_p5), %s284_s11, 4294964992  ;;  %p5884_p10 = scmp.eq.s32.totalorder %s4210_s28, 0 }
  0x73   : > { %4101 = dma.done.wait (%p5884_p10), [#allocation8], 4096   ;;  %p5885_p11 = pmov %p5884_p10 }
  0x74   : > { %v4370_v0 = vld [vmem:[%s4359_s12] sm:$0xff]  ;;  %v4373_v1 = vld [vmem:[%s4359_s12 + $0x10] sm:$0xff]  ;;  %v4378_v2 = vld [vmem:[%s4359_s12 + $0x8] sm:$0xff]  ;;  %v5854_v19 = vlaneseq  ;;  %v5855_v21 = vmov 0.0   ;;  %vm4139_vm1 = vmmov 0   ;;  %s4711_s19 = scalar_lea.vmem [#allocation10], %s3641_s21 }
  0x75   : > { %4103 = vsyncadd (%p5885_p11), [#allocation8], 4294963200  ;;  %347 = vadd.xlane.f32.xlu0 %v4370_v0  ;;  %351 = vadd.xlane.f32.xlu1 %v4373_v1  ;;  %v4381_v3 = vld [vmem:[%s4359_s12 + $0x18] sm:$0xff]  ;;  %v4386_v4 = vld [vmem:[%s4359_s12 + $0x20] sm:$0xff]  ;;  %s4713_s23 = smov 0  }
  0x76   : > { %5886 = vst [vmem:[#allocation14_spill] sm:$0xff] %v4381_v3  ;;  %5887 = vst [vmem:[#allocation15_spill] sm:$0xff] %v4386_v4  ;;  %v4389_v5 = vld [vmem:[%s4359_s12 + $0x28] sm:$0xff]  ;;  %v4392_v6 = vld [vmem:[%s4359_s12 + $0x30] sm:$0xff]  ;;  %3270 = vmatprep.subr.bf16.mxu1 %v5855_v21  ;;  %v4443_v24 = vshrl.u32 %v5854_v19, 7  ;;  %3286 = vmatprep.mubr.msk.bf16.mxu1 %vm4139_vm1, %v5855_v21 }
  0x77   : > { %5888 = vst [vmem:[#allocation16_spill] sm:$0xff] %v4389_v5  ;;  %5889 = vst [vmem:[#allocation17_spill] sm:$0xff] %v4392_v6  ;;  %v4395_v7 = vld [vmem:[%s4359_s12 + $0x38] sm:$0xff]  ;;  %v4400_v8 = vld [vmem:[%s4359_s12 + $0x40] sm:$0xff] }
  0x78   : > { %5890 = vst [vmem:[#allocation18_spill] sm:$0xff] %v4395_v7  ;;  %5891 = vst [vmem:[#allocation19_spill] sm:$0xff] %v4400_v8  ;;  %v4403_v9 = vld [vmem:[%s4359_s12 + $0x48] sm:$0xff]  ;;  %v4410_v10 = vld [vmem:[%s4359_s12 + $0x50] sm:$0xff]  ;;  %vm1078_vm0 = vcmp.gt.s32.totalorder %v4443_v24, 0 }
  0x79   : > { %349 = vadd.xlane.f32.xlu0 %v4378_v2  ;;  %353 = vadd.xlane.f32.xlu1 %v4381_v3  ;;  %5892 = vst [vmem:[#allocation20_spill] sm:$0xff] %v4403_v9  ;;  %v4413_v11 = vld [vmem:[%s4359_s12 + $0x58] sm:$0xff]  ;;  %v4418_v12 = vld [vmem:[%s4359_s12 + $0x60] sm:$0xff]  ;;  %v4421_v13 = vld [vmem:[%s4359_s12 + $0x68] sm:$0xff]  ;;  %v4448_v25 = vsel %vm1078_vm0, 1.0, %v5855_v21 }
  0x7a   : > { %5893 = vst [vmem:[#allocation21_spill] sm:$0xff] %v4418_v12  ;;  %5894 = vst [vmem:[#allocation22_spill] sm:$0xff] %v4421_v13  ;;  %v4426_v14 = vld [vmem:[%s4359_s12 + $0x70] sm:$0xff]  ;;  %v4429_v15 = vld [vmem:[%s4359_s12 + $0x78] sm:$0xff] }
  0x7b   : > { %5895 = vst [vmem:[#allocation23_spill] sm:$0xff] %v4426_v14  ;;  %5896 = vst [vmem:[#allocation24_spill] sm:$0xff] %v4429_v15  ;;  %v4434_v16 = vld [vmem:[%s4359_s12 + $0x80] sm:$0xff]  ;;  %v4437_v17 = vld [vmem:[%s4359_s12 + $0x88] sm:$0xff] }
  0x7c   : > { %5897 = vst [vmem:[#allocation25_spill] sm:$0xff] %v4434_v16  ;;  %5898 = vst [vmem:[#allocation26_spill] sm:$0xff] %v4437_v17  ;;  %v3734_v18 = vld [vmem:[#allocation7 + $0x4] ss:$12 sps:$4 sm:$0xff]   ;;  %v3736_v20 = vld [vmem:[#allocation7] ss:$12 sps:$4 sm:$0xff]  }
  0x7d   : > { %355 = vadd.xlane.f32.xlu0 %v4386_v4  ;;  %357 = vadd.xlane.f32.xlu1 %v4389_v5  ;;  %v3737_v22 = vld [vmem:[#allocation7 + $0x8] ss:$12 sps:$4 sm:$0xff]   ;;  %5899 = vst [vmem:[#allocation27_spill] sm:$0xff] %v4448_v25 }
  0x7e   : > { %v3738_v23 = vld [vmem:[#allocation7 + $0x1c] ss:$12 sps:$4 sm:$0xff]   ;;  %782 = vmatprep.subr.bf16.mxu0 %v3734_v18  ;;  %3271 = vmatpush3.bf16.msra.mxu1 %v3737_v22  ;;  %v3740_v18 = vld [vmem:[#allocation7 + $0x18] ss:$12 sps:$4 sm:$0xff]  }
  0x7f   : > { %783 = vmatpush1.bf16.msra.mxu0 %v3736_v20  ;;  %3272 = vmatprep.subr.bf16.mxu1 %v5855_v21  ;;  %v3741_v20 = vld [vmem:[#allocation7 + $0x20] ss:$12 sps:$4 sm:$0xff]  }
  0x80   : > { %784 = vmatprep.subr.bf16.mxu0 %v3738_v23 }
  0x81   : > { %359 = vadd.xlane.f32.xlu0 %v4392_v6  ;;  %361 = vadd.xlane.f32.xlu1 %v4395_v7 }
  0x82   : > { %3273 = vmatpush3.bf16.msra.mxu1 %v3741_v20 }
  0x83   : > { %785 = vmatpush1.bf16.msra.mxu0 %v3740_v18  ;;  %3274 = vmatprep.subr.bf16.mxu1 %v5855_v21  ;;  %v3750_v18 = vld [vmem:[#allocation7 + $0x64] ss:$12 sps:$4 sm:$0xff]  }
  0x85   : > { %363 = vadd.xlane.f32.xlu0 %v4400_v8  ;;  %365 = vadd.xlane.f32.xlu1 %v4403_v9 }
  0x89   : > { %367 = vadd.xlane.f32.xlu0 %v4410_v10  ;;  %369 = vadd.xlane.f32.xlu1 %v4413_v11 }
  0x8d   : > { %371 = vadd.xlane.f32.xlu0 %v4418_v12  ;;  %373 = vadd.xlane.f32.xlu1 %v4421_v13 }
  0x91   : > { %375 = vadd.xlane.f32.xlu0 %v4426_v14  ;;  %377 = vadd.xlane.f32.xlu1 %v4429_v15 }
  0x95   : > { %379 = vadd.xlane.f32.xlu0 %v4434_v16  ;;  %381 = vadd.xlane.f32.xlu1 %v4437_v17 }
 0x102   : > { %v348_v26 = vpop.xlane.xlu0 %347  ;;  %v352_v27 = vpop.xlane.xlu1 %351 }
 0x103   : > { %v384_v28 = vmul.f32 0.0078125, %v348_v26  ;;  %v386_v29 = vmul.f32 0.0078125, %v352_v27 }
 0x105   : > { %v4451_v30 = vsub.f32 %v4370_v0, %v384_v28  ;;  %v4454_v31 = vsub.f32 %v4373_v1, %v386_v29  ;;  %v3742_v29 = vld [vmem:[#allocation7 + $0x34] ss:$12 sps:$4 sm:$0xff]  }
 0x106   : > { %v350_v32 = vpop.xlane.xlu0 %349  ;;  %v354_v33 = vpop.xlane.xlu1 %353  ;;  %786 = vmatprep.subr.bf16.mxu0 %v3742_v29 }
 0x107   : > { %v385_v34 = vmul.f32 0.0078125, %v350_v32  ;;  %v420_v35 = vmul.f32 %v4451_v30, %v4451_v30  ;;  %v387_v36 = vmul.f32 0.0078125, %v354_v33  ;;  %v422_v39 = vmul.f32 %v4454_v31, %v4454_v31 }
 0x109   : > { %v4459_v37 = vsub.f32 %v4378_v2, %v385_v34  ;;  %438 = vadd.xlane.f32.xlu0 %v420_v35  ;;  %v4462_v38 = vsub.f32 %v4381_v3, %v387_v36 }
 0x10a   : > { %v356_v40 = vpop.xlane.xlu0 %355  ;;  %v358_v41 = vpop.xlane.xlu1 %357 }
 0x10b   : > { %v388_v42 = vmul.f32 0.0078125, %v356_v40  ;;  %v421_v43 = vmul.f32 %v4459_v37, %v4459_v37  ;;  %v389_v44 = vmul.f32 0.0078125, %v358_v41  ;;  %v423_v47 = vmul.f32 %v4462_v38, %v4462_v38  ;;  %v3745_v40 = vld [vmem:[#allocation7 + $0x38] ss:$12 sps:$4 sm:$0xff]  }
 0x10c   : > { %3275 = vmatpush3.bf16.msra.mxu1 %v3745_v40  ;;  %v3756_v40 = vld [vmem:[#allocation7 + $0x78] ss:$12 sps:$4 sm:$0xff]  }
 0x10d   : > { %v4469_v45 = vsub.f32 %v4386_v4, %v388_v42  ;;  %442 = vadd.xlane.f32.xlu0 %v422_v39  ;;  %440 = vadd.xlane.f32.xlu1 %v421_v43  ;;  %v4472_v46 = vsub.f32 %v4389_v5, %v389_v44  ;;  %v3744_v39 = vld [vmem:[#allocation7 + $0x30] ss:$12 sps:$4 sm:$0xff]  }
 0x10e   : > { %v360_v48 = vpop.xlane.xlu0 %359  ;;  %v362_v49 = vpop.xlane.xlu1 %361  ;;  %787 = vmatpush1.bf16.msra.mxu0 %v3744_v39  ;;  %3276 = vmatprep.subr.bf16.mxu1 %v5855_v21  ;;  %v3754_v39 = vld [vmem:[#allocation7 + $0x7c] ss:$12 sps:$4 sm:$0xff]  }
 0x10f   : > { %v390_v50 = vmul.f32 0.0078125, %v360_v48  ;;  %v424_v51 = vmul.f32 %v4469_v45, %v4469_v45  ;;  %v391_v52 = vmul.f32 0.0078125, %v362_v49  ;;  %v425_v55 = vmul.f32 %v4472_v46, %v4472_v46  ;;  %v3746_v49 = vld [vmem:[#allocation7 + $0x4c] ss:$12 sps:$4 sm:$0xff]  }
 0x110   : > { %788 = vmatprep.subr.bf16.mxu0 %v3746_v49  ;;  %v3760_v49 = vld [vmem:[#allocation7 + $0x90] ss:$12 sps:$4 sm:$0xff]  }
 0x111   : > { %v4479_v53 = vsub.f32 %v4392_v6, %v390_v50  ;;  %444 = vadd.xlane.f32.xlu1 %v423_v47  ;;  %446 = vadd.xlane.f32.xlu0 %v424_v51  ;;  %v4482_v54 = vsub.f32 %v4395_v7, %v391_v52  ;;  %v3748_v52 = vld [vmem:[#allocation7 + $0x48] ss:$12 sps:$4 sm:$0xff]  }
 0x112   : > { %v364_v56 = vpop.xlane.xlu0 %363  ;;  %v366_v57 = vpop.xlane.xlu1 %365  ;;  %789 = vmatpush1.bf16.msra.mxu0 %v3748_v52  ;;  %v3764_v52 = vld [vmem:[#allocation7 + $0xa8] ss:$12 sps:$4 sm:$0xff]  }
 0x113   : > { %v392_v58 = vmul.f32 0.0078125, %v364_v56  ;;  %v426_v59 = vmul.f32 %v4479_v53, %v4479_v53  ;;  %v393_v60 = vmul.f32 0.0078125, %v366_v57  ;;  %v427_v63 = vmul.f32 %v4482_v54, %v4482_v54  ;;  %790 = vmatprep.subr.bf16.mxu0 %v3750_v18 }
 0x115   : > { %v4489_v61 = vsub.f32 %v4400_v8, %v392_v58  ;;  %448 = vadd.xlane.f32.xlu1 %v425_v55  ;;  %450 = vadd.xlane.f32.xlu0 %v426_v59  ;;  %v4492_v62 = vsub.f32 %v4403_v9, %v393_v60  ;;  %v3749_v55 = vld [vmem:[#allocation7 + $0x50] ss:$12 sps:$4 sm:$0xff]  }
 0x116   : > { %v368_v22 = vpop.xlane.xlu0 %367  ;;  %v370_v23 = vpop.xlane.xlu1 %369  ;;  %3277 = vmatpush3.bf16.msra.mxu1 %v3749_v55  ;;  %v3765_v55 = vld [vmem:[#allocation7 + $0xb0] ss:$12 sps:$4 sm:$0xff]  }
 0x117   : > { %v394_v26 = vmul.f32 0.0078125, %v368_v22  ;;  %v428_v27 = vmul.f32 %v4489_v61, %v4489_v61  ;;  %v395_v28 = vmul.f32 0.0078125, %v370_v23  ;;  %v429_v34 = vmul.f32 %v4492_v62, %v4492_v62  ;;  %3278 = vmatprep.subr.bf16.mxu1 %v5855_v21  ;;  %v3752_v23 = vld [vmem:[#allocation7 + $0x60] ss:$12 sps:$4 sm:$0xff]  }
 0x118   : > { %791 = vmatpush1.bf16.msra.mxu0 %v3752_v23 }
 0x119   : > { %v4500_v32 = vsub.f32 %v4410_v10, %v394_v26  ;;  %452 = vadd.xlane.f32.xlu1 %v427_v63  ;;  %454 = vadd.xlane.f32.xlu0 %v428_v27  ;;  %v4503_v33 = vsub.f32 %v4413_v11, %v395_v28  ;;  %v3753_v26 = vld [vmem:[#allocation7 + $0x68] ss:$12 sps:$4 sm:$0xff]  }
 0x11a   : > { %v372_v35 = vpop.xlane.xlu0 %371  ;;  %v374_v36 = vpop.xlane.xlu1 %373  ;;  %3279 = vmatpush3.bf16.msra.mxu1 %v3753_v26  ;;  %792 = vmatprep.subr.bf16.mxu0 %v3754_v39 }
 0x11b   : > { %v396_v41 = vmul.f32 0.0078125, %v372_v35  ;;  %v430_v42 = vmul.f32 %v4500_v32, %v4500_v32  ;;  %v397_v43 = vmul.f32 0.0078125, %v374_v36  ;;  %v431_v48 = vmul.f32 %v4503_v33, %v4503_v33  ;;  %3280 = vmatprep.subr.bf16.mxu1 %v5855_v21 }
 0x11c   : > { %793 = vmatpush1.bf16.msra.mxu0 %v3756_v40 }
 0x11d   : > { %v4510_v44 = vsub.f32 %v4418_v12, %v396_v41  ;;  %456 = vadd.xlane.f32.xlu1 %v429_v34  ;;  %458 = vadd.xlane.f32.xlu0 %v430_v42  ;;  %v4513_v47 = vsub.f32 %v4421_v13, %v397_v43  ;;  %v3757_v41 = vld [vmem:[#allocation7 + $0x80] ss:$12 sps:$4 sm:$0xff]  }
 0x11e   : > { %v376_v50 = vpop.xlane.xlu0 %375  ;;  %v378_v51 = vpop.xlane.xlu1 %377  ;;  %3281 = vmatpush3.bf16.msra.mxu1 %v3757_v41 }
 0x11f   : > { %v398_v56 = vmul.f32 0.0078125, %v376_v50  ;;  %v432_v57 = vmul.f32 %v4510_v44, %v4510_v44  ;;  %v399_v58 = vmul.f32 0.0078125, %v378_v51  ;;  %v433_v63 = vmul.f32 %v4513_v47, %v4513_v47  ;;  %3282 = vmatprep.subr.bf16.mxu1 %v5855_v21  ;;  %v3761_v50 = vld [vmem:[#allocation7 + $0x98] ss:$12 sps:$4 sm:$0xff]  }
 0x120   : > { %v3762_v51 = vld [vmem:[#allocation7 + $0xac] ss:$12 sps:$4 sm:$0xff]  }
 0x121   : > { %v4521_v59 = vsub.f32 %v4426_v14, %v398_v56  ;;  %460 = vadd.xlane.f32.xlu1 %v431_v48  ;;  %462 = vadd.xlane.f32.xlu0 %v432_v57  ;;  %v4524_v60 = vsub.f32 %v4429_v15, %v399_v58  ;;  %v3758_v48 = vld [vmem:[#allocation7 + $0x94] ss:$12 sps:$4 sm:$0xff]   ;;  %v4138_v56 = vmov 0  }
 0x122   : > { %v380_v20 = vpop.xlane.xlu0 %379  ;;  %v382_v22 = vpop.xlane.xlu1 %381  ;;  %794 = vmatprep.subr.bf16.mxu0 %v3758_v48  ;;  %3283 = vmatpush3.bf16.msra.mxu1 %v3761_v50 }
 0x123   : > { %v400_v27 = vmul.f32 0.0078125, %v380_v20  ;;  %v434_v28 = vmul.f32 %v4521_v59, %v4521_v59  ;;  %v401_v29 = vmul.f32 0.0078125, %v382_v22  ;;  %v435_v36 = vmul.f32 %v4524_v60, %v4524_v60  ;;  %795 = vmatpush1.bf16.msra.mxu0 %v3760_v49  ;;  %3284 = vmatprep.subr.bf16.mxu1 %v5855_v21 }
 0x124   : > { %796 = vmatprep.subr.bf16.mxu0 %v3762_v51  ;;  %814 = vmatprep.mubr.bf16.mxu0 %v4138_v56 }
 0x125   : > { %v4532_v34 = vsub.f32 %v4434_v16, %v400_v27  ;;  %464 = vadd.xlane.f32.xlu1 %v433_v63  ;;  %466 = vadd.xlane.f32.xlu0 %v434_v28  ;;  %v4535_v35 = vsub.f32 %v4437_v17, %v401_v29 }
 0x126   : > { %3285 = vmatpush3.bf16.msra.mxu1 %v3765_v55 }
 0x127   : > { %v436_v42 = vmul.f32 %v4532_v34, %v4532_v34  ;;  %v437_v43 = vmul.f32 %v4535_v35, %v4535_v35  ;;  %797 = vmatpush1.bf16.msra.mxu0 %v3764_v52 }
 0x129   : > { %468 = vadd.xlane.f32.xlu1 %v435_v36  ;;  %470 = vadd.xlane.f32.xlu0 %v436_v42 }
 0x12d   : > { %472 = vadd.xlane.f32.xlu1 %v437_v43 }
 0x196   : > { %v439_v57 = vpop.xlane.xlu0 %438 }
 0x197   : > { %v474_v58 = vmul.f32 0.0078125, %v439_v57 }
 0x199   : > { %v492_v63 = vadd.f32 1e-05, %v474_v58  ;;  %v4553_v58 = vld [vmem:[%s5844_s1] ss:$0 sm:$0xff] }
 0x19a   : > { %v441_v18 = vpop.xlane.xlu1 %440  ;;  %v443_v20 = vpop.xlane.xlu0 %442 }
 0x19b   : > { %3766 = vrsqrt.f32 %v492_v63  ;;  %v475_v22 = vmul.f32 0.0078125, %v441_v18  ;;  %v476_v23 = vmul.f32 0.0078125, %v443_v20 }
 0x19d   : > { %v493_v26 = vadd.f32 1e-05, %v475_v22  ;;  %v494_v27 = vadd.f32 1e-05, %v476_v23 }
 0x19e   : > { %v445_v28 = vpop.xlane.xlu1 %444  ;;  %v447_v29 = vpop.xlane.xlu0 %446 }
 0x19f   : > { %3768 = vrsqrt.f32 %v493_v26  ;;  %v477_v36 = vmul.f32 0.0078125, %v445_v28  ;;  %v478_v40 = vmul.f32 0.0078125, %v447_v29 }
 0x1a0   : > { %3770 = vrsqrt.f32 %v494_v27 }
 0x1a1   : > { %v495_v39 = vadd.f32 1e-05, %v477_v36  ;;  %v496_v49 = vadd.f32 1e-05, %v478_v40 }
 0x1a2   : > { %v449_v41 = vpop.xlane.xlu1 %448  ;;  %v451_v42 = vpop.xlane.xlu0 %450 }
 0x1a3   : > { %3772 = vrsqrt.f32 %v495_v39  ;;  %v479_v43 = vmul.f32 0.0078125, %v449_v41  ;;  %v480_v18 = vmul.f32 0.0078125, %v451_v42 }
 0x1a5   : > { %v3767_v48 = vpop.eup %3766  ;;  %v497_v50 = vadd.f32 1e-05, %v479_v43  ;;  %v498_v39 = vadd.f32 1e-05, %v480_v18 }
 0x1a6   : > { %v453_v51 = vpop.xlane.xlu1 %452  ;;  %v455_v52 = vpop.xlane.xlu0 %454  ;;  %v528_v55 = vmul.f32 %v3767_v48, %v4451_v30  ;;  %v4560_v30 = vld [vmem:[%s5845_s2] ss:$0 sm:$0xff] }
 0x1a7   : > { %3774 = vrsqrt.f32 %v497_v50  ;;  %v481_v57 = vmul.f32 0.0078125, %v453_v51 }
 0x1a8   : > { %3776 = vrsqrt.f32 %v496_v49  ;;  %v553_v26 = vmul.f32 %v4553_v58, %v528_v55 }
 0x1a9   : > { %v3769_v63 = vpop.eup %3768  ;;  %v499_v28 = vadd.f32 1e-05, %v481_v57  ;;  %v482_v57 = vmul.f32 0.0078125, %v455_v52 }
 0x1aa   : > { %v457_v20 = vpop.xlane.xlu1 %456  ;;  %v459_v22 = vpop.xlane.xlu0 %458  ;;  %v529_v23 = vmul.f32 %v3769_v63, %v4459_v37  ;;  %v578_v42 = vadd.f32 %v4560_v30, %v553_v26 }
 0x1ab   : > { %v3771_v27 = vpop.eup %3770  ;;  %3778 = vrsqrt.f32 %v499_v28  ;;  %v483_v49 = vmul.f32 0.0078125, %v457_v20  ;;  %v500_v20 = vadd.f32 1e-05, %v482_v57 }
 0x1ac   : > { %v554_v29 = vmul.f32 %v4553_v58, %v529_v23  ;;  %v530_v37 = vmul.f32 %v3771_v27, %v4454_v31  ;;  %3780 = vrsqrt.f32 %v498_v39 }
 0x1ad   : > { %v3773_v36 = vpop.eup %3772 }
 0x1ae   : > { %v461_v40 = vpop.xlane.xlu1 %460  ;;  %v463_v41 = vpop.xlane.xlu0 %462  ;;  %v579_v43 = vadd.f32 %v4560_v30, %v554_v29  ;;  %v531_v48 = vmul.f32 %v3773_v36, %v4462_v38  ;;  %v555_v23 = vmul.f32 %v4553_v58, %v530_v37  ;;  %v501_v29 = vadd.f32 1e-05, %v483_v49 }
 0x1af   : > { %v485_v52 = vmul.f32 0.0078125, %v461_v40  ;;  %v484_v49 = vmul.f32 0.0078125, %v459_v22 }
 0x1b0   : > { %v596_v50 = vpack.c.bf16 %v579_v43, %v578_v42  ;;  %v556_v51 = vmul.f32 %v4553_v58, %v531_v48  ;;  %v580_v36 = vadd.f32 %v4560_v30, %v555_v23  ;;  %3782 = vrsqrt.f32 %v501_v29 }
 0x1b1   : > { %v3775_v55 = vpop.eup %3774  ;;  %3784 = vrsqrt.f32 %v500_v20  ;;  %v502_v22 = vadd.f32 1e-05, %v484_v49 }
 0x1b2   : > { %v465_v63 = vpop.xlane.xlu1 %464  ;;  %815 = vmatmul.mubr.bf16.vlgmr.msra.gmra.mrb[0].mxu0 %v596_v50  ;;  %3287 = vmatmul.mubr.bf16.vlgmr.msra.gmra.mrb[0].mxu1 %v596_v50  ;;  %v4568_v18 = vpop.xlane.xlu0 %466  ;;  %v581_v31 = vadd.f32 %v4560_v30, %v556_v51  ;;  %v533_v38 = vmul.f32 %v3775_v55, %v4472_v46  ;;  %v503_v51 = vadd.f32 1e-05, %v485_v52  ;;  %v486_v52 = vmul.f32 0.0078125, %v463_v41 }
 0x1b3   : > { %v3777_v26 = vpop.eup %3776  ;;  %824 = vmatprep.mubr.bf16.mxu0 %v4138_v56  ;;  %3290 = vmatprep.mubr.msk.bf16.mxu1 %vm4139_vm1, %v5855_v21 }
 0x1b4   : > { %v532_v39 = vmul.f32 %v3777_v26, %v4469_v45  ;;  %v597_v43 = vpack.c.bf16 %v581_v31, %v580_v36  ;;  %v558_v37 = vmul.f32 %v4553_v58, %v533_v38  ;;  %v487_v31 = vmul.f32 0.0078125, %v465_v63 }
 0x1b5   : > { %v3779_v48 = vpop.eup %3778 }
 0x1b6   : > { %v469_v27 = vpop.xlane.xlu1 %468  ;;  %v471_v28 = vpop.xlane.xlu0 %470  ;;  %v557_v46 = vmul.f32 %v4553_v58, %v532_v39  ;;  %v583_v45 = vadd.f32 %v4560_v30, %v558_v37  ;;  %v535_v57 = vmul.f32 %v3779_v48, %v4482_v54  ;;  %v505_v36 = vadd.f32 1e-05, %v487_v31 }
 0x1b7   : > { %v490_v42 = vmul.f32 0.0078125, %v471_v28  ;;  %v3781_v40 = vpop.eup %3780  ;;  %v504_v39 = vadd.f32 1e-05, %v486_v52  ;;  %v489_v37 = vmul.f32 0.0078125, %v469_v27 }
 0x1b8   : > { %v582_v26 = vadd.f32 %v4560_v30, %v557_v46  ;;  %v534_v29 = vmul.f32 %v3781_v40, %v4479_v53  ;;  %v560_v38 = vmul.f32 %v4553_v58, %v535_v57  ;;  %v488_v40 = vmul.f32 0.0078125, %v4568_v18 }
 0x1b9   : > { %v508_v50 = vadd.f32 1e-05, %v490_v42  ;;  %v507_v27 = vadd.f32 1e-05, %v489_v37 }
 0x1ba   : > { %v473_v19 = vpop.xlane.xlu1 %472  ;;  %825 = vmatmul.mubr.bf16.gmra.mrb[4].mxu0 %v597_v43  ;;  %3291 = vmatmul.mubr.bf16.gmra.mrb[4].mxu1 %v597_v43  ;;  %v3783_v20 = vpop.eup %3782  ;;  %v559_v28 = vmul.f32 %v4553_v58, %v534_v29  ;;  %v585_v53 = vadd.f32 %v4560_v30, %v560_v38 }
 0x1bb   : > { %v491_v55 = vmul.f32 0.0078125, %v473_v19  ;;  %834 = vmatprep.mubr.bf16.mxu0 %v4138_v56  ;;  %3294 = vmatprep.mubr.msk.bf16.mxu1 %vm4139_vm1, %v5855_v21  ;;  %3786 = vrsqrt.f32 %v508_v50  ;;  %v598_v19 = vpack.c.bf16 %v583_v45, %v582_v26  ;;  %v3785_v54 = vpop.eup %3784  ;;  %v537_v63 = vmul.f32 %v3783_v20, %v4492_v62 }
 0x1bc   : > { %3788 = vrsqrt.f32 %v503_v51  ;;  %v584_v43 = vadd.f32 %v4560_v30, %v559_v28  ;;  %v536_v41 = vmul.f32 %v3785_v54, %v4489_v61 }
 0x1bd   : > { %v509_v23 = vadd.f32 1e-05, %v491_v55  ;;  %v562_v51 = vmul.f32 %v4553_v58, %v537_v63 }
 0x1be   : > { %v599_v50 = vpack.c.bf16 %v585_v53, %v584_v43  ;;  %v561_v55 = vmul.f32 %v4553_v58, %v536_v41 }
 0x1bf   : > { %3790 = vrsqrt.f32 %v509_v23  ;;  %v587_v57 = vadd.f32 %v4560_v30, %v562_v51  ;;  %v506_v23 = vadd.f32 1e-05, %v488_v40  ;;  %v4140_v40 = vmov -1e+09  }
 0x1c0   : > { %3792 = vrsqrt.f32 %v502_v22  ;;  %v586_v26 = vadd.f32 %v4560_v30, %v561_v55  ;;  %v641_v55 = vsub.s32 0, %v4443_v24 }
 0x1c1   : > { %3794 = vrsqrt.f32 %v505_v36 }
 0x1c2   : > { %835 = vmatmul.mubr.bf16.gmra.mrb[8].mxu0 %v598_v19  ;;  %3295 = vmatmul.mubr.bf16.gmra.mrb[8].mxu1 %v598_v19  ;;  %3796 = vrsqrt.f32 %v504_v39  ;;  %v600_v31 = vpack.c.bf16 %v587_v57, %v586_v26 }
 0x1c3   : > { %844 = vmatprep.mubr.bf16.mxu0 %v4138_v56  ;;  %3298 = vmatprep.mubr.msk.bf16.mxu1 %vm4139_vm1, %v5855_v21  ;;  %3798 = vrsqrt.f32 %v507_v27 }
 0x1c4   : > { %3800 = vrsqrt.f32 %v506_v23 }
 0x1c5   : > { %v3787_v42 = vpop.eup %3786 }
 0x1c6   : > { %v544_v48 = vmul.f32 %v3787_v42, %v4532_v34  ;;  %v3789_v49 = vpop.eup %3788 }
 0x1c7   : > { %v539_v18 = vmul.f32 %v3789_v49, %v4503_v33 }
 0x1c8   : > { %v569_v62 = vmul.f32 %v4553_v58, %v544_v48 }
 0x1c9   : > { %v3791_v46 = vpop.eup %3790  ;;  %v564_v19 = vmul.f32 %v4553_v58, %v539_v18 }
 0x1ca   : > { %845 = vmatmul.mubr.bf16.gmra.mrb[12].mxu0 %v599_v50  ;;  %3299 = vmatmul.mubr.bf16.gmra.mrb[12].mxu1 %v599_v50  ;;  %v545_v61 = vmul.f32 %v3791_v46, %v4535_v35  ;;  %v3793_v45 = vpop.eup %3792  ;;  %v594_v34 = vadd.f32 %v4560_v30, %v569_v62 }
 0x1cb   : > { %854 = vmatprep.mubr.bf16.mxu0 %v4138_v56  ;;  %3302 = vmatprep.mubr.msk.bf16.mxu1 %vm4139_vm1, %v5855_v21  ;;  %v538_v35 = vmul.f32 %v3793_v45, %v4500_v32  ;;  %v3795_v20 = vpop.eup %3794  ;;  %v589_v32 = vadd.f32 %v4560_v30, %v564_v19 }
 0x1cc   : > { %v570_v22 = vmul.f32 %v4553_v58, %v545_v61  ;;  %v3797_v52 = vpop.eup %3796  ;;  %v541_v28 = vmul.f32 %v3795_v20, %v4513_v47  ;;  %v637_v61 = vld [vmem:[%s5847_s4] sm:$0x7] }
 0x1cd   : > { %v563_v33 = vmul.f32 %v4553_v58, %v538_v35  ;;  %v540_v36 = vmul.f32 %v3797_v52, %v4510_v44  ;;  %v3799_v39 = vpop.eup %3798  ;;  %v4649_v45 = vrot.slane %v637_v61, %v641_v55 }
 0x1ce   : > { %v595_v29 = vadd.f32 %v4560_v30, %v570_v22  ;;  %v566_v63 = vmul.f32 %v4553_v58, %v541_v28  ;;  %v3801_v43 = vpop.eup %3800  ;;  %v543_v41 = vmul.f32 %v3799_v39, %v4524_v60 }
 0x1cf   : > { %v588_v54 = vadd.f32 %v4560_v30, %v563_v33  ;;  %v565_v42 = vmul.f32 %v4553_v58, %v540_v36  ;;  %v542_v37 = vmul.f32 %v3801_v43, %v4521_v59  ;;  %v5900_v59 = vlaneseq }
 0x1d0   : > { %v604_v38 = vpack.c.bf16 %v595_v29, %v594_v34  ;;  %v591_v47 = vadd.f32 %v4560_v30, %v566_v63  ;;  %v568_v49 = vmul.f32 %v4553_v58, %v543_v41 }
 0x1d1   : > { %v601_v53 = vpack.c.bf16 %v589_v32, %v588_v54  ;;  %v590_v44 = vadd.f32 %v4560_v30, %v565_v42  ;;  %v567_v50 = vmul.f32 %v4553_v58, %v542_v37  ;;  %v1065_v58 = vand.u32 127, %v5900_v59 }
 0x1d2   : > { %855 = vmatmul.mubr.bf16.gmra.mrb[16].mxu0 %v600_v31  ;;  %3303 = vmatmul.mubr.bf16.gmra.mrb[16].mxu1 %v600_v31  ;;  %v593_v51 = vadd.f32 %v4560_v30, %v568_v49 }
 0x1d3   : > { %864 = vmatprep.mubr.bf16.mxu0 %v4138_v56  ;;  %3306 = vmatprep.mubr.msk.bf16.mxu1 %vm4139_vm1, %v5855_v21  ;;  %v602_v48 = vpack.c.bf16 %v591_v47, %v590_v44  ;;  %v592_v60 = vadd.f32 %v4560_v30, %v567_v50  ;;  %vm1066_vm2 = vcmp.lt.s32.totalorder %v1065_v58, 65  ;;  %v649_v30 = vsub.s32 2, %v4443_v24 }
 0x1d4   : > { %v4641_v62 = vsel %vm1066_vm2, 0.0, %v4140_v40 }
 0x1d5   : > { %v603_v46 = vpack.c.bf16 %v593_v51, %v592_v60  ;;  %5901 = vst [vmem:[#allocation28_spill] sm:$0xff] %v4641_v62  ;;  %v4651_v27 = vrot.slane %v637_v61, %v649_v30 }
 0x1da   : > { %865 = vmatmul.mubr.bf16.gmra.mrb[20].mxu0 %v601_v53  ;;  %3307 = vmatmul.mubr.bf16.gmra.mrb[20].mxu1 %v601_v53 }
 0x1db   : > { %874 = vmatprep.mubr.bf16.mxu0 %v4138_v56  ;;  %3310 = vmatprep.mubr.msk.bf16.mxu1 %vm4139_vm1, %v5855_v21 }
 0x1e2   : > { %875 = vmatmul.mubr.bf16.gmra.mrb[24].mxu0 %v602_v48  ;;  %3311 = vmatmul.mubr.bf16.gmra.mrb[24].mxu1 %v602_v48 }
 0x1e3   : > { %884 = vmatprep.mubr.bf16.mxu0 %v4138_v56  ;;  %3314 = vmatprep.mubr.msk.bf16.mxu1 %vm4139_vm1, %v5855_v21 }
 0x1ea   : > { %885 = vmatmul.mubr.bf16.gmra.mrb[28].mxu0 %v603_v46  ;;  %3315 = vmatmul.mubr.bf16.gmra.mrb[28].mxu1 %v603_v46 }
 0x1eb   : > { %894 = vmatprep.mubr.bf16.mxu0 %v4138_v56  ;;  %3318 = vmatprep.mubr.msk.bf16.mxu1 %vm4139_vm1, %v5855_v21  ;;  %v645_v56 = vsub.s32 1, %v4443_v24 }
 0x1ed   : > { %v4653_v34 = vrot.slane %v637_v61, %v645_v56 }
 0x1f2   : > { %895 = vmatmul.mubr.bf16.gmra.mrb[32].mxu0 %v604_v38  ;;  %3319 = vmatmul.mubr.bf16.gmra.mrb[32].mxu1 %v604_v38 }
 0x285   : > { %v816_v57 = vpop.f32.mrb[0].mxu0  ;;  %v939_v18 = vpop.f32.mrb[0].mxu1 }
 0x286   : > { %v817_v22 = vadd.f32 %v816_v57, %v4649_v45  ;;  %v940_v23 = vadd.f32 %v939_v18, %v4651_v27  ;;  %v818_v26 = vpop.f32.mrb[1].mxu0  ;;  %v3288_v35 = vpop.f32.mrb[1].mxu1 }
 0x287   : > { %v819_v29 = vadd.f32 %v818_v26, %v4653_v34  ;;  %v820_v31 = vpop.f32.mrb[2].mxu0  ;;  %v942_v19 = vpop.f32.mrb[2].mxu1 }
 0x288   : > { %1010 = vst [vmem:[#allocation2] sm:$0xff] %v817_v22  ;;  %1012 = vst [vmem:[#allocation2 + $0x10] sm:$0xff] %v940_v23  ;;  %v821_v24 = vadd.f32 %v820_v31, %v4649_v45  ;;  %v943_v38 = vadd.f32 %v942_v19, %v4651_v27  ;;  %v822_v20 = vpop.f32.mrb[3].mxu0  ;;  %v3289_v33 = vpop.f32.mrb[3].mxu1 }
 0x289   : > { %1011 = vst [vmem:[#allocation2 + $0x8] sm:$0xff] %v819_v29  ;;  %v823_v52 = vadd.f32 %v822_v20, %v4653_v34 }
 0x28a   : > { %1013 = vst [vmem:[#allocation2 + $0x18] sm:$0xff] %v821_v24  ;;  %1015 = vst [vmem:[#allocation2 + $0x28] sm:$0xff] %v943_v38 }
 0x28b   : > { %1014 = vst [vmem:[#allocation2 + $0x20] sm:$0xff] %v823_v52 }
 0x28d   : > { %v826_v32 = vpop.f32.mrb[4].mxu0  ;;  %v947_v28 = vpop.f32.mrb[4].mxu1 }
 0x28e   : > { %v827_v54 = vadd.f32 %v826_v32, %v4649_v45  ;;  %v948_v36 = vadd.f32 %v947_v28, %v4651_v27  ;;  %v828_v53 = vpop.f32.mrb[5].mxu0  ;;  %v3292_v63 = vpop.f32.mrb[5].mxu1 }
 0x28f   : > { %v829_v39 = vadd.f32 %v828_v53, %v4653_v34  ;;  %v830_v42 = vpop.f32.mrb[6].mxu0  ;;  %v950_v43 = vpop.f32.mrb[6].mxu1 }
 0x290   : > { %1016 = vst [vmem:[#allocation2 + $0x30] sm:$0xff] %v827_v54  ;;  %1018 = vst [vmem:[#allocation2 + $0x40] sm:$0xff] %v948_v36  ;;  %v831_v47 = vadd.f32 %v830_v42, %v4649_v45  ;;  %v951_v41 = vadd.f32 %v950_v43, %v4651_v27  ;;  %v832_v44 = vpop.f32.mrb[7].mxu0  ;;  %v3293_v37 = vpop.f32.mrb[7].mxu1 }
 0x291   : > { %1017 = vst [vmem:[#allocation2 + $0x38] sm:$0xff] %v829_v39  ;;  %v833_v48 = vadd.f32 %v832_v44, %v4653_v34 }
 0x292   : > { %1019 = vst [vmem:[#allocation2 + $0x48] sm:$0xff] %v831_v47  ;;  %1021 = vst [vmem:[#allocation2 + $0x58] sm:$0xff] %v951_v41 }
 0x293   : > { %1020 = vst [vmem:[#allocation2 + $0x50] sm:$0xff] %v833_v48 }
 0x295   : > { %v836_v49 = vpop.f32.mrb[8].mxu0  ;;  %v955_v50 = vpop.f32.mrb[8].mxu1 }
 0x296   : > { %v837_v51 = vadd.f32 %v836_v49, %v4649_v45  ;;  %v956_v60 = vadd.f32 %v955_v50, %v4651_v27  ;;  %v838_v46 = vpop.f32.mrb[9].mxu0  ;;  %v3296_v59 = vpop.f32.mrb[9].mxu1 }
 0x297   : > { %v839_v58 = vadd.f32 %v838_v46, %v4653_v34  ;;  %v840_v40 = vpop.f32.mrb[10].mxu0  ;;  %v958_v55 = vpop.f32.mrb[10].mxu1 }
 0x298   : > { %1022 = vst [vmem:[#allocation2 + $0x60] sm:$0xff] %v837_v51  ;;  %1024 = vst [vmem:[#allocation2 + $0x70] sm:$0xff] %v956_v60  ;;  %v841_v30 = vadd.f32 %v840_v40, %v4649_v45  ;;  %v959_v61 = vadd.f32 %v958_v55, %v4651_v27  ;;  %v842_v56 = vpop.f32.mrb[11].mxu0  ;;  %v3297_v57 = vpop.f32.mrb[11].mxu1 }
 0x299   : > { %1023 = vst [vmem:[#allocation2 + $0x68] sm:$0xff] %v839_v58  ;;  %v843_v18 = vadd.f32 %v842_v56, %v4653_v34 }
 0x29a   : > { %1025 = vst [vmem:[#allocation2 + $0x78] sm:$0xff] %v841_v30  ;;  %1027 = vst [vmem:[#allocation2 + $0x88] sm:$0xff] %v959_v61 }
 0x29b   : > { %1026 = vst [vmem:[#allocation2 + $0x80] sm:$0xff] %v843_v18 }
 0x29d   : > { %v846_v22 = vpop.f32.mrb[12].mxu0  ;;  %v963_v23 = vpop.f32.mrb[12].mxu1 }
 0x29e   : > { %v847_v26 = vadd.f32 %v846_v22, %v4649_v45  ;;  %v964_v35 = vadd.f32 %v963_v23, %v4651_v27  ;;  %v848_v29 = vpop.f32.mrb[13].mxu0  ;;  %v3300_v31 = vpop.f32.mrb[13].mxu1 }
 0x29f   : > { %v849_v19 = vadd.f32 %v848_v29, %v4653_v34  ;;  %v850_v24 = vpop.f32.mrb[14].mxu0  ;;  %v966_v38 = vpop.f32.mrb[14].mxu1 }
 0x2a0   : > { %1028 = vst [vmem:[#allocation2 + $0x90] sm:$0xff] %v847_v26  ;;  %1030 = vst [vmem:[#allocation2 + $0xa0] sm:$0xff] %v964_v35  ;;  %v851_v20 = vadd.f32 %v850_v24, %v4649_v45  ;;  %v967_v33 = vadd.f32 %v966_v38, %v4651_v27  ;;  %v852_v52 = vpop.f32.mrb[15].mxu0  ;;  %v3301_v32 = vpop.f32.mrb[15].mxu1 }
 0x2a1   : > { %1029 = vst [vmem:[#allocation2 + $0x98] sm:$0xff] %v849_v19  ;;  %v853_v28 = vadd.f32 %v852_v52, %v4653_v34 }
 0x2a2   : > { %1031 = vst [vmem:[#allocation2 + $0xa8] sm:$0xff] %v851_v20  ;;  %1033 = vst [vmem:[#allocation2 + $0xb8] sm:$0xff] %v967_v33 }
 0x2a3   : > { %1032 = vst [vmem:[#allocation2 + $0xb0] sm:$0xff] %v853_v28 }
 0x2a5   : > { %v856_v54 = vpop.f32.mrb[16].mxu0  ;;  %v971_v36 = vpop.f32.mrb[16].mxu1 }
 0x2a6   : > { %v857_v53 = vadd.f32 %v856_v54, %v4649_v45  ;;  %v972_v63 = vadd.f32 %v971_v36, %v4651_v27  ;;  %v858_v39 = vpop.f32.mrb[17].mxu0  ;;  %v3304_v42 = vpop.f32.mrb[17].mxu1 }
 0x2a7   : > { %v859_v43 = vadd.f32 %v858_v39, %v4653_v34  ;;  %v860_v47 = vpop.f32.mrb[18].mxu0  ;;  %v974_v41 = vpop.f32.mrb[18].mxu1 }
 0x2a8   : > { %1034 = vst [vmem:[#allocation2 + $0xc0] sm:$0xff] %v857_v53  ;;  %1036 = vst [vmem:[#allocation2 + $0xd0] sm:$0xff] %v972_v63  ;;  %v861_v44 = vadd.f32 %v860_v47, %v4649_v45  ;;  %v975_v37 = vadd.f32 %v974_v41, %v4651_v27  ;;  %v862_v48 = vpop.f32.mrb[19].mxu0  ;;  %v3305_v49 = vpop.f32.mrb[19].mxu1 }
 0x2a9   : > { %1035 = vst [vmem:[#allocation2 + $0xc8] sm:$0xff] %v859_v43  ;;  %v863_v50 = vadd.f32 %v862_v48, %v4653_v34 }
 0x2aa   : > { %1037 = vst [vmem:[#allocation2 + $0xd8] sm:$0xff] %v861_v44  ;;  %1039 = vst [vmem:[#allocation2 + $0xe8] sm:$0xff] %v975_v37 }
 0x2ab   : > { %1038 = vst [vmem:[#allocation2 + $0xe0] sm:$0xff] %v863_v50 }
 0x2ad   : > { %v866_v51 = vpop.f32.mrb[20].mxu0  ;;  %v979_v60 = vpop.f32.mrb[20].mxu1 }
 0x2ae   : > { %v867_v46 = vadd.f32 %v866_v51, %v4649_v45  ;;  %v980_v59 = vadd.f32 %v979_v60, %v4651_v27  ;;  %v868_v58 = vpop.f32.mrb[21].mxu0  ;;  %v3308_v40 = vpop.f32.mrb[21].mxu1 }
 0x2af   : > { %v869_v55 = vadd.f32 %v868_v58, %v4653_v34  ;;  %v870_v30 = vpop.f32.mrb[22].mxu0  ;;  %v982_v61 = vpop.f32.mrb[22].mxu1 }
 0x2b0   : > { %1040 = vst [vmem:[#allocation2 + $0xf0] sm:$0xff] %v867_v46  ;;  %1042 = vst [vmem:[#allocation2 + $0x100] sm:$0xff] %v980_v59  ;;  %v871_v56 = vadd.f32 %v870_v30, %v4649_v45  ;;  %v983_v57 = vadd.f32 %v982_v61, %v4651_v27  ;;  %v872_v18 = vpop.f32.mrb[23].mxu0  ;;  %v3309_v22 = vpop.f32.mrb[23].mxu1 }
 0x2b1   : > { %1041 = vst [vmem:[#allocation2 + $0xf8] sm:$0xff] %v869_v55  ;;  %v873_v23 = vadd.f32 %v872_v18, %v4653_v34 }
 0x2b2   : > { %1043 = vst [vmem:[#allocation2 + $0x108] sm:$0xff] %v871_v56  ;;  %1045 = vst [vmem:[#allocation2 + $0x118] sm:$0xff] %v983_v57 }
 0x2b3   : > { %1044 = vst [vmem:[#allocation2 + $0x110] sm:$0xff] %v873_v23 }
 0x2b5   : > { %v876_v26 = vpop.f32.mrb[24].mxu0  ;;  %v987_v35 = vpop.f32.mrb[24].mxu1 }
 0x2b6   : > { %v877_v29 = vadd.f32 %v876_v26, %v4649_v45  ;;  %v988_v31 = vadd.f32 %v987_v35, %v4651_v27  ;;  %v878_v19 = vpop.f32.mrb[25].mxu0  ;;  %v3312_v24 = vpop.f32.mrb[25].mxu1 }
 0x2b7   : > { %v879_v38 = vadd.f32 %v878_v19, %v4653_v34  ;;  %v880_v20 = vpop.f32.mrb[26].mxu0  ;;  %v990_v33 = vpop.f32.mrb[26].mxu1 }
 0x2b8   : > { %1046 = vst [vmem:[#allocation2 + $0x120] sm:$0xff] %v877_v29  ;;  %1048 = vst [vmem:[#allocation2 + $0x130] sm:$0xff] %v988_v31  ;;  %v881_v52 = vadd.f32 %v880_v20, %v4649_v45  ;;  %v991_v32 = vadd.f32 %v990_v33, %v4651_v27  ;;  %v882_v28 = vpop.f32.mrb[27].mxu0  ;;  %v3313_v54 = vpop.f32.mrb[27].mxu1 }
 0x2b9   : > { %1047 = vst [vmem:[#allocation2 + $0x128] sm:$0xff] %v879_v38  ;;  %v883_v36 = vadd.f32 %v882_v28, %v4653_v34 }
 0x2ba   : > { %1049 = vst [vmem:[#allocation2 + $0x138] sm:$0xff] %v881_v52  ;;  %1051 = vst [vmem:[#allocation2 + $0x148] sm:$0xff] %v991_v32 }
 0x2bb   : > { %1050 = vst [vmem:[#allocation2 + $0x140] sm:$0xff] %v883_v36 }
 0x2bd   : > { %v886_v53 = vpop.f32.mrb[28].mxu0  ;;  %v995_v63 = vpop.f32.mrb[28].mxu1 }
 0x2be   : > { %v887_v39 = vadd.f32 %v886_v53, %v4649_v45  ;;  %v996_v42 = vadd.f32 %v995_v63, %v4651_v27  ;;  %v888_v43 = vpop.f32.mrb[29].mxu0  ;;  %v3316_v47 = vpop.f32.mrb[29].mxu1 }
 0x2bf   : > { %v889_v41 = vadd.f32 %v888_v43, %v4653_v34  ;;  %v890_v44 = vpop.f32.mrb[30].mxu0  ;;  %v998_v37 = vpop.f32.mrb[30].mxu1 }
 0x2c0   : > { %1052 = vst [vmem:[#allocation2 + $0x150] sm:$0xff] %v887_v39  ;;  %1054 = vst [vmem:[#allocation2 + $0x160] sm:$0xff] %v996_v42  ;;  %v891_v48 = vadd.f32 %v890_v44, %v4649_v45  ;;  %v999_v49 = vadd.f32 %v998_v37, %v4651_v27  ;;  %v892_v50 = vpop.f32.mrb[31].mxu0  ;;  %v3317_v51 = vpop.f32.mrb[31].mxu1 }
 0x2c1   : > { %1053 = vst [vmem:[#allocation2 + $0x158] sm:$0xff] %v889_v41  ;;  %v893_v60 = vadd.f32 %v892_v50, %v4653_v34 }
 0x2c2   : > { %1055 = vst [vmem:[#allocation2 + $0x168] sm:$0xff] %v891_v48  ;;  %1057 = vst [vmem:[#allocation2 + $0x178] sm:$0xff] %v999_v49 }
 0x2c3   : > { %1056 = vst [vmem:[#allocation2 + $0x170] sm:$0xff] %v893_v60 }
 0x2c5   : > { %v896_v46 = vpop.f32.mrb[32].mxu0  ;;  %v1003_v59 = vpop.f32.mrb[32].mxu1 }
 0x2c6   : > { %v897_v58 = vadd.f32 %v896_v46, %v4649_v45  ;;  %v1004_v40 = vadd.f32 %v1003_v59, %v4651_v27  ;;  %v898_v55 = vpop.f32.mrb[33].mxu0  ;;  %v3320_v30 = vpop.f32.mrb[33].mxu1 }
 0x2c7   : > { %v899_v61 = vadd.f32 %v898_v55, %v4653_v34  ;;  %v900_v56 = vpop.f32.mrb[34].mxu0  ;;  %v1006_v57 = vpop.f32.mrb[34].mxu1 }
 0x2c8   : > { %1058 = vst [vmem:[#allocation2 + $0x180] sm:$0xff] %v897_v58  ;;  %1060 = vst [vmem:[#allocation2 + $0x190] sm:$0xff] %v1004_v40  ;;  %v901_v18 = vadd.f32 %v900_v56, %v4649_v45  ;;  %v1007_v22 = vadd.f32 %v1006_v57, %v4651_v27  ;;  %v902_v23 = vpop.f32.mrb[35].mxu0  ;;  %v3321_v26 = vpop.f32.mrb[35].mxu1 }
 0x2c9   : > { %1059 = vst [vmem:[#allocation2 + $0x188] sm:$0xff] %v899_v61  ;;  %v903_v35 = vadd.f32 %v902_v23, %v4653_v34 }
 0x2ca   : > { %1061 = vst [vmem:[#allocation2 + $0x198] sm:$0xff] %v901_v18  ;;  %1063 = vst [vmem:[#allocation2 + $0x1a8] sm:$0xff] %v1007_v22 }
 0x2cb   : > { %1062 = vst [vmem:[#allocation2 + $0x1a0] sm:$0xff] %v903_v35 }
 0x2cc LB: >> { %v5902_v62 = vld [vmem:[#allocation28_spill] sm:$0xff]  ;;  %v5858_v45 = vmov 0.0   ;;  %vm4142_vm3 = vmmov 0   ;;  %s1111_s3 = smul.u32 72, %s4126_s23  ;;  %vm1154_vm4 = vcmask 261120   ;;  %vm1257_vm5 = vcmask 588800   ;;  %s4126_s23 = sphi %s4713_s23, %s1110_s23  }
 0x2cd   : >> { %3322 = vmatprep.subr.bf16.mxu0 %v5858_v45  ;;  %3332 = vmatprep.mubr.msk.bf16.mxu0 %vm4142_vm3, %v5858_v45  ;;  %s4143_s11 = smov 96   ;;  %vm1391_vm6 = vcmask 1043456   ;;  %s4144_s12 = smov 64   ;;  %v5904_v25 = vld [vmem:[#allocation27_spill] sm:$0xff]  ;;  %vm1894_vm7 = vcmask 523520   ;;  %vm2297_vm8 = vcmask 785920  }
 0x2ce   : >> { %3352 = vmatprep.subr.bf16.mxu1 %v5858_v45  ;;  %3362 = vmatprep.mubr.msk.bf16.mxu1 %vm4142_vm3, %v5858_v45  ;;  %s1112_s15 = sshra.s32 %s1111_s3, 3  ;;  %s4145_s30 = smov 32   ;;  %vm2700_vm9 = vcmask 1048320  }
 0x2cf   : >> { %s3154_s16 = smul.u32 24, %s1112_s15  ;;  %s5113_s9 = scalar_lea.vmem [#allocation3], %s1111_s3 }
 0x2d0   : >> { %s1110_s23 = sadd.s32 1, %s4126_s23  }
 0x2d1   : >> { %s4727_s21 = scalar_lea.vmem [#allocation2], %s3154_s16  ;;  %p1107_p1 = scmp.ge.s32.totalorder %s1110_s23, 2  }
 0x2d2   : >> { %v1118_v27 = vld [vmem:[%s4727_s21 + $0x8] sm:$0xff]  ;;  %v1121_v34 = vld [vmem:[%s4727_s21 + $0x20] sm:$0xff]  ;;  %v1124_v31 = vld [vmem:[%s4727_s21 + $0x38] sm:$0xff]  ;;  %s3155_s29 = smul.u32 (%p1107_p1), 2304, %s4210_s28  ;;  %s2963_s10 = sshll.u32 (%p1107_p1), %s4711_s19, 4  ;;  %s5797_s10 = int_to_ptr.vmem [resolvable:$true] %s2963_s10 }
 0x2d3   : >> { %v4731_v29 = vpack.c.bf16 %v1121_v34, %v1118_v27  ;;  %v1127_v19 = vld [vmem:[%s4727_s21 + $0x50] sm:$0xff]  ;;  %v1130_v33 = vld [vmem:[%s4727_s21 + $0x68] sm:$0xff]  ;;  %v1133_v52 = vld [vmem:[%s4727_s21 + $0x80] sm:$0xff]  ;;  %s2950_s28 = scalar_lea.sflag (%p1107_p1), [#allocation6], %s4353_s14  ;;  %s4048_s16 = scalar_lea.vmem (%p1107_p1), %s5797_s10, 2304 }
 0x2d4   : >> { %v4738_v38 = vpack.c.bf16 %v1127_v19, %v1124_v31  ;;  %v4745_v32 = vpack.c.bf16 %v1133_v52, %v1130_v33  ;;  %v1136_v54 = vld [vmem:[%s4727_s21 + $0x98] sm:$0xff]  ;;  %v1139_v36 = vld [vmem:[%s4727_s21 + $0xb0] sm:$0xff]  ;;  %v1142_v39 = vld [vmem:[%s4727_s21 + $0xc8] sm:$0xff]  ;;  %s5795_s15 = scalar_lea.hbm (%p1107_p1), %s5850_s7, %s3155_s29  ;;  %p4049_p2 = scmp.ne.s32.totalorder (%p1107_p1), %s5797_s10, %s4048_s16 }
 0x2d5   : >> { %v1171_v24 = vsel %vm1154_vm4, %v4731_v29, 0  ;;  %v4752_v53 = vpack.c.bf16 %v1139_v36, %v1136_v54  ;;  %v4758_v42 = vpack.c.bf16 %v1142_v39, %v1142_v39  ;;  %v4763_v47 = vld [vmem:[%s4727_s21] sm:$0xff]  ;;  %v4766_v41 = vld [vmem:[%s4727_s21 + $0x18] sm:$0xff]  ;;  %v4778_v37 = vld [vmem:[%s4727_s21 + $0x30] sm:$0xff] }
 0x2d6   : >> { %3323 = vmatpush3.bf16.xpose.msra.mxu0 %v1171_v24  ;;  %v1174_v20 = vsel %vm1154_vm4, %v4738_v38, 0  ;;  %v1177_v28 = vsel %vm1154_vm4, %v4745_v32, 0  ;;  %v4771_v44 = vpack.c.bf16 %v4766_v41, %v4763_v47  ;;  %v4781_v48 = vld [vmem:[%s4727_s21 + $0x48] sm:$0xff]  ;;  %v4792_v50 = vld [vmem:[%s4727_s21 + $0x60] sm:$0xff]  ;;  %v4795_v51 = vld [vmem:[%s4727_s21 + $0x78] sm:$0xff]  ;;  %p4050_p4 = pnand (%p1107_p1), %p4049_p2, %p4304_p6 }
 0x2d7   : >> { %3324 = vmatprep.subr.bf16.mxu0 %v5858_v45  ;;  %v1180_v63 = vsel %vm1154_vm4, %v4752_v53, 0  ;;  %v1183_v43 = vsel %vm1154_vm4, %v4758_v42, 0  ;;  %v4785_v49 = vpack.c.bf16 %v4781_v48, %v4778_v37  ;;  %v4799_v60 = vpack.c.bf16 %v4795_v51, %v4792_v50  ;;  %v4806_v46 = vld [vmem:[%s4727_s21 + $0x90] sm:$0xff]  ;;  %v4809_v59 = vld [vmem:[%s4727_s21 + $0xa8] sm:$0xff]  ;;  %v4820_v40 = vld [vmem:[%s4727_s21 + $0xc0] sm:$0xff] }
 0x2d8   : >> { %v4813_v58 = vpack.c.bf16 %v4809_v59, %v4806_v46  ;;  %v4824_v55 = vpack.c.bf16 %v4820_v40, %v4820_v40  ;;  %p4051_p8 = pneg (%p1107_p1), %p4050_p4 }
 0x2de   : >> { %3325 = vmatpush3.bf16.xpose.msra.mxu0 %v1174_v20 }
 0x2df   : >> { %3326 = vmatprep.subr.bf16.mxu0 %v5858_v45 }
 0x2e6   : >> { %3327 = vmatpush3.bf16.xpose.msra.mxu0 %v1177_v28 }
 0x2e7   : >> { %3328 = vmatprep.subr.bf16.mxu0 %v5858_v45 }
 0x2ee   : >> { %3329 = vmatpush3.bf16.xpose.msra.mxu0 %v1180_v63 }
 0x2ef   : >> { %3330 = vmatprep.subr.bf16.mxu0 %v5858_v45 }
 0x2f6   : >> { %3331 = vmatpush3.bf16.xpose.msra.mxu0 %v1183_v43 }
 0x2f7   : >> { %3412 = vmatprep.subr.bf16.mxu0 %v5858_v45 }
 0x2fd   : >> { %3333 = vmatmul.mubr.msk.bf16.vlgmr.msra.gmra.mrb[0].mxu0 %vm1154_vm4, %v4771_v44 }
 0x2fe   : >> { %3336 = vmatprep.mubr.msk.bf16.mxu0 %vm4142_vm3, %v5858_v45 }
 0x305   : >> { %3337 = vmatmul.mubr.msk.bf16.gmra.mrb[4].mxu0 %vm1154_vm4, %v4785_v49 }
 0x306   : >> { %3340 = vmatprep.mubr.msk.bf16.mxu0 %vm4142_vm3, %v5858_v45 }
 0x30d   : >> { %3341 = vmatmul.mubr.msk.bf16.gmra.mrb[8].mxu0 %vm1154_vm4, %v4799_v60 }
 0x30e   : >> { %3344 = vmatprep.mubr.msk.bf16.mxu0 %vm4142_vm3, %v5858_v45 }
 0x315   : >> { %3345 = vmatmul.mubr.msk.bf16.gmra.mrb[12].mxu0 %vm1154_vm4, %v4813_v58 }
 0x316   : >> { %3348 = vmatprep.mubr.msk.bf16.mxu0 %vm4142_vm3, %v5858_v45 }
 0x31d   : >> { %3349 = vmatmul.mubr.msk.bf16.gmra.mrb[16].mxu0 %vm1154_vm4, %v4824_v55 }
 0x31e   : >> { %3422 = vmatprep.mubr.msk.bf16.mxu0 %vm4142_vm3, %v5858_v45 }
 0x3d0   : >> { %v1219_v30 = vpop.f32.mrb[0].mxu0 }
 0x3d1   : >> { %v1220_v61 = vadd.f32 %v1219_v30, %v5902_v62  ;;  %v3334_v56 = vpop.f32.mrb[1].mxu0 }
 0x3d2   : >> { %v1222_v57 = vpop.f32.mrb[2].mxu0 }
 0x3d3   : >> { %v1223_v18 = vadd.f32 %v1222_v57, %v5902_v62  ;;  %v3335_v22 = vpop.f32.mrb[3].mxu0  ;;  %v1258_v23 = vsel %vm1257_vm5, %v1220_v61, -inf }
 0x3d4   : >> { %1259 = vmax.xlane.f32.xlu0 %v1258_v23 }
 0x3d5   : >> { %v1261_v26 = vsel %vm1257_vm5, %v1223_v18, -inf }
 0x3d8   : >> { %1262 = vmax.xlane.f32.xlu0 %v1261_v26  ;;  %v1227_v35 = vpop.f32.mrb[4].mxu0 }
 0x3d9   : >> { %v1228_v27 = vadd.f32 %v1227_v35, %v5902_v62  ;;  %v3338_v34 = vpop.f32.mrb[5].mxu0 }
 0x3da   : >> { %v1230_v31 = vpop.f32.mrb[6].mxu0 }
 0x3db   : >> { %v1231_v19 = vadd.f32 %v1230_v31, %v5902_v62  ;;  %v3339_v24 = vpop.f32.mrb[7].mxu0  ;;  %v1264_v20 = vsel %vm1257_vm5, %v1228_v27, -inf }
 0x3dc   : >> { %1265 = vmax.xlane.f32.xlu1 %v1264_v20 }
 0x3dd   : >> { %v1267_v33 = vsel %vm1257_vm5, %v1231_v19, -inf }
 0x3e0   : >> { %1268 = vmax.xlane.f32.xlu1 %v1267_v33  ;;  %v1235_v52 = vpop.f32.mrb[8].mxu0 }
 0x3e1   : >> { %v1236_v28 = vadd.f32 %v1235_v52, %v5902_v62  ;;  %v3342_v54 = vpop.f32.mrb[9].mxu0 }
 0x3e2   : >> { %v1238_v36 = vpop.f32.mrb[10].mxu0 }
 0x3e3   : >> { %v1239_v63 = vadd.f32 %v1238_v36, %v5902_v62  ;;  %v3343_v39 = vpop.f32.mrb[11].mxu0  ;;  %v1270_v43 = vsel %vm1257_vm5, %v1236_v28, -inf }
 0x3e4   : >> { %1271 = vmax.xlane.f32.xlu0 %v1270_v43  ;;  %v1119_v39 = vld [vmem:[%s4727_s21 + $0x10] sm:$0xff]  ;;  %v1122_v43 = vld [vmem:[%s4727_s21 + $0x28] sm:$0xff] }
 0x3e5   : >> { %v1273_v30 = vsel %vm1257_vm5, %v1239_v63, -inf }
 0x3e6   : >> { %1274 = vmax.xlane.f32.xlu1 %v1273_v30  ;;  %v1125_v30 = vld [vmem:[%s4727_s21 + $0x40] sm:$0xff] }
 0x3e8   : >> { %v1243_v56 = vpop.f32.mrb[12].mxu0 }
 0x3e9   : >> { %v4843_v57 = vadd.f32 %v1243_v56, %v5902_v62  ;;  %v3346_v22 = vpop.f32.mrb[13].mxu0  ;;  %v4862_v56 = vpack.c.bf16 %v1122_v43, %v1119_v39 }
 0x3ea   : >> { %v1246_v23 = vpop.f32.mrb[14].mxu0  ;;  %v1128_v22 = vld [vmem:[%s4727_s21 + $0x58] sm:$0xff] }
 0x3eb   : >> { %v4846_v26 = vadd.f32 %v1246_v23, %v5902_v62  ;;  %v3347_v35 = vpop.f32.mrb[15].mxu0  ;;  %v1276_v34 = vsel %vm1257_vm5, %v4843_v57, -inf  ;;  %3353 = vmatpush3.bf16.msra.mxu1 %v4862_v56  ;;  %v4866_v23 = vpack.c.bf16 %v1128_v22, %v1125_v30 }
 0x3ec   : >> { %1277 = vmax.xlane.f32.xlu0 %v1276_v34  ;;  %3354 = vmatprep.subr.bf16.mxu1 %v5858_v45 }
 0x3ed   : >> { %v1279_v31 = vsel %vm1257_vm5, %v4846_v26, -inf }
 0x3ee   : >> { %1280 = vmax.xlane.f32.xlu1 %v1279_v31 }
 0x3ef   : >> { %3355 = vmatpush3.bf16.msra.mxu1 %v4866_v23 }
 0x3f0   : >> { %v1251_v24 = vpop.f32.mrb[16].mxu0  ;;  %3356 = vmatprep.subr.bf16.mxu1 %v5858_v45 }
 0x3f1   : >> { %v4853_v20 = vadd.f32 %v1251_v24, %v5902_v62  ;;  %v3350_v33 = vpop.f32.mrb[17].mxu0 }
 0x3f2   : >> { %v1254_v52 = vpop.f32.mrb[18].mxu0 }
 0x3f3   : >> { %v3351_v54 = vpop.f32.mrb[19].mxu0  ;;  %v1282_v36 = vsel %vm1257_vm5, %v4853_v20, -inf }
 0x3f4   : >> { %1283 = vmax.xlane.f32.xlu0 %v1282_v36 }
 0x3ff   : >> { %1497 = vrot.lane.b32.xlu1 %v4731_v29, %s4143_s11 }
 0x461   : >> { %v1260_v35 = vpop.xlane.xlu0 %1259 }
 0x462   : >> { %v1285_v34 = vsub.f32 %v1220_v61, %v1260_v35 }
 0x464   : >> { %v1294_v31 = vmul.f32 1.442695, %v1285_v34 }
 0x465   : >> { %v1263_v24 = vpop.xlane.xlu0 %1262 }
 0x466   : >> { %3802 = vpow2.f32 %v1294_v31  ;;  %v1286_v33 = vsub.f32 %v1223_v18, %v1263_v24 }
 0x468   : >> { %v1296_v52 = vmul.f32 1.442695, %v1286_v33 }
 0x469   : >> { %v1266_v54 = vpop.xlane.xlu1 %1265 }
 0x46a   : >> { %3804 = vpow2.f32 %v1296_v52  ;;  %v1287_v36 = vsub.f32 %v1228_v27, %v1266_v54 }
 0x46c   : >> { %v1298_v39 = vmul.f32 1.442695, %v1287_v36 }
 0x46d   : >> { %v1269_v43 = vpop.xlane.xlu1 %1268 }
 0x46e   : >> { %3806 = vpow2.f32 %v1298_v39  ;;  %v1288_v30 = vsub.f32 %v1231_v19, %v1269_v43  ;;  %v1131_v39 = vld [vmem:[%s4727_s21 + $0x70] sm:$0xff]  ;;  %v1134_v43 = vld [vmem:[%s4727_s21 + $0x88] sm:$0xff] }
 0x470   : >> { %v4871_v22 = vpop.eup %3802  ;;  %v1300_v21 = vmul.f32 1.442695, %v1288_v30 }
 0x471   : >> { %v1272_v9 = vpop.xlane.xlu0 %1271  ;;  %v1312_v45 = vsel %vm1257_vm5, %v4871_v22, 0.0 }
 0x472   : >> { %3808 = vpow2.f32 %v1300_v21  ;;  %v1289_v61 = vsub.f32 %v1236_v28, %v1272_v9  ;;  %1313 = vadd.xlane.f32.xlu1 %v1312_v45 }
 0x473   : >> { %v1275_v35 = vpop.xlane.xlu1 %1274 }
 0x474   : >> { %v4875_v18 = vpop.eup %3804  ;;  %v1302_v34 = vmul.f32 1.442695, %v1289_v61  ;;  %v1290_v31 = vsub.f32 %v1239_v63, %v1275_v35 }
 0x475   : >> { %v1315_v27 = vsel %vm1257_vm5, %v4875_v18, 0.0 }
 0x476   : >> { %3810 = vpow2.f32 %v1302_v34  ;;  %v1304_v19 = vmul.f32 1.442695, %v1290_v31  ;;  %1316 = vadd.xlane.f32.xlu0 %v1315_v27  ;;  %v5903_v27 = vmov 0.0  }
 0x478   : >> { %v4879_v24 = vpop.eup %3806  ;;  %3812 = vpow2.f32 %v1304_v19  ;;  %v1137_v19 = vld [vmem:[%s4727_s21 + $0xa0] sm:$0xff] }
 0x479   : >> { %v1278_v33 = vpop.xlane.xlu0 %1277  ;;  %v1318_v9 = vsel %vm1257_vm5, %v4879_v24, 0.0 }
 0x47a   : >> { %v1291_v21 = vsub.f32 %v4843_v57, %v1278_v33  ;;  %1319 = vadd.xlane.f32.xlu1 %v1318_v9  ;;  %v4893_v57 = vpack.c.bf16 %v1134_v43, %v1131_v39  ;;  %v1140_v33 = vld [vmem:[%s4727_s21 + $0xb8] sm:$0xff] }
 0x47b   : >> { %v1281_v45 = vpop.xlane.xlu1 %1280 }
 0x47c   : >> { %v4884_v28 = vpop.eup %3808  ;;  %v1306_v63 = vmul.f32 1.442695, %v1291_v21  ;;  %v1292_v52 = vsub.f32 %v4846_v26, %v1281_v45  ;;  %3357 = vmatpush3.bf16.msra.mxu1 %v4893_v57  ;;  %v4906_v21 = vpack.c.bf16 %v1140_v33, %v1137_v19  ;;  %v1143_v45 = vld [vmem:[%s4727_s21 + $0xd0] sm:$0xff] }
 0x47d   : >> { %v1321_v54 = vsel %vm1257_vm5, %v4884_v28, 0.0  ;;  %3358 = vmatprep.subr.bf16.mxu1 %v5903_v27 }
 0x47e   : >> { %3814 = vpow2.f32 %v1306_v63  ;;  %v1308_v36 = vmul.f32 1.442695, %v1292_v52  ;;  %1322 = vadd.xlane.f32.xlu0 %v1321_v54 }
 0x480   : >> { %v4891_v30 = vpop.eup %3810  ;;  %3816 = vpow2.f32 %v1308_v36  ;;  %3359 = vmatpush3.bf16.msra.mxu1 %v4906_v21 }
 0x481   : >> { %v1284_v61 = vpop.xlane.xlu0 %1283  ;;  %v1324_v26 = vsel %vm1257_vm5, %v4891_v30, 0.0  ;;  %3360 = vmatprep.subr.bf16.mxu1 %v5903_v27 }
 0x482   : >> { %v4897_v35 = vpop.eup %3812  ;;  %v1293_v34 = vsub.f32 %v4853_v20, %v1284_v61  ;;  %1325 = vadd.xlane.f32.xlu1 %v1324_v26  ;;  %v4911_v20 = vpack.c.bf16 %v1143_v45, %v1143_v45 }
 0x483   : >> { %v1327_v31 = vsel %vm1257_vm5, %v4897_v35, 0.0 }
 0x484   : >> { %v1310_v9 = vmul.f32 1.442695, %v1293_v34  ;;  %1328 = vadd.xlane.f32.xlu0 %v1327_v31  ;;  %v1393_v54 = vsel %vm1391_vm6, %v4911_v20, 0 }
 0x485   : >> { %3361 = vmatpush3.bf16.msra.mxu1 %v1393_v54 }
 0x486   : >> { %3818 = vpow2.f32 %v1310_v9  ;;  %3382 = vmatprep.subr.bf16.mxu1 %v5903_v27 }
 0x488   : >> { %v4913_v63 = vpop.eup %3814 }
 0x489   : >> { %v1330_v52 = vsel %vm1257_vm5, %v4913_v63, 0.0 }
 0x48a   : >> { %v4919_v36 = vpop.eup %3816  ;;  %1331 = vadd.xlane.f32.xlu1 %v1330_v52 }
 0x48b   : >> { %v1333_v39 = vsel %vm1257_vm5, %v4919_v36, 0.0 }
 0x48c   : >> { %1334 = vadd.xlane.f32.xlu0 %v1333_v39 }
 0x490   : >> { %v4924_v43 = vpop.eup %3818 }
 0x491   : >> { %v1336_v61 = vsel %vm1257_vm5, %v4924_v43, 0.0 }
 0x492   : >> { %1337 = vadd.xlane.f32.xlu0 %v1336_v61 }
 0x49b   : >> { %1501 = vrot.lane.b32.xlu1 %v4745_v32, %s4143_s11 }
 0x49f   : >> { %1503 = vrot.lane.b32.xlu1 %v4752_v53, %s4143_s11 }
 0x4a3   : >> { %1505 = vrot.lane.b32.xlu1 %v4758_v42, %s4143_s11 }
 0x4a7   : >> { %1482 = vrot.lane.b32.xlu1 %v4771_v44, %s4143_s11 }
 0x4a8   : >> { %1499 = vrot.lane.b32.xlu0 %v4738_v38, %s4143_s11 }
 0x4ab   : >> { %1484 = vrot.lane.b32.xlu1 %v4785_v49, %s4143_s11 }
 0x4ac   : >> { %1914 = vrot.lane.b32.xlu0 %v4731_v29, %s4144_s12 }
 0x4af   : >> { %1486 = vrot.lane.b32.xlu1 %v4799_v60, %s4143_s11 }
 0x4b0   : >> { %1916 = vrot.lane.b32.xlu0 %v4738_v38, %s4144_s12 }
 0x4b3   : >> { %1488 = vrot.lane.b32.xlu1 %v4813_v58, %s4143_s11 }
 0x4b4   : >> { %1918 = vrot.lane.b32.xlu0 %v4745_v32, %s4144_s12 }
 0x4b7   : >> { %1490 = vrot.lane.b32.xlu1 %v4824_v55, %s4143_s11 }
 0x4b8   : >> { %1920 = vrot.lane.b32.xlu0 %v4752_v53, %s4144_s12 }
 0x4bb   : >> { %1904 = vrot.lane.b32.xlu1 %v4771_v44, %s4144_s12 }
 0x4bc   : >> { %1922 = vrot.lane.b32.xlu0 %v4758_v42, %s4144_s12 }
 0x4bf   : >> { %1906 = vrot.lane.b32.xlu1 %v4785_v49, %s4144_s12 }
 0x4c0   : >> { %2317 = vrot.lane.b32.xlu0 %v4731_v29, %s4145_s30  ;;  %v1498_v29 = vpop.permute.xlu1 %1497 }
 0x4c1   : >> { %v1523_v31 = vsel %vm1154_vm4, %v1498_v29, 0 }
 0x4c3   : >> { %1908 = vrot.lane.b32.xlu1 %v4799_v60, %s4144_s12 }
 0x4c4   : >> { %2319 = vrot.lane.b32.xlu0 %v4738_v38, %s4145_s30 }
 0x4c7   : >> { %1910 = vrot.lane.b32.xlu1 %v4813_v58, %s4144_s12 }
 0x4c8   : >> { %2321 = vrot.lane.b32.xlu0 %v4745_v32, %s4145_s30 }
 0x4cb   : >> { %1912 = vrot.lane.b32.xlu1 %v4824_v55, %s4144_s12 }
 0x4cc   : >> { %2323 = vrot.lane.b32.xlu0 %v4752_v53, %s4145_s30 }
 0x4cf   : >> { %2307 = vrot.lane.b32.xlu1 %v4771_v44, %s4145_s30 }
 0x4d0   : >> { %2325 = vrot.lane.b32.xlu0 %v4758_v42, %s4145_s30 }
 0x4d3   : >> { %2311 = vrot.lane.b32.xlu1 %v4799_v60, %s4145_s30 }
 0x4d4   : >> { %2309 = vrot.lane.b32.xlu0 %v4785_v49, %s4145_s30 }
 0x4d7   : >> { %2315 = vrot.lane.b32.xlu1 %v4824_v55, %s4145_s30 }
 0x4d8   : >> { %2313 = vrot.lane.b32.xlu0 %v4813_v58, %s4145_s30 }
 0x4db   : >> { %1720 = vrot.lane.b32.xlu1 %v4866_v23, %s4143_s11 }
 0x4dc   : >> { %1718 = vrot.lane.b32.xlu0 %v4862_v56, %s4143_s11 }
 0x4df   : >> { %1724 = vrot.lane.b32.xlu1 %v4906_v21, %s4143_s11 }
 0x4e0   : >> { %1722 = vrot.lane.b32.xlu0 %v4893_v57, %s4143_s11 }
 0x4e3   : >> { %2132 = vrot.lane.b32.xlu1 %v4866_v23, %s4144_s12 }
 0x4e4   : >> { %1726 = vrot.lane.b32.xlu0 %v4911_v20, %s4143_s11 }
 0x4e7   : >> { %2136 = vrot.lane.b32.xlu1 %v4906_v21, %s4144_s12 }
 0x4e8   : >> { %2130 = vrot.lane.b32.xlu0 %v4862_v56, %s4144_s12 }
 0x4ec   : >> { %2134 = vrot.lane.b32.xlu0 %v4893_v57, %s4144_s12 }
 0x4ff   : >> { %v1314_v38 = vpop.xlane.xlu1 %1313 }
 0x500   : >> { %3820 = vrcp.f32 %v1314_v38 }
 0x503   : >> { %v1317_v32 = vpop.xlane.xlu0 %1316 }
 0x504   : >> { %3822 = vrcp.f32 %v1317_v32 }
 0x507   : >> { %v1320_v53 = vpop.xlane.xlu1 %1319 }
 0x508   : >> { %3824 = vrcp.f32 %v1320_v53 }
 0x50a   : >> { %v3821_v44 = vpop.eup %3820 }
 0x50b   : >> { %v1323_v42 = vpop.xlane.xlu0 %1322  ;;  %v1348_v58 = vmul.f32 %v3821_v44, %v4871_v22 }
 0x50c   : >> { %3826 = vrcp.f32 %v1323_v42 }
 0x50e   : >> { %v3823_v49 = vpop.eup %3822 }
 0x50f   : >> { %v1326_v60 = vpop.xlane.xlu1 %1325  ;;  %v1349_v55 = vmul.f32 %v3823_v49, %v4875_v18 }
 0x510   : >> { %3828 = vrcp.f32 %v1326_v60 }
 0x511   : >> { %v1329_v26 = vpop.xlane.xlu0 %1328  ;;  %v1357_v34 = vpack.c.bf16 %v1349_v55, %v1348_v58 }
 0x512   : >> { %3830 = vrcp.f32 %v1329_v26  ;;  %v3825_v19 = vpop.eup %3824 }
 0x513   : >> { %3363 = vmatmul.mubr.msk.bf16.vlgmr.msra.gmra.mrb[0].mxu1 %vm1257_vm5, %v1357_v34  ;;  %v1350_v22 = vmul.f32 %v3825_v19, %v4879_v24 }
 0x514   : >> { %3383 = vmatpush3.bf16.xpose.msra.mxu1 %v1523_v31  ;;  %3366 = vmatprep.mubr.msk.bf16.mxu1 %vm4142_vm3, %v5903_v27 }
 0x515   : >> { %3384 = vmatprep.subr.bf16.mxu1 %v5903_v27 }
 0x516   : >> { %v3827_v33 = vpop.eup %3826 }
 0x517   : >> { %v1332_v9 = vpop.xlane.xlu1 %1331  ;;  %v1351_v18 = vmul.f32 %v3827_v33, %v4884_v28 }
 0x518   : >> { %3832 = vrcp.f32 %v1332_v9 }
 0x519   : >> { %v1335_v45 = vpop.xlane.xlu0 %1334  ;;  %v1358_v52 = vpack.c.bf16 %v1351_v18, %v1350_v22 }
 0x51a   : >> { %3834 = vrcp.f32 %v1335_v45  ;;  %v3829_v54 = vpop.eup %3828 }
 0x51b   : >> { %3367 = vmatmul.mubr.msk.bf16.gmra.mrb[4].mxu1 %vm1257_vm5, %v1358_v52  ;;  %v1352_v38 = vmul.f32 %v3829_v54, %v4891_v30 }
 0x51c   : >> { %v3831_v39 = vpop.eup %3830  ;;  %3370 = vmatprep.mubr.msk.bf16.mxu1 %vm4142_vm3, %v5903_v27 }
 0x51d   : >> { %v1353_v61 = vmul.f32 %v3831_v39, %v4897_v35  ;;  %v1502_v35 = vpop.permute.xlu1 %1501 }
 0x51e   : >> { %v1529_v58 = vsel %vm1154_vm4, %v1502_v35, 0 }
 0x51f   : >> { %v1338_v29 = vpop.xlane.xlu0 %1337  ;;  %v1359_v24 = vpack.c.bf16 %v1353_v61, %v1352_v38 }
 0x520   : >> { %3836 = vrcp.f32 %v1338_v29 }
 0x522   : >> { %v3833_v32 = vpop.eup %3832 }
 0x523   : >> { %3371 = vmatmul.mubr.msk.bf16.gmra.mrb[8].mxu1 %vm1257_vm5, %v1359_v24  ;;  %v1500_v28 = vpop.permute.xlu0 %1499  ;;  %v1354_v30 = vmul.f32 %v3833_v32, %v4913_v63 }
 0x524   : >> { %v3835_v53 = vpop.eup %3834  ;;  %v1526_v42 = vsel %vm1154_vm4, %v1500_v28, 0  ;;  %3374 = vmatprep.mubr.msk.bf16.mxu1 %vm4142_vm3, %v5903_v27 }
 0x525   : >> { %3385 = vmatpush3.bf16.xpose.msra.mxu1 %v1526_v42  ;;  %v1355_v44 = vmul.f32 %v3835_v53, %v4919_v36  ;;  %v1504_v36 = vpop.permute.xlu1 %1503 }
 0x526   : >> { %3386 = vmatprep.subr.bf16.mxu1 %v5903_v27  ;;  %v1532_v34 = vsel %vm1154_vm4, %v1504_v36, 0 }
 0x527   : >> { %v1360_v49 = vpack.c.bf16 %v1355_v44, %v1354_v30 }
 0x529   : >> { %v1506_v63 = vpop.permute.xlu1 %1505 }
 0x52a   : >> { %v3837_v60 = vpop.eup %3836  ;;  %v1535_v31 = vsel %vm1154_vm4, %v1506_v63, 0 }
 0x52b   : >> { %3375 = vmatmul.mubr.msk.bf16.gmra.mrb[12].mxu1 %vm1257_vm5, %v1360_v49  ;;  %v1356_v55 = vmul.f32 %v3837_v60, %v4924_v43  ;;  %v1915_v43 = vpop.permute.xlu0 %1914 }
 0x52c   : >> { %3378 = vmatprep.mubr.msk.bf16.mxu1 %vm4142_vm3, %v5903_v27  ;;  %v1940_v33 = vsel %vm1154_vm4, %v1915_v43, 0 }
 0x52d   : >> { %3387 = vmatpush3.bf16.xpose.msra.mxu1 %v1529_v58  ;;  %v1361_v26 = vpack.c.bf16 %v1356_v55, %v1356_v55  ;;  %v1483_v19 = vpop.permute.xlu1 %1482 }
 0x52e   : >> { %3388 = vmatprep.subr.bf16.mxu1 %v5903_v27 }
 0x52f   : >> { %v1917_v9 = vpop.permute.xlu0 %1916 }
 0x530   : >> { %v1943_v18 = vsel %vm1154_vm4, %v1917_v9, 0 }
 0x531   : >> { %v1485_v22 = vpop.permute.xlu1 %1484 }
 0x533   : >> { %3379 = vmatmul.mubr.msk.bf16.gmra.mrb[16].mxu1 %vm1257_vm5, %v1361_v26  ;;  %v1919_v45 = vpop.permute.xlu0 %1918 }
 0x534   : >> { %3392 = vmatprep.mubr.msk.bf16.mxu1 %vm4142_vm3, %v5903_v27  ;;  %v1946_v54 = vsel %vm1154_vm4, %v1919_v45, 0 }
 0x535   : >> { %3389 = vmatpush3.bf16.xpose.msra.mxu1 %v1532_v34  ;;  %v1487_v52 = vpop.permute.xlu1 %1486 }
 0x536   : >> { %3390 = vmatprep.subr.bf16.mxu1 %v5903_v27 }
 0x537   : >> { %v1921_v39 = vpop.permute.xlu0 %1920 }
 0x538   : >> { %v1949_v29 = vsel %vm1154_vm4, %v1921_v39, 0 }
 0x539   : >> { %v1489_v61 = vpop.permute.xlu1 %1488 }
 0x53b   : >> { %v1923_v38 = vpop.permute.xlu0 %1922 }
 0x53c   : >> { %v1952_v32 = vsel %vm1154_vm4, %v1923_v38, 0 }
 0x53d   : >> { %3391 = vmatpush3.bf16.xpose.msra.mxu1 %v1535_v31  ;;  %v1491_v24 = vpop.permute.xlu1 %1490 }
 0x53e   : >> { %3442 = vmatprep.subr.bf16.mxu1 %v5903_v27 }
 0x53f   : >> { %v2318_v28 = vpop.permute.xlu0 %2317 }
 0x540   : >> { %v2343_v42 = vsel %vm1154_vm4, %v2318_v28, 0 }
 0x541   : >> { %v1905_v53 = vpop.permute.xlu1 %1904 }
 0x543   : >> { %v2320_v44 = vpop.permute.xlu0 %2319 }
 0x544   : >> { %3393 = vmatmul.mubr.msk.bf16.vlgmr.msra.gmra.mrb[20].mxu1 %vm1154_vm4, %v1483_v19  ;;  %v2346_v30 = vsel %vm1154_vm4, %v2320_v44, 0 }
 0x545   : >> { %3443 = vmatpush3.bf16.xpose.msra.mxu1 %v1940_v33  ;;  %3396 = vmatprep.mubr.msk.bf16.mxu1 %vm4142_vm3, %v5903_v27  ;;  %v1907_v35 = vpop.permute.xlu1 %1906 }
 0x546   : >> { %3444 = vmatprep.subr.bf16.mxu1 %v5903_v27 }
 0x547   : >> { %v2322_v49 = vpop.permute.xlu0 %2321 }
 0x548   : >> { %v2349_v58 = vsel %vm1154_vm4, %v2322_v49, 0 }
 0x549   : >> { %v1909_v60 = vpop.permute.xlu1 %1908 }
 0x54b   : >> { %v2324_v55 = vpop.permute.xlu0 %2323 }
 0x54c   : >> { %3397 = vmatmul.mubr.msk.bf16.gmra.mrb[24].mxu1 %vm1154_vm4, %v1485_v22  ;;  %v2352_v26 = vsel %vm1154_vm4, %v2324_v55, 0 }
 0x54d   : >> { %3445 = vmatpush3.bf16.xpose.msra.mxu1 %v1943_v18  ;;  %3400 = vmatprep.mubr.msk.bf16.mxu1 %vm4142_vm3, %v5903_v27  ;;  %v1911_v36 = vpop.permute.xlu1 %1910 }
 0x54e   : >> { %3446 = vmatprep.subr.bf16.mxu1 %v5903_v27 }
 0x54f   : >> { %v2326_v34 = vpop.permute.xlu0 %2325 }
 0x550   : >> { %v2355_v31 = vsel %vm1154_vm4, %v2326_v34, 0 }
 0x551   : >> { %v1913_v63 = vpop.permute.xlu1 %1912 }
 0x553   : >> { %v2310_v19 = vpop.permute.xlu0 %2309 }
 0x554   : >> { %3401 = vmatmul.mubr.msk.bf16.gmra.mrb[28].mxu1 %vm1154_vm4, %v1487_v52  ;;  %v5107_v52 = vmul.f32 %v5904_v25, %v4763_v47 }
 0x555   : >> { %3447 = vmatpush3.bf16.xpose.msra.mxu1 %v1946_v54  ;;  %3404 = vmatprep.mubr.msk.bf16.mxu1 %vm4142_vm3, %v5903_v27  ;;  %v2308_v43 = vpop.permute.xlu1 %2307 }
 0x556   : >> { %3448 = vmatprep.subr.bf16.mxu1 %v5903_v27 }
 0x557   : >> { %v2314_v9 = vpop.permute.xlu0 %2313 }
 0x559   : >> { %v2312_v33 = vpop.permute.xlu1 %2311 }
 0x55b   : >> { %v1719_v18 = vpop.permute.xlu0 %1718 }
 0x55c   : >> { %3405 = vmatmul.mubr.msk.bf16.gmra.mrb[32].mxu1 %vm1154_vm4, %v1489_v61  ;;  %3413 = vmatpush3.bf16.msra.mxu0 %v1719_v18 }
 0x55d   : >> { %3449 = vmatpush3.bf16.xpose.msra.mxu1 %v1949_v29  ;;  %3408 = vmatprep.mubr.msk.bf16.mxu1 %vm4142_vm3, %v5903_v27  ;;  %v2316_v22 = vpop.permute.xlu1 %2315 }
 0x55e   : >> { %3450 = vmatprep.subr.bf16.mxu1 %v5903_v27  ;;  %3414 = vmatprep.subr.bf16.mxu0 %v5903_v27 }
 0x55f   : >> { %v1723_v54 = vpop.permute.xlu0 %1722 }
 0x561   : >> { %v1721_v45 = vpop.permute.xlu1 %1720 }
 0x562   : >> { %3415 = vmatpush3.bf16.msra.mxu0 %v1721_v45 }
 0x563   : >> { %3416 = vmatprep.subr.bf16.mxu0 %v5903_v27  ;;  %v1727_v28 = vpop.permute.xlu0 %1726 }
 0x564   : >> { %3409 = vmatmul.mubr.msk.bf16.gmra.mrb[36].mxu1 %vm1154_vm4, %v1491_v24 }
 0x565   : >> { %3451 = vmatpush3.bf16.xpose.msra.mxu1 %v1952_v32  ;;  %3452 = vmatprep.mubr.msk.bf16.mxu1 %vm4142_vm3, %v5903_v27  ;;  %v1725_v61 = vpop.permute.xlu1 %1724 }
 0x566   : >> { %3502 = vmatprep.subr.bf16.mxu1 %v5903_v27  ;;  %3417 = vmatpush3.bf16.msra.mxu0 %v1723_v54 }
 0x567   : >> { %3418 = vmatprep.subr.bf16.mxu0 %v5903_v27 }
 0x56a   : >> { %3419 = vmatpush3.bf16.msra.mxu0 %v1725_v61 }
 0x56b   : >> { %3420 = vmatprep.subr.bf16.mxu0 %v5903_v27 }
 0x56c   : >> { %3453 = vmatmul.mubr.msk.bf16.vlgmr.msra.gmra.mrb[40].mxu1 %vm1154_vm4, %v1905_v53  ;;  %v1784_v53 = vsel %vm1391_vm6, %v1727_v28, 0 }
 0x56d   : >> { %3503 = vmatpush3.bf16.xpose.msra.mxu1 %v2343_v42  ;;  %3456 = vmatprep.mubr.msk.bf16.mxu1 %vm4142_vm3, %v5903_v27 }
 0x56e   : >> { %3504 = vmatprep.subr.bf16.mxu1 %v5903_v27  ;;  %3421 = vmatpush3.bf16.msra.mxu0 %v1784_v53 }
 0x56f   : >> { %3472 = vmatprep.subr.bf16.mxu0 %v5903_v27 }
 0x574   : >> { %3457 = vmatmul.mubr.msk.bf16.gmra.mrb[44].mxu1 %vm1154_vm4, %v1907_v35 }
 0x575   : >> { %3505 = vmatpush3.bf16.xpose.msra.mxu1 %v2346_v30  ;;  %3460 = vmatprep.mubr.msk.bf16.mxu1 %vm4142_vm3, %v5903_v27 }
 0x576   : >> { %3506 = vmatprep.subr.bf16.mxu1 %v5903_v27 }
 0x57c   : >> { %3461 = vmatmul.mubr.msk.bf16.gmra.mrb[48].mxu1 %vm1154_vm4, %v1909_v60 }
 0x57d   : >> { %3507 = vmatpush3.bf16.xpose.msra.mxu1 %v2349_v58  ;;  %3464 = vmatprep.mubr.msk.bf16.mxu1 %vm4142_vm3, %v5903_v27 }
 0x57e   : >> { %3508 = vmatprep.subr.bf16.mxu1 %v5903_v27 }
 0x584   : >> { %3465 = vmatmul.mubr.msk.bf16.gmra.mrb[52].mxu1 %vm1154_vm4, %v1911_v36 }
 0x585   : >> { %3509 = vmatpush3.bf16.xpose.msra.mxu1 %v2352_v26  ;;  %3468 = vmatprep.mubr.msk.bf16.mxu1 %vm4142_vm3, %v5903_v27 }
 0x586   : >> { %3510 = vmatprep.subr.bf16.mxu1 %v5903_v27 }
 0x58c   : >> { %3469 = vmatmul.mubr.msk.bf16.gmra.mrb[56].mxu1 %vm1154_vm4, %v1913_v63 }
 0x58d   : >> { %3511 = vmatpush3.bf16.xpose.msra.mxu1 %v2355_v31  ;;  %3512 = vmatprep.mubr.msk.bf16.mxu1 %vm4142_vm3, %v5903_v27 }
 0x58e   : >> { %3614 = vmatprep.subr.bf16.mxu1 %v5903_v27 }
 0x594   : >> { %3513 = vmatmul.mubr.msk.bf16.vlgmr.msra.gmra.mrb[60].mxu1 %vm1154_vm4, %v2308_v43 }
 0x595   : >> { %3516 = vmatprep.mubr.msk.bf16.mxu1 %vm4142_vm3, %v5903_v27 }
 0x59c   : >> { %3517 = vmatmul.mubr.msk.bf16.gmra.mrb[64].mxu1 %vm1154_vm4, %v2310_v19 }
 0x59d   : >> { %3520 = vmatprep.mubr.msk.bf16.mxu1 %vm4142_vm3, %v5903_v27 }
 0x5a4   : >> { %3521 = vmatmul.mubr.msk.bf16.gmra.mrb[68].mxu1 %vm1154_vm4, %v2312_v33 }
 0x5a5   : >> { %3524 = vmatprep.mubr.msk.bf16.mxu1 %vm4142_vm3, %v5903_v27 }
 0x5ac   : >> { %3525 = vmatmul.mubr.msk.bf16.gmra.mrb[72].mxu1 %vm1154_vm4, %v2314_v9 }
 0x5ad   : >> { %3528 = vmatprep.mubr.msk.bf16.mxu1 %vm4142_vm3, %v5903_v27 }
 0x5b4   : >> { %3529 = vmatmul.mubr.msk.bf16.gmra.mrb[76].mxu1 %vm1154_vm4, %v2316_v22 }
 0x5b5   : >> { %3558 = vmatprep.mubr.msk.bf16.mxu1 %vm4142_vm3, %v5903_v27 }
 0x5e6   : >> { %v1429_v39 = vpop.f32.mrb[0].mxu1 }
 0x5e7   : >> { %v1430_v29 = vadd.f32 %v1429_v39, %v5107_v52  ;;  %v3364_v38 = vpop.f32.mrb[1].mxu1 }
 0x5e8   : >> { %v1432_v24 = vpop.f32.mrb[2].mxu1 }
 0x5e9   : >> { %1468 = vst.msk [vmem:[%s5113_s9] sm:$0xff] %vm1154_vm4, %v1430_v29  ;;  %v1433_v47 = vadd.f32 %v1432_v24, %v4766_v41  ;;  %v3365_v32 = vpop.f32.mrb[3].mxu1 }
 0x5eb   : >> { %1469 = vst.msk [vmem:[%s5113_s9 + $0x8] sm:$0xff] %vm1154_vm4, %v1433_v47 }
 0x5ee   : >> { %v1437_v42 = vpop.f32.mrb[4].mxu1 }
 0x5ef   : >> { %v1438_v44 = vadd.f32 %v1437_v42, %v4778_v37  ;;  %v3368_v35 = vpop.f32.mrb[5].mxu1 }
 0x5f0   : >> { %v1440_v41 = vpop.f32.mrb[6].mxu1 }
 0x5f1   : >> { %1470 = vst.msk [vmem:[%s5113_s9 + $0x10] sm:$0xff] %vm1154_vm4, %v1438_v44  ;;  %v1441_v30 = vadd.f32 %v1440_v41, %v4781_v48  ;;  %v3369_v49 = vpop.f32.mrb[7].mxu1 }
 0x5f3   : >> { %1471 = vst.msk [vmem:[%s5113_s9 + $0x18] sm:$0xff] %vm1154_vm4, %v1441_v30 }
 0x5f6   : >> { %v1445_v60 = vpop.f32.mrb[8].mxu1 }
 0x5f7   : >> { %v1446_v58 = vadd.f32 %v1445_v60, %v4792_v50  ;;  %v3372_v55 = vpop.f32.mrb[9].mxu1 }
 0x5f8   : >> { %v1448_v36 = vpop.f32.mrb[10].mxu1 }
 0x5f9   : >> { %1472 = vst.msk [vmem:[%s5113_s9 + $0x20] sm:$0xff] %vm1154_vm4, %v1446_v58  ;;  %v1449_v37 = vadd.f32 %v1448_v36, %v4795_v51  ;;  %v3373_v26 = vpop.f32.mrb[11].mxu1 }
 0x5fb   : >> { %1473 = vst.msk [vmem:[%s5113_s9 + $0x28] sm:$0xff] %vm1154_vm4, %v1449_v37 }
 0x5fe   : >> { %v1453_v34 = vpop.f32.mrb[12].mxu1 }
 0x5ff   : >> { %v1454_v48 = vadd.f32 %v1453_v34, %v4806_v46  ;;  %v3376_v63 = vpop.f32.mrb[13].mxu1 }
 0x600   : >> { %v1456_v31 = vpop.f32.mrb[14].mxu1 }
 0x601   : >> { %1474 = vst.msk [vmem:[%s5113_s9 + $0x30] sm:$0xff] %vm1154_vm4, %v1454_v48  ;;  %v1457_v43 = vadd.f32 %v1456_v31, %v4809_v59  ;;  %v3377_v50 = vpop.f32.mrb[15].mxu1 }
 0x603   : >> { %1475 = vst.msk [vmem:[%s5113_s9 + $0x38] sm:$0xff] %vm1154_vm4, %v1457_v43 }
 0x606   : >> { %v1461_v19 = vpop.f32.mrb[16].mxu1 }
 0x607   : >> { %v1462_v33 = vadd.f32 %v1461_v19, %v4820_v40  ;;  %v3380_v9 = vpop.f32.mrb[17].mxu1 }
 0x608   : >> { %v1464_v51 = vpop.f32.mrb[18].mxu1 }
 0x609   : >> { %1476 = vst.msk [vmem:[%s5113_s9 + $0x40] sm:$0xff] %vm1154_vm4, %v1462_v33  ;;  %v3381_v22 = vpop.f32.mrb[19].mxu1 }
 0x617   : >> { %v1571_v18 = vpop.f32.mrb[20].mxu1 }
 0x618   : >> { %v5145_v46 = vadd.f32 %v1571_v18, %v5902_v62  ;;  %v3394_v45 = vpop.f32.mrb[21].mxu1 }
 0x619   : >> { %v1574_v54 = vpop.f32.mrb[22].mxu1 }
 0x61a   : >> { %v5148_v39 = vadd.f32 %v1574_v54, %v5902_v62  ;;  %v3395_v59 = vpop.f32.mrb[23].mxu1  ;;  %v1609_v61 = vsel %vm1257_vm5, %v5145_v46, -inf }
 0x61b   : >> { %1610 = vmax.xlane.f32.xlu0 %v1609_v61 }
 0x61c   : >> { %v1612_v40 = vsel %vm1257_vm5, %v5148_v39, -inf }
 0x61d   : >> { %1613 = vmax.xlane.f32.xlu1 %v1612_v40 }
 0x61f   : >> { %v1579_v29 = vpop.f32.mrb[24].mxu1 }
 0x620   : >> { %v5155_v38 = vadd.f32 %v1579_v29, %v5902_v62  ;;  %v3398_v24 = vpop.f32.mrb[25].mxu1 }
 0x621   : >> { %v1582_v47 = vpop.f32.mrb[26].mxu1 }
 0x622   : >> { %v5158_v32 = vadd.f32 %v1582_v47, %v5902_v62  ;;  %v3399_v28 = vpop.f32.mrb[27].mxu1  ;;  %v1615_v53 = vsel %vm1257_vm5, %v5155_v38, -inf }
 0x623   : >> { %1616 = vmax.xlane.f32.xlu0 %v1615_v53 }
 0x624   : >> { %v1618_v42 = vsel %vm1257_vm5, %v5158_v32, -inf }
 0x627   : >> { %1619 = vmax.xlane.f32.xlu0 %v1618_v42  ;;  %v1587_v44 = vpop.f32.mrb[28].mxu1 }
 0x628   : >> { %v3402_v35 = vpop.f32.mrb[29].mxu1  ;;  %v5182_v29 = vadd.f32 %v1587_v44, %v5902_v62 }
 0x629   : >> { %v1590_v41 = vpop.f32.mrb[30].mxu1 }
 0x62a   : >> { %v3403_v30 = vpop.f32.mrb[31].mxu1 }
 0x62b   : >> { %v1621_v30 = vsel %vm1257_vm5, %v5182_v29, -inf }
 0x62e   : >> { %2533 = vrot.lane.b32.xlu1 %v4862_v56, %s4145_s30  ;;  %v5169_v56 = vadd.f32 %v1590_v41, %v5902_v62 }
 0x62f   : >> { %v1595_v49 = vpop.f32.mrb[32].mxu1 }
 0x630   : >> { %v3406_v60 = vpop.f32.mrb[33].mxu1  ;;  %v1624_v22 = vsel %vm1257_vm5, %v5169_v56, -inf  ;;  %v5190_v41 = vadd.f32 %v1595_v49, %v5902_v62 }
 0x631   : >> { %v1598_v58 = vpop.f32.mrb[34].mxu1 }
 0x632   : >> { %v3407_v55 = vpop.f32.mrb[35].mxu1  ;;  %v5172_v51 = vadd.f32 %v1598_v58, %v5902_v62 }
 0x633   : >> { %v1627_v55 = vsel %vm1257_vm5, %v5190_v41, -inf }
 0x634   : >> { %v1630_v40 = vsel %vm1257_vm5, %v5172_v51, -inf }
 0x637   : >> { %v1603_v36 = vpop.f32.mrb[36].mxu1 }
 0x638   : >> { %v3410_v37 = vpop.f32.mrb[37].mxu1  ;;  %v5200_v58 = vadd.f32 %v1603_v36, %v5902_v62 }
 0x639   : >> { %v1606_v26 = vpop.f32.mrb[38].mxu1 }
 0x63a   : >> { %v3411_v34 = vpop.f32.mrb[39].mxu1  ;;  %v1633_v36 = vsel %vm1257_vm5, %v5200_v58, -inf }
 0x63d   : >> { %2138 = vrot.lane.b32.xlu0 %v4911_v20, %s4144_s12 }
 0x63f   : >> { %v1988_v48 = vpop.f32.mrb[40].mxu1 }
 0x640   : >> { %v3454_v63 = vpop.f32.mrb[41].mxu1  ;;  %v5177_v61 = vadd.f32 %v1988_v48, %v5902_v62 }
 0x641   : >> { %v1991_v31 = vpop.f32.mrb[42].mxu1 }
 0x642   : >> { %v3455_v43 = vpop.f32.mrb[43].mxu1  ;;  %v2026_v47 = vsel %vm1257_vm5, %v5177_v61, -inf  ;;  %v5210_v48 = vadd.f32 %v1991_v31, %v5902_v62 }
 0x644   : >> { %v2029_v31 = vsel %vm1257_vm5, %v5210_v48, -inf }
 0x647   : >> { %v1996_v50 = vpop.f32.mrb[44].mxu1 }
 0x648   : >> { %v3458_v19 = vpop.f32.mrb[45].mxu1  ;;  %v5185_v24 = vadd.f32 %v1996_v50, %v5902_v62 }
 0x649   : >> { %v1999_v33 = vpop.f32.mrb[46].mxu1 }
 0x64a   : >> { %v3459_v9 = vpop.f32.mrb[47].mxu1  ;;  %v2032_v60 = vsel %vm1257_vm5, %v5185_v24, -inf }
 0x64b   : >> { %v5220_v9 = vadd.f32 %v1999_v33, %v5902_v62 }
 0x64f   : >> { %v2004_v18 = vpop.f32.mrb[48].mxu1 }
 0x650   : >> { %v3462_v45 = vpop.f32.mrb[49].mxu1  ;;  %v5195_v44 = vadd.f32 %v2004_v18, %v5902_v62 }
 0x651   : >> { %v2007_v54 = vpop.f32.mrb[50].mxu1 }
 0x652   : >> { %1625 = vmax.xlane.f32.xlu1 %v1624_v22  ;;  %v3463_v59 = vpop.f32.mrb[51].mxu1  ;;  %v2038_v37 = vsel %vm1257_vm5, %v5195_v44, -inf }
 0x653   : >> { %v5227_v59 = vadd.f32 %v2007_v54, %v5902_v62 }
 0x655   : >> { %v2041_v54 = vsel %vm1257_vm5, %v5227_v59, -inf }
 0x656   : >> { %1631 = vmax.xlane.f32.xlu1 %v1630_v40 }
 0x657   : >> { %v2012_v28 = vpop.f32.mrb[52].mxu1 }
 0x658   : >> { %v3466_v53 = vpop.f32.mrb[53].mxu1  ;;  %v5205_v49 = vadd.f32 %v2012_v28, %v5902_v62 }
 0x659   : >> { %v2015_v42 = vpop.f32.mrb[54].mxu1 }
 0x65a   : >> { %2027 = vmax.xlane.f32.xlu1 %v2026_v47  ;;  %v3467_v35 = vpop.f32.mrb[55].mxu1  ;;  %v2044_v19 = vsel %vm1257_vm5, %v5205_v49, -inf  ;;  %v2035_v47 = vsel %vm1257_vm5, %v5220_v9, -inf }
 0x65b   : >> { %v5237_v35 = vadd.f32 %v2015_v42, %v5902_v62 }
 0x65c   : >> { %1622 = vmax.xlane.f32.xlu0 %v1621_v30 }
 0x65e   : >> { %2033 = vmax.xlane.f32.xlu1 %v2032_v60 }
 0x65f   : >> { %v2020_v26 = vpop.f32.mrb[56].mxu1 }
 0x660   : >> { %1628 = vmax.xlane.f32.xlu0 %v1627_v55  ;;  %v3470_v34 = vpop.f32.mrb[57].mxu1  ;;  %v5215_v50 = vadd.f32 %v2020_v26, %v5902_v62  ;;  %v2047_v26 = vsel %vm1257_vm5, %v5237_v35, -inf }
 0x661   : >> { %v2023_v63 = vpop.f32.mrb[58].mxu1 }
 0x662   : >> { %2039 = vmax.xlane.f32.xlu1 %v2038_v37  ;;  %v3471_v43 = vpop.f32.mrb[59].mxu1  ;;  %v2050_v18 = vsel %vm1257_vm5, %v5215_v50, -inf }
 0x664   : >> { %1634 = vmax.xlane.f32.xlu0 %v1633_v36 }
 0x666   : >> { %2045 = vmax.xlane.f32.xlu1 %v2044_v19 }
 0x667   : >> { %v2391_v22 = vpop.f32.mrb[60].mxu1 }
 0x668   : >> { %2030 = vmax.xlane.f32.xlu0 %v2029_v31  ;;  %v3514_v45 = vpop.f32.mrb[61].mxu1  ;;  %v5242_v55 = vadd.f32 %v2391_v22, %v5902_v62 }
 0x669   : >> { %v2394_v40 = vpop.f32.mrb[62].mxu1 }
 0x66a   : >> { %2051 = vmax.xlane.f32.xlu1 %v2050_v18  ;;  %v5232_v33 = vadd.f32 %v2394_v40, %v5902_v62  ;;  %v3515_v28 = vpop.f32.mrb[63].mxu1  ;;  %v2429_v43 = vsel %vm1257_vm5, %v5242_v55, -inf }
 0x66c   : >> { %2036 = vmax.xlane.f32.xlu0 %v2035_v47  ;;  %v2432_v53 = vsel %vm1257_vm5, %v5232_v33, -inf }
 0x66e   : >> { %2433 = vmax.xlane.f32.xlu1 %v2432_v53 }
 0x66f   : >> { %v2399_v30 = vpop.f32.mrb[64].mxu1 }
 0x670   : >> { %2042 = vmax.xlane.f32.xlu0 %v2041_v54  ;;  %v3518_v60 = vpop.f32.mrb[65].mxu1  ;;  %v5252_v63 = vadd.f32 %v2399_v30, %v5902_v62 }
 0x671   : >> { %v2402_v37 = vpop.f32.mrb[66].mxu1 }
 0x672   : >> { %v5247_v34 = vadd.f32 %v2402_v37, %v5902_v62  ;;  %v3519_v36 = vpop.f32.mrb[67].mxu1  ;;  %v2435_v45 = vsel %vm1257_vm5, %v5252_v63, -inf }
 0x674   : >> { %2048 = vmax.xlane.f32.xlu0 %v2047_v26  ;;  %v2438_v42 = vsel %vm1257_vm5, %v5247_v34, -inf }
 0x675   : >> { %2439 = vmax.xlane.f32.xlu1 %v2438_v42 }
 0x677   : >> { %v2407_v19 = vpop.f32.mrb[68].mxu1 }
 0x678   : >> { %2430 = vmax.xlane.f32.xlu0 %v2429_v43  ;;  %v3522_v31 = vpop.f32.mrb[69].mxu1  ;;  %v5257_v22 = vadd.f32 %v2407_v19, %v5902_v62 }
 0x679   : >> { %v2410_v18 = vpop.f32.mrb[70].mxu1 }
 0x67a   : >> { %v5262_v40 = vadd.f32 %v2410_v18, %v5902_v62  ;;  %v3523_v47 = vpop.f32.mrb[71].mxu1  ;;  %v2441_v53 = vsel %vm1257_vm5, %v5257_v22, -inf }
 0x67c   : >> { %2436 = vmax.xlane.f32.xlu0 %v2435_v45  ;;  %v2444_v28 = vsel %vm1257_vm5, %v5262_v40, -inf }
 0x67d   : >> { %2445 = vmax.xlane.f32.xlu1 %v2444_v28 }
 0x67f   : >> { %v2415_v54 = vpop.f32.mrb[72].mxu1 }
 0x680   : >> { %v5269_v30 = vadd.f32 %v2415_v54, %v5902_v62  ;;  %2442 = vmax.xlane.f32.xlu0 %v2441_v53  ;;  %v3526_v60 = vpop.f32.mrb[73].mxu1  ;;  %v5283_v53 = vpop.permute.xlu0 %2130 }
 0x681   : >> { %v2418_v37 = vpop.f32.mrb[74].mxu1  ;;  %v5285_v54 = vpop.permute.xlu1 %2132 }
 0x682   : >> { %v5272_v26 = vadd.f32 %v2418_v37, %v5902_v62  ;;  %v2447_v36 = vsel %vm1257_vm5, %v5269_v30, -inf  ;;  %v3527_v42 = vpop.f32.mrb[75].mxu1 }
 0x684   : >> { %2448 = vmax.xlane.f32.xlu0 %v2447_v36  ;;  %v2450_v43 = vsel %vm1257_vm5, %v5272_v26, -inf  ;;  %v5287_v60 = vpop.permute.xlu0 %2134 }
 0x685   : >> { %2451 = vmax.xlane.f32.xlu1 %v2450_v43  ;;  %v5289_v37 = vpop.permute.xlu1 %2136 }
 0x687   : >> { %v2423_v19 = vpop.f32.mrb[76].mxu1 }
 0x688   : >> { %v5279_v31 = vadd.f32 %v2423_v19, %v5902_v62  ;;  %v3530_v18 = vpop.f32.mrb[77].mxu1 }
 0x689   : >> { %v2426_v45 = vpop.f32.mrb[78].mxu1 }
 0x68a   : >> { %v2453_v47 = vsel %vm1257_vm5, %v5279_v31, -inf  ;;  %v3531_v28 = vpop.f32.mrb[79].mxu1 }
 0x68b   : >> { %2454 = vmax.xlane.f32.xlu1 %v2453_v47 }
 0x6a8   : >> { %v1611_v36 = vpop.xlane.xlu0 %1610 }
 0x6a9   : >> { %v1636_v42 = vsub.f32 %v5145_v46, %v1611_v36 }
 0x6aa   : >> { %v1614_v43 = vpop.xlane.xlu1 %1613 }
 0x6ab   : >> { %v1645_v19 = vmul.f32 1.442695, %v1636_v42  ;;  %v1637_v18 = vsub.f32 %v5148_v39, %v1614_v43 }
 0x6ad   : >> { %3838 = vpow2.f32 %v1645_v19  ;;  %v1647_v45 = vmul.f32 1.442695, %v1637_v18 }
 0x6ae   : >> { %v5293_v25 = vpop.permute.xlu1 %2533 }
 0x6af   : >> { %3840 = vpow2.f32 %v1647_v45  ;;  %3619 = vmatpush3.bf16.msra.mxu1 %v5293_v25 }
 0x6b0   : >> { %v1617_v47 = vpop.xlane.xlu0 %1616  ;;  %3615 = vmatprep.subr.bf16.mxu1 %v5903_v27 }
 0x6b1   : >> { %v1638_v28 = vsub.f32 %v5155_v38, %v1617_v47 }
 0x6b3   : >> { %v1649_v62 = vmul.f32 1.442695, %v1638_v28 }
 0x6b4   : >> { %v1620_v8 = vpop.xlane.xlu0 %1619 }
 0x6b5   : >> { %3842 = vpow2.f32 %v1649_v62  ;;  %v1639_v46 = vsub.f32 %v5158_v32, %v1620_v8 }
 0x6b7   : >> { %v5299_v36 = vpop.eup %3838  ;;  %v1651_v39 = vmul.f32 1.442695, %v1639_v46 }
 0x6b8   : >> { %v1663_v42 = vsel %vm1257_vm5, %v5299_v36, 0.0 }
 0x6b9   : >> { %v5303_v43 = vpop.eup %3840  ;;  %3844 = vpow2.f32 %v1651_v39  ;;  %1664 = vadd.xlane.f32.xlu0 %v1663_v42  ;;  %v5317_v39 = vpop.permute.xlu0 %2138 }
 0x6ba   : >> { %v1666_v19 = vsel %vm1257_vm5, %v5303_v43, 0.0 }
 0x6bb   : >> { %1667 = vadd.xlane.f32.xlu1 %v1666_v19 }
 0x6bf   : >> { %v5307_v38 = vpop.eup %3842 }
 0x6c0   : >> { %v1669_v62 = vsel %vm1257_vm5, %v5307_v38, 0.0 }
 0x6c1   : >> { %1670 = vadd.xlane.f32.xlu0 %v1669_v62 }
 0x6c3   : >> { %v5311_v8 = vpop.eup %3844 }
 0x6c4   : >> { %v1672_v32 = vsel %vm1257_vm5, %v5311_v8, 0.0 }
 0x6c5   : >> { %1673 = vadd.xlane.f32.xlu1 %v1672_v32 }
 0x6df   : >> { %v1626_v18 = vpop.xlane.xlu1 %1625 }
 0x6e0   : >> { %v1641_v45 = vsub.f32 %v5169_v56, %v1626_v18 }
 0x6e2   : >> { %v1655_v47 = vmul.f32 1.442695, %v1641_v45 }
 0x6e3   : >> { %v1632_v28 = vpop.xlane.xlu1 %1631 }
 0x6e4   : >> { %3846 = vpow2.f32 %v1655_v47  ;;  %v1643_v46 = vsub.f32 %v5172_v51, %v1632_v28 }
 0x6e6   : >> { %v1659_v42 = vmul.f32 1.442695, %v1643_v46 }
 0x6e8   : >> { %3848 = vpow2.f32 %v1659_v42 }
 0x6e9   : >> { %v1623_v19 = vpop.xlane.xlu0 %1622 }
 0x6ea   : >> { %v1640_v62 = vsub.f32 %v5182_v29, %v1623_v19  ;;  %v2028_v29 = vpop.xlane.xlu1 %2027 }
 0x6ec   : >> { %v1653_v17 = vmul.f32 1.442695, %v1640_v62 }
 0x6ed   : >> { %v1629_v7 = vpop.xlane.xlu0 %1628 }
 0x6ee   : >> { %v5320_v16 = vpop.eup %3846  ;;  %3850 = vpow2.f32 %v1653_v17  ;;  %v1642_v32 = vsub.f32 %v5190_v41, %v1629_v7  ;;  %v2034_v41 = vpop.xlane.xlu1 %2033 }
 0x6ef   : >> { %v1678_v56 = vsel %vm1257_vm5, %v5320_v16, 0.0 }
 0x6f0   : >> { %v1657_v18 = vmul.f32 1.442695, %v1642_v32  ;;  %1679 = vadd.xlane.f32.xlu0 %v1678_v56 }
 0x6f1   : >> { %v1635_v28 = vpop.xlane.xlu0 %1634 }
 0x6f2   : >> { %v5325_v51 = vpop.eup %3848  ;;  %3852 = vpow2.f32 %v1657_v18  ;;  %v2040_v19 = vpop.xlane.xlu1 %2039  ;;  %v1644_v3 = vsub.f32 %v5200_v58, %v1635_v28 }
 0x6f3   : >> { %v1684_v45 = vsel %vm1257_vm5, %v5325_v51, 0.0 }
 0x6f4   : >> { %1685 = vadd.xlane.f32.xlu0 %v1684_v45 }
 0x6f5   : >> { %v2031_v42 = vpop.xlane.xlu0 %2030 }
 0x6f6   : >> { %v2046_v32 = vpop.xlane.xlu1 %2045 }
 0x6f8   : >> { %v5329_v47 = vpop.eup %3850 }
 0x6f9   : >> { %v1675_v17 = vsel %vm1257_vm5, %v5329_v47, 0.0  ;;  %v2037_v62 = vpop.xlane.xlu0 %2036 }
 0x6fa   : >> { %1676 = vadd.xlane.f32.xlu1 %v1675_v17  ;;  %v5339_v18 = vpop.xlane.xlu1 %2051  ;;  %v2057_v17 = vsub.f32 %v5195_v44, %v2040_v19  ;;  %v2053_v44 = vsub.f32 %v5177_v61, %v2028_v29  ;;  %v1661_v19 = vmul.f32 1.442695, %v1644_v3 }
 0x6fc   : >> { %v5333_v7 = vpop.eup %3852  ;;  %v2070_v15 = vmul.f32 1.442695, %v2057_v17 }
 0x6fd   : >> { %v1681_v46 = vsel %vm1257_vm5, %v5333_v7, 0.0  ;;  %v2043_v56 = vpop.xlane.xlu0 %2042 }
 0x6fe   : >> { %1682 = vadd.xlane.f32.xlu1 %v1681_v46  ;;  %v5344_v6 = vpop.xlane.xlu1 %2433  ;;  %v2059_v46 = vsub.f32 %v5205_v49, %v2046_v32  ;;  %3854 = vpow2.f32 %v2070_v15  ;;  %v2062_v32 = vmul.f32 1.442695, %v2053_v44  ;;  %v2054_v15 = vsub.f32 %v5210_v48, %v2031_v42 }
 0x6ff   : >> { %v2056_v48 = vsub.f32 %v5220_v9, %v2037_v62  ;;  %v2058_v28 = vsub.f32 %v5227_v59, %v2043_v56  ;;  %v2061_v56 = vsub.f32 %v5215_v50, %v5339_v18 }
 0x700   : >> { %v2074_v4 = vmul.f32 1.442695, %v2059_v46 }
 0x701   : >> { %v2049_v45 = vpop.xlane.xlu0 %2048  ;;  %v2072_v62 = vmul.f32 1.442695, %v2058_v28 }
 0x702   : >> { %v5347_v5 = vpop.xlane.xlu1 %2439  ;;  %3856 = vpow2.f32 %v2074_v4  ;;  %v2055_v4 = vsub.f32 %v5185_v24, %v2034_v41  ;;  %v2068_v24 = vmul.f32 1.442695, %v2056_v48  ;;  %v2060_v46 = vsub.f32 %v5237_v35, %v2049_v45 }
 0x703   : >> { %v2078_v45 = vmul.f32 1.442695, %v2061_v56  ;;  %v2459_v48 = vsub.f32 %v5247_v34, %v5347_v5 }
 0x704   : >> { %v2066_v61 = vmul.f32 1.442695, %v2055_v4  ;;  %v2076_v44 = vmul.f32 1.442695, %v2060_v46 }
 0x705   : >> { %v2431_v14 = vpop.xlane.xlu0 %2430 }
 0x708   : >> { %v5353_v49 = vpop.eup %3854 }
 0x70a   : >> { %2535 = vrot.lane.b32.xlu0 %v4866_v23, %s4145_s30  ;;  %v2456_v23 = vsub.f32 %v5242_v55, %v2431_v14  ;;  %v2446_v13 = vpop.xlane.xlu1 %2445  ;;  %v2092_v14 = vsel %vm1257_vm5, %v5353_v49, 0.0 }
 0x70b   : >> { %v2461_v12 = vsub.f32 %v5262_v40, %v2446_v13  ;;  %v2064_v13 = vmul.f32 1.442695, %v2054_v15 }
 0x70c   : >> { %v5358_v58 = vpop.eup %3856 }
 0x70d   : >> { %v2475_v17 = vmul.f32 1.442695, %v2461_v12  ;;  %v2098_v3 = vsel %vm1257_vm5, %v5358_v58, 0.0 }
 0x70f   : >> { %2537 = vrot.lane.b32.xlu1 %v4893_v57, %s4145_s30  ;;  %v2465_v57 = vmul.f32 1.442695, %v2456_v23  ;;  %v2437_v23 = vpop.xlane.xlu0 %2436 }
 0x710   : >> { %v2458_v50 = vsub.f32 %v5252_v63, %v2437_v23 }
 0x711   : >> { %3858 = vpow2.f32 %v2465_v57 }
 0x712   : >> { %3860 = vpow2.f32 %v1661_v19  ;;  %v2452_v18 = vpop.xlane.xlu1 %2451 }
 0x713   : >> { %3862 = vpow2.f32 %v2475_v17  ;;  %v2443_v35 = vpop.xlane.xlu0 %2442 }
 0x714   : >> { %3864 = vpow2.f32 %v2062_v32  ;;  %v2457_v32 = vsub.f32 %v5232_v33, %v5344_v6  ;;  %v2469_v6 = vmul.f32 1.442695, %v2458_v50  ;;  %v2460_v28 = vsub.f32 %v5257_v22, %v2443_v35 }
 0x715   : >> { %3866 = vpow2.f32 %v2064_v13 }
 0x716   : >> { %3868 = vpow2.f32 %v2066_v61  ;;  %v2467_v4 = vmul.f32 1.442695, %v2457_v32  ;;  %v2473_v5 = vmul.f32 1.442695, %v2460_v28 }
 0x717   : >> { %3870 = vpow2.f32 %v2068_v24  ;;  %v2449_v13 = vpop.xlane.xlu0 %2448 }
 0x718   : >> { %3872 = vpow2.f32 %v2072_v62  ;;  %v2455_v33 = vpop.xlane.xlu1 %2454  ;;  %v2462_v34 = vsub.f32 %v5269_v30, %v2449_v13  ;;  %v2463_v30 = vsub.f32 %v5272_v26, %v2452_v18 }
 0x719   : >> { %3874 = vpow2.f32 %v2076_v44 }
 0x71a   : >> { %3876 = vpow2.f32 %v2078_v45  ;;  %v2477_v44 = vmul.f32 1.442695, %v2462_v34  ;;  %v3949_v34 = vld [vmem:[%s4727_s21 + $0x60] sm:$0xff] }
 0x71b   : >> { %v5363_v12 = vpop.eup %3858  ;;  %3878 = vpow2.f32 %v2467_v4 }
 0x71c   : >> { %v5366_v55 = vpop.eup %3860  ;;  %v2483_v40 = vsel %vm1257_vm5, %v5363_v12, 0.0 }
 0x71d   : >> { %v5370_v29 = vpop.eup %3862  ;;  %v1687_v41 = vsel %vm1257_vm5, %v5366_v55, 0.0 }
 0x71e   : >> { %v5375_v42 = vpop.eup %3864  ;;  %v2498_v9 = vsel %vm1257_vm5, %v5370_v29, 0.0 }
 0x71f   : >> { %v2080_v57 = vsel %vm1257_vm5, %v5375_v42, 0.0  ;;  %v5382_v59 = vpop.eup %3866 }
 0x720   : >> { %v2083_v19 = vsel %vm1257_vm5, %v5382_v59, 0.0  ;;  %v5388_v17 = vpop.eup %3868 }
 0x721   : >> { %v2086_v15 = vsel %vm1257_vm5, %v5388_v17, 0.0 }
 0x729   : >> { %2093 = vadd.xlane.f32.xlu0 %v2092_v14  ;;  %v5394_v14 = vpop.eup %3870 }
 0x72a   : >> { %v5399_v61 = vpop.eup %3872 }
 0x72b   : >> { %v2095_v63 = vsel %vm1257_vm5, %v5399_v61, 0.0  ;;  %v5405_v24 = vpop.eup %3874 }
 0x72c   : >> { %v2101_v62 = vsel %vm1257_vm5, %v5405_v24, 0.0  ;;  %v5410_v46 = vpop.eup %3876 }
 0x72d   : >> { %2099 = vadd.xlane.f32.xlu0 %v2098_v3  ;;  %v2089_v3 = vsel %vm1257_vm5, %v5394_v14, 0.0  ;;  %v2104_v22 = vsel %vm1257_vm5, %v5410_v46, 0.0 }
 0x731   : >> { %2484 = vadd.xlane.f32.xlu0 %v2483_v40 }
 0x733   : >> { %1688 = vadd.xlane.f32.xlu1 %v1687_v41 }
 0x735   : >> { %2499 = vadd.xlane.f32.xlu0 %v2498_v9  ;;  %v2471_v9 = vmul.f32 1.442695, %v2459_v48 }
 0x737   : >> { %2081 = vadd.xlane.f32.xlu1 %v2080_v57  ;;  %v5417_v57 = vpop.eup %3878 }
 0x73b   : >> { %2084 = vadd.xlane.f32.xlu1 %v2083_v19 }
 0x73f   : >> { %2087 = vadd.xlane.f32.xlu1 %v2086_v15 }
 0x743   : >> { %2090 = vadd.xlane.f32.xlu1 %v2089_v3  ;;  %v2479_v3 = vmul.f32 1.442695, %v2463_v30  ;;  %v3953_v30 = vld [vmem:[%s4727_s21 + $0xa8] sm:$0xff] }
 0x746   : >> { %v1665_v40 = vpop.xlane.xlu0 %1664 }
 0x747   : >> { %3880 = vrcp.f32 %v1665_v40  ;;  %2096 = vadd.xlane.f32.xlu1 %v2095_v63 }
 0x748   : >> { %3882 = vpow2.f32 %v2469_v6  ;;  %v1668_v41 = vpop.xlane.xlu1 %1667  ;;  %v2464_v6 = vsub.f32 %v5279_v31, %v2455_v33 }
 0x749   : >> { %3884 = vrcp.f32 %v1668_v41 }
 0x74a   : >> { %3886 = vpow2.f32 %v2471_v9  ;;  %v2481_v18 = vmul.f32 1.442695, %v2464_v6  ;;  %v3947_v9 = vld [vmem:[%s4727_s21 + $0x48] sm:$0xff] }
 0x74b   : >> { %2102 = vadd.xlane.f32.xlu1 %v2101_v62  ;;  %2539 = vrot.lane.b32.xlu0 %v4906_v21, %s4145_s30  ;;  %3888 = vpow2.f32 %v2473_v5  ;;  %v2486_v21 = vsel %vm1257_vm5, %v5417_v57, 0.0  ;;  %v3948_v5 = vld [vmem:[%s4727_s21 + $0x18] sm:$0xff] }
 0x74e   : >> { %v1671_v23 = vpop.xlane.xlu0 %1670 }
 0x74f   : >> { %2105 = vadd.xlane.f32.xlu1 %v2104_v22  ;;  %3890 = vrcp.f32 %v1671_v23  ;;  %v3950_v22 = vld [vmem:[%s4727_s21 + $0x78] sm:$0xff] }
 0x751   : >> { %v3881_v56 = vpop.eup %3880 }
 0x752   : >> { %v5419_v19 = vpop.eup %3882  ;;  %v1674_v35 = vpop.xlane.xlu1 %1673  ;;  %v1699_v32 = vmul.f32 %v3881_v56, %v5299_v36  ;;  %v3951_v56 = vld [vmem:[%s4727_s21 + $0xc0] sm:$0xff] }
 0x753   : >> { %v3885_v45 = vpop.eup %3884  ;;  %3892 = vrcp.f32 %v1674_v35  ;;  %2487 = vadd.xlane.f32.xlu1 %v2486_v21  ;;  %v2489_v4 = vsel %vm1257_vm5, %v5419_v19, 0.0  ;;  %v3952_v35 = vld [vmem:[%s4727_s21 + $0x90] sm:$0xff] }
 0x754   : >> { %v1700_v15 = vmul.f32 %v3885_v45, %v5303_v43  ;;  %3894 = vpow2.f32 %v2477_v44  ;;  %v5428_v13 = vpop.eup %3886 }
 0x755   : >> { %v5435_v26 = vpop.eup %3888  ;;  %v2492_v36 = vsel %vm1257_vm5, %v5428_v13, 0.0  ;;  %3896 = vpow2.f32 %v2479_v3 }
 0x756   : >> { %v1708_v50 = vpack.c.bf16 %v1700_v15, %v1699_v32  ;;  %v2495_v31 = vsel %vm1257_vm5, %v5435_v26, 0.0  ;;  %3898 = vpow2.f32 %v2481_v18 }
 0x757   : >> { %2490 = vadd.xlane.f32.xlu1 %v2489_v4 }
 0x758   : >> { %3423 = vmatmul.mubr.msk.bf16.vlgmr.msra.gmra.mrb[20].mxu0 %vm1257_vm5, %v1708_v50 }
 0x759   : >> { %3473 = vmatpush3.bf16.msra.mxu0 %v5283_v53  ;;  %3426 = vmatprep.mubr.msk.bf16.mxu0 %vm4142_vm3, %v5903_v27  ;;  %v3891_v43 = vpop.eup %3890 }
 0x75a   : >> { %3474 = vmatprep.subr.bf16.mxu0 %v5903_v27  ;;  %v1701_v53 = vmul.f32 %v3891_v43, %v5307_v38 }
 0x75b   : >> { %2493 = vadd.xlane.f32.xlu1 %v2492_v36 }
 0x75d   : >> { %v3893_v48 = vpop.eup %3892  ;;  %3475 = vmatpush3.bf16.msra.mxu0 %v5285_v54 }
 0x75e   : >> { %3476 = vmatprep.subr.bf16.mxu0 %v5903_v27  ;;  %v1702_v33 = vmul.f32 %v3893_v48, %v5311_v8  ;;  %v5446_v40 = vpop.eup %3894 }
 0x75f   : >> { %2496 = vadd.xlane.f32.xlu1 %v2495_v31  ;;  %v2501_v54 = vsel %vm1257_vm5, %v5446_v40, 0.0  ;;  %v5456_v38 = vpop.eup %3896 }
 0x760   : >> { %v1709_v63 = vpack.c.bf16 %v1702_v33, %v1701_v53  ;;  %v2504_v8 = vsel %vm1257_vm5, %v5456_v38, 0.0  ;;  %v5463_v28 = vpop.eup %3898 }
 0x761   : >> { %3477 = vmatpush3.bf16.msra.mxu0 %v5287_v60  ;;  %v2187_v60 = vsel %vm1391_vm6, %v5317_v39, 0  ;;  %v3946_v39 = vld [vmem:[%s4727_s21 + $0x30] sm:$0xff]  ;;  %s4146_s21 = smov (%p1107_p1), [#allocation10]  }
 0x762   : >> { %3427 = vmatmul.mubr.msk.bf16.gmra.mrb[24].mxu0 %vm1257_vm5, %v1709_v63  ;;  %3478 = vmatprep.subr.bf16.mxu0 %v5903_v27 }
 0x763   : >> { %2502 = vadd.xlane.f32.xlu1 %v2501_v54  ;;  %3430 = vmatprep.mubr.msk.bf16.mxu0 %vm4142_vm3, %v5903_v27 }
 0x765   : >> { %3479 = vmatpush3.bf16.msra.mxu0 %v5289_v37  ;;  %v2507_v37 = vsel %vm1257_vm5, %v5463_v28, 0.0 }
 0x766   : >> { %3480 = vmatprep.subr.bf16.mxu0 %v5903_v27 }
 0x769   : >> { %3481 = vmatpush3.bf16.msra.mxu0 %v2187_v60 }
 0x76a   : >> { %2505 = vadd.xlane.f32.xlu0 %v2504_v8  ;;  %3532 = vmatprep.subr.bf16.mxu0 %v5903_v27 }
 0x76e   : >> { %2508 = vadd.xlane.f32.xlu0 %v2507_v37 }
 0x774   : >> { %2541 = vrot.lane.b32.xlu1 %v4911_v20, %s4145_s30 }
 0x778   : >> { %1741 = vrot.lane.b32.xlu1 %v5107_v52, %s4143_s11 }
 0x77c   : >> { %1745 = vrot.lane.b32.xlu1 %v3946_v39, %s4143_s11 }
 0x77d   : >> { %v1680_v41 = vpop.xlane.xlu0 %1679 }
 0x77e   : >> { %3900 = vrcp.f32 %v1680_v41 }
 0x780   : >> { %1747 = vrot.lane.b32.xlu1 %v3947_v9, %s4143_s11 }
 0x781   : >> { %v1686_v62 = vpop.xlane.xlu0 %1685 }
 0x784   : >> { %1743 = vrot.lane.b32.xlu0 %v3948_v5, %s4143_s11  ;;  %1749 = vrot.lane.b32.xlu1 %v3949_v34, %s4143_s11 }
 0x785   : >> { %v5480_v20 = vpop.permute.xlu0 %2535 }
 0x786   : >> { %3620 = vmatpush3.bf16.msra.mxu1 %v5480_v20 }
 0x787   : >> { %v1677_v23 = vpop.xlane.xlu1 %1676  ;;  %3616 = vmatprep.subr.bf16.mxu1 %v5903_v27 }
 0x788   : >> { %3902 = vrcp.f32 %v1677_v23  ;;  %1751 = vrot.lane.b32.xlu1 %v3950_v22, %s4143_s11  ;;  %1757 = vrot.lane.b32.xlu0 %v3951_v56, %s4143_s11  ;;  %v3901_v45 = vpop.eup %3900 }
 0x789   : >> { %v1704_v50 = vmul.f32 %v3901_v45, %v5320_v16 }
 0x78b   : >> { %v1683_v44 = vpop.xlane.xlu1 %1682 }
 0x78c   : >> { %3904 = vrcp.f32 %v1683_v44  ;;  %1753 = vrot.lane.b32.xlu1 %v3952_v35, %s4143_s11  ;;  %2146 = vrot.lane.b32.xlu0 %v3948_v5, %s4144_s12 }
 0x78d   : >> { %3906 = vrcp.f32 %v1686_v62 }
 0x78f   : >> { %v5491_v21 = vpop.permute.xlu1 %2537 }
 0x790   : >> { %3621 = vmatpush3.bf16.msra.mxu1 %v5491_v21  ;;  %1755 = vrot.lane.b32.xlu1 %v3953_v30, %s4143_s11 }
 0x791   : >> { %3617 = vmatprep.subr.bf16.mxu1 %v5903_v27  ;;  %2150 = vrot.lane.b32.xlu0 %v3947_v9, %s4144_s12 }
 0x792   : >> { %v3903_v32 = vpop.eup %3902 }
 0x793   : >> { %v1703_v15 = vmul.f32 %v3903_v32, %v5329_v47 }
 0x794   : >> { %2144 = vrot.lane.b32.xlu1 %v5107_v52, %s4144_s12 }
 0x795   : >> { %v1710_v4 = vpack.c.bf16 %v1704_v50, %v1703_v15  ;;  %2154 = vrot.lane.b32.xlu0 %v3950_v22, %s4144_s12 }
 0x796   : >> { %v3905_v3 = vpop.eup %3904 }
 0x797   : >> { %3431 = vmatmul.mubr.msk.bf16.gmra.mrb[28].mxu0 %vm1257_vm5, %v1710_v4  ;;  %v3907_v6 = vpop.eup %3906  ;;  %v1705_v36 = vmul.f32 %v3905_v3, %v5333_v7 }
 0x798   : >> { %3434 = vmatprep.mubr.msk.bf16.mxu0 %vm4142_vm3, %v5903_v27  ;;  %2148 = vrot.lane.b32.xlu1 %v3946_v39, %s4144_s12  ;;  %v1706_v16 = vmul.f32 %v3907_v6, %v5325_v51 }
 0x799   : >> { %2158 = vrot.lane.b32.xlu0 %v3953_v30, %s4144_s12 }
 0x79a   : >> { %v1711_v47 = vpack.c.bf16 %v1706_v16, %v1705_v36 }
 0x79c   : >> { %2152 = vrot.lane.b32.xlu1 %v3949_v34, %s4144_s12 }
 0x79d   : >> { %2547 = vrot.lane.b32.xlu0 %v5107_v52, %s4145_s30 }
 0x79f   : >> { %3435 = vmatmul.mubr.msk.bf16.gmra.mrb[32].mxu0 %vm1257_vm5, %v1711_v47 }
 0x7a0   : >> { %3438 = vmatprep.mubr.msk.bf16.mxu0 %vm4142_vm3, %v5903_v27  ;;  %2156 = vrot.lane.b32.xlu1 %v3952_v35, %s4144_s12 }
 0x7a1   : >> { %2551 = vrot.lane.b32.xlu0 %v3946_v39, %s4145_s30 }
 0x7a4   : >> { %2160 = vrot.lane.b32.xlu1 %v3951_v56, %s4144_s12 }
 0x7a5   : >> { %2555 = vrot.lane.b32.xlu0 %v3949_v34, %s4145_s30 }
 0x7a8   : >> { %2549 = vrot.lane.b32.xlu1 %v3948_v5, %s4145_s30 }
 0x7a9   : >> { %2559 = vrot.lane.b32.xlu0 %v3952_v35, %s4145_s30 }
 0x7ac   : >> { %2553 = vrot.lane.b32.xlu1 %v3947_v9, %s4145_s30 }
 0x7ad   : >> { %2563 = vrot.lane.b32.xlu0 %v3951_v56, %s4145_s30 }
 0x7b0   : >> { %2557 = vrot.lane.b32.xlu1 %v3950_v22, %s4145_s30 }
 0x7b4   : >> { %2561 = vrot.lane.b32.xlu1 %v3953_v30, %s4145_s30 }
 0x7b6   : >> { %v2094_v52 = vpop.xlane.xlu0 %2093 }
 0x7ba   : >> { %v2100_v51 = vpop.xlane.xlu0 %2099 }
 0x7be   : >> { %v5526_v7 = vpop.xlane.xlu0 %2484 }
 0x7c0   : >> { %v1689_v43 = vpop.xlane.xlu1 %1688 }
 0x7c1   : >> { %3908 = vrcp.f32 %v1689_v43 }
 0x7c2   : >> { %v5528_v18 = vpop.xlane.xlu0 %2499 }
 0x7c4   : >> { %v2082_v48 = vpop.xlane.xlu1 %2081 }
 0x7c5   : >> { %3910 = vrcp.f32 %v2082_v48 }
 0x7c6   : >> { %v2540_v31 = vpop.permute.xlu0 %2539 }
 0x7c7   : >> { %3622 = vmatpush3.bf16.msra.mxu1 %v2540_v31 }
 0x7c8   : >> { %v2085_v53 = vpop.xlane.xlu1 %2084  ;;  %3618 = vmatprep.subr.bf16.mxu1 %v5903_v27 }
 0x7c9   : >> { %3912 = vrcp.f32 %v2085_v53 }
 0x7cb   : >> { %v3909_v33 = vpop.eup %3908 }
 0x7cc   : >> { %v2088_v63 = vpop.xlane.xlu1 %2087  ;;  %v1707_v54 = vmul.f32 %v3909_v33, %v5366_v55 }
 0x7cd   : >> { %3914 = vrcp.f32 %v2088_v63 }
 0x7ce   : >> { %v1712_v60 = vpack.c.bf16 %v1707_v54, %v1707_v54 }
 0x7cf   : >> { %v3911_v37 = vpop.eup %3910 }
 0x7d0   : >> { %v2091_v8 = vpop.xlane.xlu1 %2090  ;;  %3439 = vmatmul.mubr.msk.bf16.gmra.mrb[36].mxu0 %vm1257_vm5, %v1712_v60  ;;  %v2116_v41 = vmul.f32 %v3911_v37, %v5375_v42 }
 0x7d1   : >> { %3916 = vrcp.f32 %v2091_v8  ;;  %3482 = vmatprep.mubr.msk.bf16.mxu0 %vm4142_vm3, %v5903_v27 }
 0x7d3   : >> { %v3913_v39 = vpop.eup %3912 }
 0x7d4   : >> { %v2117_v9 = vmul.f32 %v3913_v39, %v5382_v59  ;;  %v2097_v62 = vpop.xlane.xlu1 %2096 }
 0x7d5   : >> { %3918 = vrcp.f32 %v2097_v62 }
 0x7d6   : >> { %v2125_v5 = vpack.c.bf16 %v2117_v9, %v2116_v41  ;;  %3920 = vrcp.f32 %v2094_v52 }
 0x7d7   : >> { %v3915_v34 = vpop.eup %3914 }
 0x7d8   : >> { %v2103_v55 = vpop.xlane.xlu1 %2102  ;;  %3483 = vmatmul.mubr.msk.bf16.vlgmr.msra.gmra.mrb[40].mxu0 %vm1257_vm5, %v2125_v5  ;;  %v2118_v42 = vmul.f32 %v3915_v34, %v5388_v17 }
 0x7d9   : >> { %3533 = vmatpush3.bf16.msra.mxu0 %v5293_v25  ;;  %3486 = vmatprep.mubr.msk.bf16.mxu0 %vm4142_vm3, %v5903_v27  ;;  %3922 = vrcp.f32 %v2103_v55 }
 0x7da   : >> { %3534 = vmatprep.subr.bf16.mxu0 %v5903_v27  ;;  %3924 = vrcp.f32 %v2100_v51 }
 0x7db   : >> { %v3917_v23 = vpop.eup %3916 }
 0x7dc   : >> { %v2106_v22 = vpop.xlane.xlu1 %2105  ;;  %v2119_v59 = vmul.f32 %v3917_v23, %v5394_v14 }
 0x7dd   : >> { %3535 = vmatpush3.bf16.msra.mxu0 %v5480_v20  ;;  %3926 = vrcp.f32 %v2106_v22 }
 0x7de   : >> { %3536 = vmatprep.subr.bf16.mxu0 %v5903_v27  ;;  %v2126_v56 = vpack.c.bf16 %v2119_v59, %v2118_v42 }
 0x7df   : >> { %v3919_v44 = vpop.eup %3918 }
 0x7e0   : >> { %v2488_v25 = vpop.xlane.xlu1 %2487  ;;  %3487 = vmatmul.mubr.msk.bf16.gmra.mrb[44].mxu0 %vm1257_vm5, %v2126_v56  ;;  %v3921_v35 = vpop.eup %3920  ;;  %v2121_v17 = vmul.f32 %v3919_v44, %v5399_v61 }
 0x7e1   : >> { %3537 = vmatpush3.bf16.msra.mxu0 %v5491_v21  ;;  %3490 = vmatprep.mubr.msk.bf16.mxu0 %vm4142_vm3, %v5903_v27  ;;  %v2120_v20 = vmul.f32 %v3921_v35, %v5353_v49  ;;  %3928 = vrcp.f32 %v2488_v25 }
 0x7e2   : >> { %3538 = vmatprep.subr.bf16.mxu0 %v5903_v27  ;;  %3930 = vrcp.f32 %v5526_v7 }
 0x7e3   : >> { %v2127_v45 = vpack.c.bf16 %v2121_v17, %v2120_v20  ;;  %v3923_v30 = vpop.eup %3922 }
 0x7e4   : >> { %v2491_v14 = vpop.xlane.xlu1 %2490  ;;  %v3925_v21 = vpop.eup %3924  ;;  %v2123_v15 = vmul.f32 %v3923_v30, %v5405_v24 }
 0x7e5   : >> { %3539 = vmatpush3.bf16.msra.mxu0 %v2540_v31  ;;  %v2122_v61 = vmul.f32 %v3925_v21, %v5358_v58 }
 0x7e6   : >> { %3540 = vmatprep.subr.bf16.mxu0 %v5903_v27 }
 0x7e7   : >> { %v2128_v49 = vpack.c.bf16 %v2123_v15, %v2122_v61  ;;  %v3927_v4 = vpop.eup %3926 }
 0x7e8   : >> { %v2494_v32 = vpop.xlane.xlu1 %2493  ;;  %3491 = vmatmul.mubr.msk.bf16.gmra.mrb[48].mxu0 %vm1257_vm5, %v2127_v45  ;;  %v2124_v6 = vmul.f32 %v3927_v4, %v5410_v46 }
 0x7e9   : >> { %3494 = vmatprep.mubr.msk.bf16.mxu0 %vm4142_vm3, %v5903_v27  ;;  %3932 = vrcp.f32 %v2494_v32 }
 0x7ea   : >> { %v2129_v16 = vpack.c.bf16 %v2124_v6, %v2124_v6  ;;  %3934 = vrcp.f32 %v2491_v14 }
 0x7eb   : >> { %v3929_v58 = vpop.eup %3928 }
 0x7ec   : >> { %v2497_v50 = vpop.xlane.xlu1 %2496  ;;  %v3931_v52 = vpop.eup %3930  ;;  %v2520_v51 = vmul.f32 %v3929_v58, %v5417_v57 }
 0x7ed   : >> { %v2519_v46 = vmul.f32 %v3931_v52, %v5363_v12 }
 0x7ef   : >> { %v2528_v43 = vpack.c.bf16 %v2520_v51, %v2519_v46 }
 0x7f0   : >> { %v2503_v3 = vpop.xlane.xlu1 %2502  ;;  %3495 = vmatmul.mubr.msk.bf16.gmra.mrb[52].mxu0 %vm1257_vm5, %v2128_v49 }
 0x7f1   : >> { %3498 = vmatprep.mubr.msk.bf16.mxu0 %vm4142_vm3, %v5903_v27 }
 0x7f3   : >> { %v3933_v48 = vpop.eup %3932 }
 0x7f4   : >> { %v2542_v36 = vpop.permute.xlu1 %2541  ;;  %v3935_v31 = vpop.eup %3934  ;;  %v2522_v53 = vmul.f32 %v3933_v48, %v5428_v13 }
 0x7f5   : >> { %v2590_v24 = vsel %vm1391_vm6, %v2542_v36, 0  ;;  %v2521_v33 = vmul.f32 %v3935_v31, %v5419_v19 }
 0x7f6   : >> { %3541 = vmatpush3.bf16.msra.mxu0 %v2590_v24  ;;  %3623 = vmatpush3.bf16.msra.mxu1 %v2590_v24 }
 0x7f7   : >> { %v2506_v47 = vpop.xlane.xlu0 %2505  ;;  %v2529_v63 = vpack.c.bf16 %v2522_v53, %v2521_v33 }
 0x7f8   : >> { %3499 = vmatmul.mubr.msk.bf16.gmra.mrb[56].mxu0 %vm1257_vm5, %v2129_v16 }
 0x7f9   : >> { %3542 = vmatprep.mubr.msk.bf16.mxu0 %vm4142_vm3, %v5903_v27 }
 0x7fb   : >> { %v2509_v7 = vpop.xlane.xlu0 %2508 }
 0x7fc   : >> { %3936 = vrcp.f32 %v2509_v7 }
 0x7fd   : >> { %3938 = vrcp.f32 %v2497_v50 }
 0x7fe   : >> { %3940 = vrcp.f32 %v5528_v18 }
 0x7ff   : >> { %3942 = vrcp.f32 %v2506_v47  ;;  %v1744_v5 = vpop.permute.xlu0 %1743 }
 0x800   : >> { %3543 = vmatmul.mubr.msk.bf16.vlgmr.msra.gmra.mrb[60].mxu0 %vm1257_vm5, %v2528_v43  ;;  %3944 = vrcp.f32 %v2503_v3 }
 0x801   : >> { %3546 = vmatprep.mubr.msk.bf16.mxu0 %vm4142_vm3, %v5903_v27 }
 0x803   : >> { %v1758_v45 = vpop.permute.xlu0 %1757 }
 0x806   : >> { %v3937_v57 = vpop.eup %3936 }
 0x807   : >> { %v3939_v12 = vpop.eup %3938  ;;  %v2527_v54 = vmul.f32 %v3937_v57, %v5463_v28  ;;  %v2147_v61 = vpop.permute.xlu0 %2146 }
 0x808   : >> { %3547 = vmatmul.mubr.msk.bf16.gmra.mrb[64].mxu0 %vm1257_vm5, %v2529_v63  ;;  %v3941_v18 = vpop.eup %3940  ;;  %v2523_v8 = vmul.f32 %v3939_v12, %v5435_v26  ;;  %v1742_v26 = vpop.permute.xlu1 %1741 }
 0x809   : >> { %v2532_v60 = vpack.c.bf16 %v2527_v54, %v2527_v54  ;;  %3550 = vmatprep.mubr.msk.bf16.mxu0 %vm4142_vm3, %v5903_v27  ;;  %v2524_v19 = vmul.f32 %v3941_v18, %v5370_v29  ;;  %v3943_v37 = vpop.eup %3942 }
 0x80a   : >> { %v3945_v39 = vpop.eup %3944  ;;  %v2526_v28 = vmul.f32 %v3943_v37, %v5456_v38 }
 0x80b   : >> { %3559 = vmatmul.mubr.msk.bf16.vlgmr.msra.gmra.mrb[80].mxu1 %vm1257_vm5, %v2532_v60  ;;  %v2530_v13 = vpack.c.bf16 %v2524_v19, %v2523_v8  ;;  %v2525_v41 = vmul.f32 %v3945_v39, %v5446_v40  ;;  %v2151_v36 = vpop.permute.xlu0 %2150 }
 0x80c   : >> { %v1746_v42 = vpop.permute.xlu1 %1745 }
 0x80d   : >> { %v2531_v9 = vpack.c.bf16 %v2526_v28, %v2525_v41 }
 0x80f   : >> { %v2155_v7 = vpop.permute.xlu0 %2154 }
 0x810   : >> { %3551 = vmatmul.mubr.msk.bf16.gmra.mrb[68].mxu0 %vm1257_vm5, %v2530_v13  ;;  %v1748_v38 = vpop.permute.xlu1 %1747 }
 0x811   : >> { %3554 = vmatprep.mubr.msk.bf16.mxu0 %vm4142_vm3, %v5903_v27 }
 0x813   : >> { %v2159_v43 = vpop.permute.xlu0 %2158 }
 0x814   : >> { %v1750_v35 = vpop.permute.xlu1 %1749 }
 0x817   : >> { %v5597_v31 = vpop.permute.xlu0 %2547 }
 0x818   : >> { %3555 = vmatmul.mubr.msk.bf16.gmra.mrb[72].mxu0 %vm1257_vm5, %v2531_v9  ;;  %v1752_v17 = vpop.permute.xlu1 %1751 }
 0x81b   : >> { %v5601_v33 = vpop.permute.xlu0 %2551 }
 0x81c   : >> { %v1754_v14 = vpop.permute.xlu1 %1753 }
 0x81f   : >> { %v5605_v63 = vpop.permute.xlu0 %2555 }
 0x820   : >> { %v1756_v20 = vpop.permute.xlu1 %1755 }
 0x823   : >> { %v5609_v54 = vpop.permute.xlu0 %2559 }
 0x824   : >> { %v2145_v32 = vpop.permute.xlu1 %2144 }
 0x827   : >> { %v5613_v60 = vpop.permute.xlu0 %2563 }
 0x828   : >> { %v2149_v3 = vpop.permute.xlu1 %2148 }
 0x82b   : >> { %v1820_v62 = vpop.f32.mrb[20].mxu0 }
 0x82c   : >> { %v1821_v55 = vadd.f32 %v1820_v62, %v1742_v26  ;;  %v3424_v29 = vpop.f32.mrb[21].mxu0  ;;  %v2153_v51 = vpop.permute.xlu1 %2152 }
 0x82d   : >> { %v1823_v34 = vpop.f32.mrb[22].mxu0 }
 0x82e   : >> { %v1824_v23 = vadd.f32 %v1823_v34, %v1744_v5  ;;  %1867 = vrot.lane.b32.xlu1 %v1821_v55, %s4145_s30  ;;  %v3425_v22 = vpop.f32.mrb[23].mxu0 }
 0x830   : >> { %1869 = vrot.lane.b32.xlu0 %v1824_v23, %s4145_s30  ;;  %v2157_v46 = vpop.permute.xlu1 %2156 }
 0x834   : >> { %v2161_v48 = vpop.permute.xlu1 %2160 }
 0x835   : >> { %v1828_v27 = vpop.f32.mrb[24].mxu0 }
 0x836   : >> { %v1829_v59 = vadd.f32 %v1828_v27, %v1746_v42  ;;  %v3428_v40 = vpop.f32.mrb[25].mxu0 }
 0x837   : >> { %v1831_v56 = vpop.f32.mrb[26].mxu0 }
 0x838   : >> { %v1832_v44 = vadd.f32 %v1831_v56, %v1748_v38  ;;  %1871 = vrot.lane.b32.xlu1 %v1829_v59, %s4145_s30  ;;  %v3429_v25 = vpop.f32.mrb[27].mxu0  ;;  %v5599_v53 = vpop.permute.xlu1 %2549 }
 0x83a   : >> { %1873 = vrot.lane.b32.xlu0 %v1832_v44, %s4145_s30 }
 0x83c   : >> { %v5603_v57 = vpop.permute.xlu1 %2553 }
 0x840   : >> { %v5607_v12 = vpop.permute.xlu1 %2557 }
 0x844   : >> { %v5611_v18 = vpop.permute.xlu1 %2561 }
 0x86a   : >> { %v1836_v30 = vpop.f32.mrb[28].mxu0 }
 0x86b   : >> { %v1837_v21 = vadd.f32 %v1836_v30, %v1750_v35  ;;  %v3432_v15 = vpop.f32.mrb[29].mxu0 }
 0x86c   : >> { %v1839_v50 = vpop.f32.mrb[30].mxu0 }
 0x86d   : >> { %v1840_v49 = vadd.f32 %v1839_v50, %v1752_v17  ;;  %1875 = vrot.lane.b32.xlu1 %v1837_v21, %s4145_s30  ;;  %v3433_v4 = vpop.f32.mrb[31].mxu0 }
 0x86f   : >> { %1877 = vrot.lane.b32.xlu0 %v1840_v49, %s4145_s30 }
 0x872   : >> { %v1844_v6 = vpop.f32.mrb[32].mxu0 }
 0x873   : >> { %v1845_v24 = vadd.f32 %v1844_v6, %v1754_v14  ;;  %v3436_v16 = vpop.f32.mrb[33].mxu0 }
 0x874   : >> { %v1847_v58 = vpop.f32.mrb[34].mxu0 }
 0x875   : >> { %v1848_v47 = vadd.f32 %v1847_v58, %v1756_v20  ;;  %1879 = vrot.lane.b32.xlu1 %v1845_v24, %s4145_s30  ;;  %v3437_v52 = vpop.f32.mrb[35].mxu0 }
 0x877   : >> { %1881 = vrot.lane.b32.xlu0 %v1848_v47, %s4145_s30 }
 0x8a0   : >> { %v1868_v8 = vpop.permute.xlu1 %1867 }
 0x8a1   : >> { %1895 = vst.msk [vmem:[%s5113_s9] sm:$0xff] %vm1894_vm7, %v1868_v8 }
 0x8a2   : >> { %v1870_v19 = vpop.permute.xlu0 %1869 }
 0x8a3   : >> { %1896 = vst.msk [vmem:[%s5113_s9 + $0x8] sm:$0xff] %vm1894_vm7, %v1870_v19  ;;  %v1852_v13 = vpop.f32.mrb[36].mxu0 }
 0x8a4   : >> { %v1853_v37 = vadd.f32 %v1852_v13, %v1758_v45  ;;  %v3440_v39 = vpop.f32.mrb[37].mxu0 }
 0x8a5   : >> { %v1855_v28 = vpop.f32.mrb[38].mxu0 }
 0x8a6   : >> { %1883 = vrot.lane.b32.xlu1 %v1853_v37, %s4145_s30  ;;  %v3441_v41 = vpop.f32.mrb[39].mxu0 }
 0x8aa   : >> { %v1872_v9 = vpop.permute.xlu1 %1871 }
 0x8ab   : >> { %1897 = vst.msk [vmem:[%s5113_s9 + $0x10] sm:$0xff] %vm1894_vm7, %v1872_v9  ;;  %v2223_v26 = vpop.f32.mrb[40].mxu0 }
 0x8ac   : >> { %v2224_v62 = vadd.f32 %v2223_v26, %v2145_v32  ;;  %v1874_v5 = vpop.permute.xlu0 %1873  ;;  %v3484_v55 = vpop.f32.mrb[41].mxu0 }
 0x8ad   : >> { %1898 = vst.msk [vmem:[%s5113_s9 + $0x18] sm:$0xff] %vm1894_vm7, %v1874_v5  ;;  %v2226_v29 = vpop.f32.mrb[42].mxu0 }
 0x8ae   : >> { %v2227_v34 = vadd.f32 %v2226_v29, %v2147_v61  ;;  %2270 = vrot.lane.b32.xlu0 %v2224_v62, %s4144_s12  ;;  %v3485_v23 = vpop.f32.mrb[43].mxu0 }
 0x8b0   : >> { %2272 = vrot.lane.b32.xlu1 %v2227_v34, %s4144_s12 }
 0x8b3   : >> { %v2231_v22 = vpop.f32.mrb[44].mxu0 }
 0x8b4   : >> { %v2232_v42 = vadd.f32 %v2231_v22, %v2149_v3  ;;  %v3488_v27 = vpop.f32.mrb[45].mxu0 }
 0x8b5   : >> { %v2234_v38 = vpop.f32.mrb[46].mxu0 }
 0x8b6   : >> { %v2235_v59 = vadd.f32 %v2234_v38, %v2151_v36  ;;  %2274 = vrot.lane.b32.xlu0 %v2232_v42, %s4144_s12  ;;  %v3489_v40 = vpop.f32.mrb[47].mxu0 }
 0x8b8   : >> { %2276 = vrot.lane.b32.xlu1 %v2235_v59, %s4144_s12 }
 0x8bb   : >> { %v2239_v56 = vpop.f32.mrb[48].mxu0 }
 0x8bc   : >> { %v2240_v44 = vadd.f32 %v2239_v56, %v2153_v51  ;;  %v3492_v25 = vpop.f32.mrb[49].mxu0 }
 0x8bd   : >> { %v2242_v35 = vpop.f32.mrb[50].mxu0 }
 0x8be   : >> { %v2243_v17 = vadd.f32 %v2242_v35, %v2155_v7  ;;  %2278 = vrot.lane.b32.xlu0 %v2240_v44, %s4144_s12  ;;  %v3493_v14 = vpop.f32.mrb[51].mxu0 }
 0x8c0   : >> { %2280 = vrot.lane.b32.xlu1 %v2243_v17, %s4144_s12 }
 0x8c3   : >> { %v2247_v20 = vpop.f32.mrb[52].mxu0 }
 0x8c4   : >> { %v2248_v45 = vadd.f32 %v2247_v20, %v2157_v46  ;;  %v3496_v30 = vpop.f32.mrb[53].mxu0 }
 0x8c5   : >> { %v2250_v32 = vpop.f32.mrb[54].mxu0 }
 0x8c6   : >> { %v2251_v21 = vadd.f32 %v2250_v32, %v2159_v43  ;;  %2282 = vrot.lane.b32.xlu0 %v2248_v45, %s4144_s12  ;;  %v3497_v15 = vpop.f32.mrb[55].mxu0 }
 0x8c7   : > { %v3954_v15 = vld [vmem:[#allocation9] sm:$0xff] (%p1107_p1)  }
 0x8c8   : >> { %2284 = vrot.lane.b32.xlu1 %v2251_v21, %s4144_s12  ;;  %v5905_v21 = vmov (%p1107_p1), 0.0  }
 0x8c9   : > { %3562 = vmatprep.subr.bf16.mxu0 (%p1107_p1), %v5905_v21  ;;  %3624 = vmatprep.subr.bf16.mxu1 (%p1107_p1), %v5905_v21 }
 0x8ca   : > { %3578 = vmatprep.mubr.msk.bf16.mxu0 (%p1107_p1), %vm4139_vm1, %v5905_v21  ;;  %3598 = vmatprep.mubr.msk.bf16.mxu1 (%p1107_p1), %vm4139_vm1, %v5905_v21 }
 0x8cb   : >> { %v2255_v50 = vpop.f32.mrb[56].mxu0  ;;  %3563 = vmatpush3.bf16.msra.mxu0 (%p1107_p1), %v3954_v15  ;;  %3632 = vmatpush3.bf16.msra.mxu1 (%p1107_p1), %v3954_v15  ;;  %v5906_v15 = vld [vmem:[#allocation21_spill] sm:$0xff] (%p1107_p1) }
 0x8cc   : >> { %v2256_v61 = vadd.f32 %v2255_v50, %v2161_v48  ;;  %v3500_v49 = vpop.f32.mrb[57].mxu0  ;;  %v3955_v50 = vld [vmem:[#allocation9 + $0x8] sm:$0xff] (%p1107_p1)   ;;  %3564 = vmatprep.subr.bf16.mxu0 (%p1107_p1), %v5905_v21  ;;  %3625 = vmatprep.subr.bf16.mxu1 (%p1107_p1), %v5905_v21 }
 0x8cd   : >> { %v2258_v4 = vpop.f32.mrb[58].mxu0  ;;  %v3957_v49 = vld [vmem:[#allocation9 + $0x18] sm:$0xff] (%p1107_p1)  }
 0x8ce   : >> { %2286 = vrot.lane.b32.xlu0 %v2256_v61, %s4144_s12  ;;  %v3501_v3 = vpop.f32.mrb[59].mxu0  ;;  %v3956_v61 = vld [vmem:[#allocation9 + $0x10] sm:$0xff] (%p1107_p1)   ;;  %v3958_v4 = vld [vmem:[#allocation9 + $0x20] sm:$0xff] (%p1107_p1)  }
 0x8cf   : > { %3565 = vmatpush3.bf16.msra.mxu0 (%p1107_p1), %v3955_v50  ;;  %3633 = vmatpush3.bf16.msra.mxu1 (%p1107_p1), %v3955_v50  ;;  %v3959_v3 = vld [vmem:[#allocation9 + $0x28] sm:$0xff] (%p1107_p1)  }
 0x8d0   : > { %3566 = vmatprep.subr.bf16.mxu0 (%p1107_p1), %v5905_v21  ;;  %3626 = vmatprep.subr.bf16.mxu1 (%p1107_p1), %v5905_v21 }
 0x8d3   : >> { %v2626_v6 = vpop.f32.mrb[60].mxu0  ;;  %3567 = vmatpush3.bf16.msra.mxu0 (%p1107_p1), %v3956_v61  ;;  %3634 = vmatpush3.bf16.msra.mxu1 (%p1107_p1), %v3956_v61 }
 0x8d4   : >> { %v2627_v36 = vadd.f32 %v2626_v6, %v5597_v31  ;;  %v3544_v24 = vpop.f32.mrb[61].mxu0  ;;  %3568 = vmatprep.subr.bf16.mxu0 (%p1107_p1), %v5905_v21  ;;  %3627 = vmatprep.subr.bf16.mxu1 (%p1107_p1), %v5905_v21  ;;  %v3960_v6 = vld [vmem:[#allocation9 + $0x30] sm:$0xff] (%p1107_p1)  }
 0x8d5   : >> { %v2629_v16 = vpop.f32.mrb[62].mxu0 }
 0x8d6   : >> { %v2630_v58 = vadd.f32 %v2629_v16, %v5599_v53  ;;  %2673 = vrot.lane.b32.xlu1 %v2627_v36, %s4143_s11  ;;  %v3545_v47 = vpop.f32.mrb[63].mxu0  ;;  %v3961_v36 = vld [vmem:[#allocation9 + $0x38] sm:$0xff] (%p1107_p1)  }
 0x8d7   : > { %3569 = vmatpush3.bf16.msra.mxu0 (%p1107_p1), %v3957_v49  ;;  %3635 = vmatpush3.bf16.msra.mxu1 (%p1107_p1), %v3957_v49 }
 0x8d8   : >> { %2675 = vrot.lane.b32.xlu0 %v2630_v58, %s4143_s11  ;;  %3570 = vmatprep.subr.bf16.mxu0 (%p1107_p1), %v5905_v21 }
 0x8d9   : > { %3628 = vmatprep.subr.bf16.mxu1 (%p1107_p1), %v5905_v21 }
 0x8db   : >> { %v2634_v52 = vpop.f32.mrb[64].mxu0  ;;  %3571 = vmatpush3.bf16.msra.mxu0 (%p1107_p1), %v3958_v4  ;;  %3636 = vmatpush3.bf16.msra.mxu1 (%p1107_p1), %v3958_v4  ;;  %v5907_v4 = vld [vmem:[#allocation14_spill] sm:$0xff] (%p1107_p1) }
 0x8dc   : >> { %v2635_v51 = vadd.f32 %v2634_v52, %v5601_v33  ;;  %v3548_v7 = vpop.f32.mrb[65].mxu0  ;;  %3572 = vmatprep.subr.bf16.mxu0 (%p1107_p1), %v5905_v21  ;;  %3629 = vmatprep.subr.bf16.mxu1 (%p1107_p1), %v5905_v21 }
 0x8dd   : >> { %v2637_v46 = vpop.f32.mrb[66].mxu0 }
 0x8de   : >> { %v2638_v43 = vadd.f32 %v2637_v46, %v5603_v57  ;;  %v2658_v48 = vpop.f32.mrb[80].mxu1  ;;  %2677 = vrot.lane.b32.xlu1 %v2635_v51, %s4143_s11  ;;  %v3549_v31 = vpop.f32.mrb[67].mxu0 }
 0x8df   : >> { %v2659_v8 = vadd.f32 %v2658_v48, %v5613_v60  ;;  %v3560_v53 = vpop.f32.mrb[81].mxu1  ;;  %v1876_v19 = vpop.permute.xlu1 %1875  ;;  %3573 = vmatpush3.bf16.msra.mxu0 (%p1107_p1), %v3959_v3  ;;  %3637 = vmatpush3.bf16.msra.mxu1 (%p1107_p1), %v3959_v3 }
 0x8e0   : >> { %1899 = vst.msk [vmem:[%s5113_s9 + $0x20] sm:$0xff] %vm1894_vm7, %v1876_v19  ;;  %v2661_v13 = vpop.f32.mrb[82].mxu1  ;;  %2679 = vrot.lane.b32.xlu0 %v2638_v43, %s4143_s11  ;;  %3574 = vmatprep.subr.bf16.mxu0 (%p1107_p1), %v5905_v21 }
 0x8e1   : >> { %v3561_v33 = vpop.f32.mrb[83].mxu1  ;;  %v1878_v37 = vpop.permute.xlu0 %1877  ;;  %3630 = vmatprep.subr.bf16.mxu1 (%p1107_p1), %v5905_v21 }
 0x8e2   : >> { %1900 = vst.msk [vmem:[%s5113_s9 + $0x28] sm:$0xff] %vm1894_vm7, %v1878_v37 }
 0x8e3   : >> { %v2642_v57 = vpop.f32.mrb[68].mxu0  ;;  %3575 = vmatpush3.bf16.msra.mxu0 (%p1107_p1), %v3960_v6  ;;  %3638 = vmatpush3.bf16.msra.mxu1 (%p1107_p1), %v3960_v6  ;;  %v5908_v6 = vld [vmem:[#allocation22_spill] sm:$0xff] (%p1107_p1) }
 0x8e4   : >> { %v2643_v39 = vadd.f32 %v2642_v57, %v5605_v63  ;;  %v3552_v28 = vpop.f32.mrb[69].mxu0  ;;  %3576 = vmatprep.subr.bf16.mxu0 (%p1107_p1), %v5905_v21  ;;  %3631 = vmatprep.subr.bf16.mxu1 (%p1107_p1), %v5905_v21 }
 0x8e5   : >> { %v2645_v41 = vpop.f32.mrb[70].mxu0 }
 0x8e6   : >> { %v2646_v60 = vadd.f32 %v2645_v41, %v5607_v12  ;;  %2681 = vrot.lane.b32.xlu1 %v2643_v39, %s4143_s11  ;;  %v3553_v9 = vpop.f32.mrb[71].mxu0 }
 0x8e7   : >> { %v1880_v26 = vpop.permute.xlu1 %1879  ;;  %3577 = vmatpush3.bf16.msra.mxu0 (%p1107_p1), %v3961_v36  ;;  %3639 = vmatpush3.bf16.msra.mxu1 (%p1107_p1), %v3961_v36 }
 0x8e8   : >> { %1901 = vst.msk [vmem:[%s5113_s9 + $0x30] sm:$0xff] %vm1894_vm7, %v1880_v26  ;;  %2683 = vrot.lane.b32.xlu0 %v2646_v60, %s4143_s11 }
 0x8e9   : >> { %v1882_v62 = vpop.permute.xlu0 %1881 }
 0x8ea   : >> { %1902 = vst.msk [vmem:[%s5113_s9 + $0x38] sm:$0xff] %vm1894_vm7, %v1882_v62 }
 0x8eb   : >> { %v2650_v5 = vpop.f32.mrb[72].mxu0 }
 0x8ec   : >> { %v2651_v63 = vadd.f32 %v2650_v5, %v5609_v54  ;;  %v3556_v55 = vpop.f32.mrb[73].mxu0 }
 0x8ed   : >> { %v2653_v12 = vpop.f32.mrb[74].mxu0  ;;  %v5737_v55 = vld [vmem:[%s5849_s6] ss:$0 sm:$0xff] (%p1107_p1) }
 0x8ee   : >> { %v2654_v29 = vadd.f32 %v2653_v12, %v5611_v18  ;;  %2685 = vrot.lane.b32.xlu1 %v2651_v63, %s4143_s11  ;;  %v3557_v34 = vpop.f32.mrb[75].mxu0 }
 0x8f0   : >> { %2687 = vrot.lane.b32.xlu0 %v2654_v29, %s4143_s11 }
 0x8f2   : >> { %2689 = vrot.lane.b32.xlu1 %v2659_v8, %s4143_s11  ;;  %s4052_s11 = sshll.u32 (%p1107_p1), %s4146_s21, 4  ;;  %s4053_s11 = int_to_ptr.vmem [resolvable:$false] %s4052_s11 }
 0x8f3   : > { %s4054_s12 = scalar_lea.vmem (%p1107_p1), %s4053_s11, 4608  ;;  %p4055_p13 = scmp.lt.s32.totalorder (%p1107_p1), %s5797_s10, %s4053_s11 }
 0x8f4   : > { %p4056_p3 = scmp.lt.s32.totalorder (%p1107_p1), %s4054_s12, %s4048_s16 }
 0x8f6   : > { %p4057_p7 = por (%p1107_p1), %p4056_p3, %p4055_p13 }
 0x8f8   : > { %p4058_p9 = pnand (%p1107_p1), %p4057_p7, %p4051_p8 }
 0x918   : >> { %v1884_v23 = vpop.permute.xlu1 %1883 }
 0x919   : >> { %1903 = vst.msk [vmem:[%s5113_s9 + $0x40] sm:$0xff] %vm1894_vm7, %v1884_v23 }
 0x920   : >> { %v2271_v54 = vpop.permute.xlu0 %2270 }
 0x921   : >> { %2298 = vst.msk [vmem:[%s5113_s9] sm:$0xff] %vm2297_vm8, %v2271_v54 }
 0x922   : >> { %v2273_v18 = vpop.permute.xlu1 %2272 }
 0x923   : >> { %2299 = vst.msk [vmem:[%s5113_s9 + $0x8] sm:$0xff] %vm2297_vm8, %v2273_v18 }
 0x928   : >> { %v2275_v22 = vpop.permute.xlu0 %2274 }
 0x929   : >> { %2300 = vst.msk [vmem:[%s5113_s9 + $0x10] sm:$0xff] %vm2297_vm8, %v2275_v22 }
 0x92a   : >> { %v2277_v42 = vpop.permute.xlu1 %2276 }
 0x92b   : >> { %2301 = vst.msk [vmem:[%s5113_s9 + $0x18] sm:$0xff] %vm2297_vm8, %v2277_v42 }
 0x930   : >> { %v2279_v27 = vpop.permute.xlu0 %2278 }
 0x931   : >> { %2302 = vst.msk [vmem:[%s5113_s9 + $0x20] sm:$0xff] %vm2297_vm8, %v2279_v27 }
 0x932   : >> { %v2281_v38 = vpop.permute.xlu1 %2280 }
 0x933   : >> { %2303 = vst.msk [vmem:[%s5113_s9 + $0x28] sm:$0xff] %vm2297_vm8, %v2281_v38 }
 0x938   : >> { %v2283_v59 = vpop.permute.xlu0 %2282 }
 0x939   : >> { %2304 = vst.msk [vmem:[%s5113_s9 + $0x30] sm:$0xff] %vm2297_vm8, %v2283_v59 }
 0x93a   : >> { %v2285_v40 = vpop.permute.xlu1 %2284 }
 0x93b   : >> { %2305 = vst.msk [vmem:[%s5113_s9 + $0x38] sm:$0xff] %vm2297_vm8, %v2285_v40 }
 0x940   : >> { %v2287_v56 = vpop.permute.xlu0 %2286 }
 0x941   : >> { %2306 = vst.msk [vmem:[%s5113_s9 + $0x40] sm:$0xff] %vm2297_vm8, %v2287_v56 }
 0x948   : >> { %v2674_v44 = vpop.permute.xlu1 %2673 }
 0x949   : >> { %2701 = vst.msk [vmem:[%s5113_s9] sm:$0xff] %vm2700_vm9, %v2674_v44 }
 0x94a   : >> { %v2676_v25 = vpop.permute.xlu0 %2675 }
 0x94b   : >> { %2702 = vst.msk [vmem:[%s5113_s9 + $0x8] sm:$0xff] %vm2700_vm9, %v2676_v25 }
 0x950   : >> { %v2678_v35 = vpop.permute.xlu1 %2677 }
 0x951   : >> { %2703 = vst.msk [vmem:[%s5113_s9 + $0x10] sm:$0xff] %vm2700_vm9, %v2678_v35 }
 0x952   : >> { %v2680_v17 = vpop.permute.xlu0 %2679 }
 0x953   : >> { %2704 = vst.msk [vmem:[%s5113_s9 + $0x18] sm:$0xff] %vm2700_vm9, %v2680_v17 }
 0x958   : >> { %v2682_v14 = vpop.permute.xlu1 %2681 }
 0x959   : >> { %2705 = vst.msk [vmem:[%s5113_s9 + $0x20] sm:$0xff] %vm2700_vm9, %v2682_v14 }
 0x95a   : >> { %v2684_v20 = vpop.permute.xlu0 %2683 }
 0x95b   : >> { %2706 = vst.msk [vmem:[%s5113_s9 + $0x28] sm:$0xff] %vm2700_vm9, %v2684_v20 }
 0x95f   : > { %1109 = sbr.rel (!%p1107_p1) target bundleno = 716 (0x2cc), region = 110 }
 0x960   : >> { %v2686_v45 = vpop.permute.xlu1 %2685 }
 0x961   : >> { %2707 = vst.msk [vmem:[%s5113_s9 + $0x30] sm:$0xff] %vm2700_vm9, %v2686_v45 }
 0x962   : >> { %v2688_v30 = vpop.permute.xlu0 %2687 }
 0x963   : >> { %2708 = vst.msk [vmem:[%s5113_s9 + $0x38] sm:$0xff] %vm2700_vm9, %v2688_v30 }
 0x964   : >> { %v2690_v32 = vpop.permute.xlu1 %2689 }
 0x965   : >> { %2709 = vst.msk [vmem:[%s5113_s9 + $0x40] sm:$0xff] %vm2700_vm9, %v2690_v32 }
 0x96c   : > { %v2710_v24 = vld [vmem:[#allocation3] sm:$0xff]  ;;  %v2711_v16 = vld [vmem:[#allocation3 + $0x8] sm:$0xff]  ;;  %v2720_v58 = vld [vmem:[#allocation3 + $0x50] sm:$0xff] }
 0x96d   : > { %v2721_v47 = vld [vmem:[#allocation3 + $0x58] sm:$0xff]  ;;  %v2728_v52 = vpack.c.bf16 %v2711_v16, %v2710_v24  ;;  %v2712_v7 = vld [vmem:[#allocation3 + $0x10] sm:$0xff]  ;;  %v2722_v43 = vld [vmem:[#allocation3 + $0x60] sm:$0xff] }
 0x96e   : > { %v2733_v51 = vpack.c.bf16 %v2721_v47, %v2720_v58  ;;  %v2713_v46 = vld [vmem:[#allocation3 + $0x18] sm:$0xff]  ;;  %v2723_v48 = vld [vmem:[#allocation3 + $0x68] sm:$0xff]  ;;  %v2714_v53 = vld [vmem:[#allocation3 + $0x20] sm:$0xff] }
 0x96f   : > { %3579 = vmatmul.mubr.bf16.vlgmr.msra.gmra.mrb[0].mxu0 %v2728_v52  ;;  %v2729_v31 = vpack.c.bf16 %v2713_v46, %v2712_v7  ;;  %v2734_v8 = vpack.c.bf16 %v2723_v48, %v2722_v43  ;;  %v2715_v19 = vld [vmem:[#allocation3 + $0x28] sm:$0xff]  ;;  %v2724_v13 = vld [vmem:[#allocation3 + $0x70] sm:$0xff]  ;;  %v2725_v33 = vld [vmem:[#allocation3 + $0x78] sm:$0xff] }
 0x970   : > { %3599 = vmatmul.mubr.bf16.vlgmr.msra.gmra.mrb[0].mxu1 %v2733_v51  ;;  %3582 = vmatprep.mubr.msk.bf16.mxu0 %vm4139_vm1, %v5905_v21  ;;  %v2730_v37 = vpack.c.bf16 %v2715_v19, %v2714_v53  ;;  %v2735_v57 = vpack.c.bf16 %v2725_v33, %v2724_v13  ;;  %v2716_v39 = vld [vmem:[#allocation3 + $0x30] sm:$0xff]  ;;  %v2717_v28 = vld [vmem:[#allocation3 + $0x38] sm:$0xff]  ;;  %v2726_v41 = vld [vmem:[#allocation3 + $0x80] sm:$0xff] }
 0x971   : > { %3602 = vmatprep.mubr.msk.bf16.mxu1 %vm4139_vm1, %v5905_v21  ;;  %v2727_v60 = vld [vmem:[#allocation3 + $0x88] sm:$0xff]  ;;  %v2731_v9 = vpack.c.bf16 %v2717_v28, %v2716_v39  ;;  %v2718_v62 = vld [vmem:[#allocation3 + $0x40] sm:$0xff]  ;;  %v5909_v46 = vld [vmem:[#allocation15_spill] sm:$0xff] }
 0x972   : > { %v2736_v26 = vpack.c.bf16 %v2727_v60, %v2726_v41  ;;  %v2719_v5 = vld [vmem:[#allocation3 + $0x48] sm:$0xff]  ;;  %v5911_v33 = vld [vmem:[#allocation16_spill] sm:$0xff] }
 0x973   : > { %v2732_v63 = vpack.c.bf16 %v2719_v5, %v2718_v62 }
 0x977   : > { %3583 = vmatmul.mubr.bf16.gmra.mrb[4].mxu0 %v2729_v31 }
 0x978   : > { %3603 = vmatmul.mubr.bf16.gmra.mrb[4].mxu1 %v2734_v8  ;;  %3586 = vmatprep.mubr.msk.bf16.mxu0 %vm4139_vm1, %v5905_v21  ;;  %v5910_v8 = vld [vmem:[#allocation23_spill] sm:$0xff] }
 0x979   : > { %3606 = vmatprep.mubr.msk.bf16.mxu1 %vm4139_vm1, %v5905_v21 }
 0x97f   : > { %3587 = vmatmul.mubr.bf16.gmra.mrb[8].mxu0 %v2730_v37 }
 0x980   : > { %3607 = vmatmul.mubr.bf16.gmra.mrb[8].mxu1 %v2735_v57  ;;  %3590 = vmatprep.mubr.msk.bf16.mxu0 %vm4139_vm1, %v5905_v21  ;;  %v5912_v57 = vld [vmem:[#allocation24_spill] sm:$0xff] }
 0x981   : > { %3610 = vmatprep.mubr.msk.bf16.mxu1 %vm4139_vm1, %v5905_v21 }
 0x987   : > { %3591 = vmatmul.mubr.bf16.gmra.mrb[12].mxu0 %v2731_v9 }
 0x988   : > { %3611 = vmatmul.mubr.bf16.gmra.mrb[12].mxu1 %v2736_v26  ;;  %3594 = vmatprep.mubr.msk.bf16.mxu0 %vm4139_vm1, %v5905_v21 }
 0x98f   : > { %3595 = vmatmul.mubr.bf16.gmra.mrb[16].mxu0 %v2732_v63 }
 0xa42   : > { %v2842_v12 = vpop.f32.mrb[0].mxu0 }
 0xa43   : > { %v2882_v29 = vpop.f32.mrb[0].mxu1  ;;  %v2843_v34 = vadd.f32 %v5737_v55, %v2842_v12  ;;  %v3580_v23 = vpop.f32.mrb[1].mxu0  ;;  %v5913_v12 = vld [vmem:[#allocation17_spill] sm:$0xff] }
 0xa44   : > { %v2883_v54 = vadd.f32 %v5737_v55, %v2882_v29  ;;  %v3600_v18 = vpop.f32.mrb[1].mxu1  ;;  %v2845_v22 = vpop.f32.mrb[2].mxu0 }
 0xa45   : > { %v2885_v42 = vpop.f32.mrb[2].mxu1  ;;  %v2913_v27 = vadd.f32 %v2843_v34, %v4370_v0  ;;  %v2846_v38 = vadd.f32 %v5737_v55, %v2845_v22  ;;  %v3581_v59 = vpop.f32.mrb[3].mxu0 }
 0xa46   : > { %v2923_v40 = vadd.f32 %v2883_v54, %v4410_v10  ;;  %v2886_v56 = vadd.f32 %v5737_v55, %v2885_v42  ;;  %v3601_v44 = vpop.f32.mrb[3].mxu1  ;;  %v5914_v54 = vld [vmem:[#allocation25_spill] sm:$0xff]  ;;  %v5916_v59 = vld [vmem:[#allocation26_spill] sm:$0xff] }
 0xa47   : > { %2931 = vst [vmem:[%s4711_s19] sm:$0xff] %v2913_v27  ;;  %v2914_v25 = vadd.f32 %v2846_v38, %v4378_v2  ;;  %v5915_v27 = vld [vmem:[#allocation18_spill] sm:$0xff] }
 0xa48   : > { %2941 = vst [vmem:[%s4711_s19 + $0x50] sm:$0xff] %v2923_v40  ;;  %v2924_v35 = vadd.f32 %v2886_v56, %v4413_v11 }
 0xa49   : > { %2932 = vst [vmem:[%s4711_s19 + $0x8] sm:$0xff] %v2914_v25 }
 0xa4a   : > { %2942 = vst [vmem:[%s4711_s19 + $0x58] sm:$0xff] %v2924_v35  ;;  %v2850_v17 = vpop.f32.mrb[4].mxu0 }
 0xa4b   : > { %v2890_v0 = vpop.f32.mrb[4].mxu1  ;;  %v2851_v14 = vadd.f32 %v5737_v55, %v2850_v17  ;;  %v3584_v20 = vpop.f32.mrb[5].mxu0  ;;  %v5917_v17 = vld [vmem:[#allocation19_spill] sm:$0xff] }
 0xa4c   : > { %v2891_v10 = vadd.f32 %v5737_v55, %v2890_v0  ;;  %v3604_v45 = vpop.f32.mrb[5].mxu1  ;;  %v2853_v30 = vpop.f32.mrb[6].mxu0 }
 0xa4d   : > { %v2893_v32 = vpop.f32.mrb[6].mxu1  ;;  %v2915_v2 = vadd.f32 %v2851_v14, %v4373_v1  ;;  %v2854_v11 = vadd.f32 %v5737_v55, %v2853_v30  ;;  %v3585_v21 = vpop.f32.mrb[7].mxu0 }
 0xa4e   : > { %v2925_v50 = vadd.f32 %v2891_v10, %v5906_v15  ;;  %v2894_v61 = vadd.f32 %v5737_v55, %v2893_v32  ;;  %v3605_v49 = vpop.f32.mrb[7].mxu1  ;;  %v5918_v10 = vld [vmem:[#allocation20_spill] sm:$0xff] }
 0xa4f   : > { %2933 = vst [vmem:[%s4711_s19 + $0x10] sm:$0xff] %v2915_v2  ;;  %v2916_v3 = vadd.f32 %v2854_v11, %v5907_v4 }
 0xa50   : > { %2943 = vst [vmem:[%s4711_s19 + $0x60] sm:$0xff] %v2925_v50  ;;  %v2926_v36 = vadd.f32 %v2894_v61, %v5908_v6 }
 0xa51   : > { %2934 = vst [vmem:[%s4711_s19 + $0x18] sm:$0xff] %v2916_v3 }
 0xa52   : > { %2944 = vst [vmem:[%s4711_s19 + $0x68] sm:$0xff] %v2926_v36  ;;  %v2858_v24 = vpop.f32.mrb[8].mxu0 }
 0xa53   : > { %v2898_v1 = vpop.f32.mrb[8].mxu1  ;;  %v2859_v16 = vadd.f32 %v5737_v55, %v2858_v24  ;;  %v3588_v58 = vpop.f32.mrb[9].mxu0 }
 0xa54   : > { %v2899_v47 = vadd.f32 %v5737_v55, %v2898_v1  ;;  %v3608_v52 = vpop.f32.mrb[9].mxu1  ;;  %v2861_v51 = vpop.f32.mrb[10].mxu0 }
 0xa55   : > { %v2901_v7 = vpop.f32.mrb[10].mxu1  ;;  %v2917_v43 = vadd.f32 %v2859_v16, %v5909_v46  ;;  %v2862_v48 = vadd.f32 %v5737_v55, %v2861_v51  ;;  %v3589_v31 = vpop.f32.mrb[11].mxu0 }
 0xa56   : > { %v2927_v53 = vadd.f32 %v2899_v47, %v5910_v8  ;;  %v2902_v19 = vadd.f32 %v5737_v55, %v2901_v7  ;;  %v3609_v13 = vpop.f32.mrb[11].mxu1 }
 0xa57   : > { %2935 = vst [vmem:[%s4711_s19 + $0x20] sm:$0xff] %v2917_v43  ;;  %v2918_v37 = vadd.f32 %v2862_v48, %v5911_v33 }
 0xa58   : > { %2945 = vst [vmem:[%s4711_s19 + $0x70] sm:$0xff] %v2927_v53  ;;  %v2928_v39 = vadd.f32 %v2902_v19, %v5912_v57 }
 0xa59   : > { %2936 = vst [vmem:[%s4711_s19 + $0x28] sm:$0xff] %v2918_v37 }
 0xa5a   : > { %2946 = vst [vmem:[%s4711_s19 + $0x78] sm:$0xff] %v2928_v39  ;;  %v2866_v28 = vpop.f32.mrb[12].mxu0 }
 0xa5b   : > { %v2906_v41 = vpop.f32.mrb[12].mxu1  ;;  %v2867_v60 = vadd.f32 %v5737_v55, %v2866_v28  ;;  %v3592_v9 = vpop.f32.mrb[13].mxu0 }
 0xa5c   : > { %v2907_v26 = vadd.f32 %v5737_v55, %v2906_v41  ;;  %v3612_v62 = vpop.f32.mrb[13].mxu1  ;;  %v2869_v5 = vpop.f32.mrb[14].mxu0 }
 0xa5d   : > { %v2909_v63 = vpop.f32.mrb[14].mxu1  ;;  %v2919_v29 = vadd.f32 %v2867_v60, %v5913_v12  ;;  %v2870_v34 = vadd.f32 %v5737_v55, %v2869_v5  ;;  %v3593_v23 = vpop.f32.mrb[15].mxu0 }
 0xa5e   : > { %v2929_v18 = vadd.f32 %v2907_v26, %v5914_v54  ;;  %v2910_v22 = vadd.f32 %v5737_v55, %v2909_v63  ;;  %v3613_v42 = vpop.f32.mrb[15].mxu1 }
 0xa5f   : > { %2937 = vst [vmem:[%s4711_s19 + $0x30] sm:$0xff] %v2919_v29  ;;  %v2920_v38 = vadd.f32 %v2870_v34, %v5915_v27 }
 0xa60   : > { %2947 = vst [vmem:[%s4711_s19 + $0x80] sm:$0xff] %v2929_v18  ;;  %v2930_v40 = vadd.f32 %v2910_v22, %v5916_v59 }
 0xa61   : > { %2938 = vst [vmem:[%s4711_s19 + $0x38] sm:$0xff] %v2920_v38 }
 0xa62   : > { %2948 = vst [vmem:[%s4711_s19 + $0x88] sm:$0xff] %v2930_v40  ;;  %v2874_v56 = vpop.f32.mrb[16].mxu0 }
 0xa63   : > { %v2875_v44 = vadd.f32 %v5737_v55, %v2874_v56  ;;  %v3596_v25 = vpop.f32.mrb[17].mxu0 }
 0xa64   : > { %v2877_v35 = vpop.f32.mrb[18].mxu0 }
 0xa65   : > { %v2921_v0 = vadd.f32 %v2875_v44, %v5917_v17  ;;  %v2878_v14 = vadd.f32 %v5737_v55, %v2877_v35  ;;  %v3597_v20 = vpop.f32.mrb[19].mxu0 }
 0xa67   : > { %2939 = vst [vmem:[%s4711_s19 + $0x40] sm:$0xff] %v2921_v0  ;;  %v2922_v45 = vadd.f32 %v2878_v14, %v5918_v10 }
 0xa69   : > { %2940 = vst [vmem:[%s4711_s19 + $0x48] sm:$0xff] %v2922_v45 }
 0xa6a   : > { %4061 = shalt.err (!%p4058_p9)
}
 0xa6b   : > { %s4062_s19 = scalar_lea.hbm %s5795_s15, 2304  ;;  %s4066_s20 = scalar_lea.hbm %s5850_s7, 9216 }
 0xa6c   : > { %p4063_p12 = scmp.ne.s32.totalorder %s5795_s15, %s4062_s19  ;;  %p4067_p10 = scmp.lt.u32.totalorder %s5795_s15, %s5850_s7 }
 0xa6d   : > { %p4068_p11 = scmp.lt.u32.totalorder %s4066_s20, %s4062_s19  ;;  %p4070_p2 = scmp.lt.u32.totalorder %s4062_s19, %s5795_s15 }
 0xa6e   : > { %p4064_p0 = pnand %p4063_p12, %p4304_p6 }
 0xa6f   : > { %p4069_p1 = por %p4068_p11, %p4067_p10 }
 0xa70   : > { %p4065_p5 = pneg %p4064_p0 }
 0xa71   : > { %p4071_p4 = por %p4070_p2, %p4069_p1 }
 0xa73   : > { %p4072_p8 = pnand %p4071_p4, %p4065_p5 }
 0xa75   : > { %4075 = shalt.err (!%p4072_p8)
}
 0xa76   : > { %s4147_s23 = smov 128   ;;  %s4148_s3 = smov 8  }
 0xa77   : > { %3652 = dma.vmem_to_hbm [thread:$0]  (%p4304_p6), %s5797_s10, 2304, %s5795_s15, %s2950_s28, %s4147_s23, %s4147_s23, %s4148_s3  }
 0xa78 PF: > { %p3674_p13 = scmp.ge.s32.totalorder %s4122_s27, 2  ;;  %s2978_s16 = sand.u32 1, %s4110_s24  }
 0xa79   : > { %p5919_p3 = scmp.ne.s32.totalorder %s5875_s8, 0  ;;  %s2979_s21 = scalar_lea.sflag [#allocation6], %s2978_s16 }
 0xa7b   : > { %p3666_p7 = pnand %p3674_p13, %p5919_p3 }
 0xa7d   : > { %4105 = dma.done.wait (!%p3666_p7), %s2979_s21, 2304  }
 0xa7e   : > { %4107 = vsyncadd (!%p3666_p7), %s2979_s21, 4294964992  ;;  %p21_p9 = scmp.ge.s32.totalorder %s4291_s13, 6   ;;  %s5920_s24 = smov %s4114_s25 }
 0xa7f   : > { %s5921_s25 = smov %s4118_s26  ;;  %s5922_s26 = smov %s4300_s17 }
 0xa80   : > { %s5923_s27 = smov %s4291_s13  ;;  %23 = sbr.rel (!%p21_p9) target bundleno = 8 (0x8), region = 121 }
 0xa87   :  { %2984 = vsyncpa [#allocation5], 1 }
 0xa88   :  { %2986 = vsyncpa [#allocation5 + $0x1], 1 }
 0xa89   :  { %2987 = vsyncpa [#allocation8], 1 }
 0xa8a   :  { %2988 = vsyncpa [#allocation6], 1 }
 0xa8b   :  { %2990 = vsyncpa [#allocation6 + $0x1], 1 }

</bundles_post_ra>
